<compile_context>
chip_gen: v7x
topology: tpu7x:2x2x1
jax: 0.10.0
libtpu: 0.0.40
codegen_flags: <defaults>
</compile_context>

<pallas_src>
import jax
import jax.numpy as jnp
from jax import lax
from jax.experimental import pallas as pl
from jax.experimental.pallas import tpu as pltpu


# (name, kh, kw) — static metadata, never passed through jit.
_LAYER_SPECS = (
    ("branch1x1", 1, 1),
    ("branch7x7_1", 1, 1),
    ("branch7x7_2", 1, 7),
    ("branch7x7_3", 7, 1),
    ("branch7x7dbl_1", 1, 1),
    ("branch7x7dbl_2", 7, 1),
    ("branch7x7dbl_3", 1, 7),
    ("branch7x7dbl_4", 7, 1),
    ("branch7x7dbl_5", 1, 7),
    ("branch_pool", 1, 1),
)

_BN_EPS = 1e-3


# ----------------------------------------------------------------------------
# Fused InceptionC Pallas kernel (one grid step == one NHWC image)
# ----------------------------------------------------------------------------
def _make_inception_c_kernel(H, W):

    def _affine_relu(y, scale_ref, bias_ref, extra_scale=None):
        s = scale_ref[...]
        if extra_scale is not None:
            s = s * extra_scale
        return jnp.maximum(y * s + bias_ref[...], 0.0)

    def _conv1x1(x_mat, w_ref, scale_ref, bias_ref, extra_scale=None):
        # x_mat: (H*W, Cin); w_ref: (Cin, Cout)
        y = jnp.dot(x_mat, w_ref[...], preferred_element_type=jnp.float32)
        return _affine_relu(y, scale_ref, bias_ref, extra_scale)

    def _pad_hw(x, ph, pw):
        # Zero padding of a VMEM value (no HBM pass) via concatenation.
        h, w, c = x.shape
        if ph:
            z = jnp.zeros((ph, w, c), x.dtype)
            x = jnp.concatenate([z, x, z], axis=0)
        if pw:
            z = jnp.zeros((x.shape[0], pw, c), x.dtype)
            x = jnp.concatenate([z, x, z], axis=1)
        return x

    def _conv_taps(x_hwc, w_ref, scale_ref, bias_ref, kh, kw):
        # Same-padded (kh, kw) conv as ONE matmul via im2col along K.
        cin = x_hwc.shape[-1]
        ph, pw = (kh - 1) // 2, (kw - 1) // 2
        xp = _pad_hw(x_hwc, ph, pw)
        taps = [
            lax.slice(xp, (dy, dx, 0), (dy + H, dx + W, cin))
            for dy in range(kh) for dx in range(kw)
        ]
        patches = jnp.concatenate(taps, axis=-1).reshape(H * W, kh * kw * cin)
        y = jnp.dot(patches, w_ref[...], preferred_element_type=jnp.float32)
        return _affine_relu(y, scale_ref, bias_ref)

    def kernel(x_ref, *rest):
        # x_ref: (1, H, W, Cin); rest = 10 x (w, scale, bias) refs + out ref
        o_ref = rest[-1]
        prefs = rest[:-1]

        def layer_refs(i):
            return prefs[3 * i], prefs[3 * i + 1], prefs[3 * i + 2]

        x = x_ref[0]                                  # (H, W, Cin)
        cin = x.shape[-1]
        x_mat = x.reshape(H * W, cin)

        # --- branch1x1 ------------------------------------------------------
        b1 = _conv1x1(x_mat, *layer_refs(0))

        # --- branch7x7: 1x1 -> 1x7 -> 7x1 ------------------------------------
        t = _conv1x1(x_mat, *layer_refs(1))
        c7 = t.shape[-1]
        t = _conv_taps(t.reshape(H, W, c7), *layer_refs(2), 1, 7)
        b7 = _conv_taps(t.reshape(H, W, c7), *layer_refs(3), 7, 1)

        # --- branch7x7dbl: 1x1 -> 7x1 -> 1x7 -> 7x1 -> 1x7 -------------------
        t = _conv1x1(x_mat, *layer_refs(4))
        t = _conv_taps(t.reshape(H, W, c7), *layer_refs(5), 7, 1)
        t = _conv_taps(t.reshape(H, W, c7), *layer_refs(6), 1, 7)
        t = _conv_taps(t.reshape(H, W, c7), *layer_refs(7), 7, 1)
        b7d = _conv_taps(t.reshape(H, W, c7), *layer_refs(8), 1, 7)

        # --- branch_pool: 3x3 avgpool (pad=1, count_include_pad) -> 1x1 ------
        xp = _pad_hw(x.astype(jnp.float32), 1, 1)
        psum = jnp.zeros((H, W, cin), jnp.float32)
        for dy in range(3):
            for dx in range(3):
                psum = psum + lax.slice(xp, (dy, dx, 0), (dy + H, dx + W, cin))
        # 1/9 pool normalization folded into the BN scale of the 1x1 conv.
        bp = _conv1x1(psum.reshape(H * W, cin), *layer_refs(9),
                      extra_scale=1.0 / 9.0)

        # Channel concat of the 4 branches, stored lane-dense in one shot.
        out = jnp.concatenate([b1, b7, b7d, bp], axis=-1)     # (H*W, 4*192)
        o_ref[...] = out.reshape(1, H, W, out.shape[-1]).astype(o_ref.dtype)

    return kernel


# ----------------------------------------------------------------------------
# Wrapper (NCHW in / NCHW out, matching the PyTorch module)
# ----------------------------------------------------------------------------
@jax.jit
def inception_c_forward(params, x_nchw):
    x = jnp.transpose(x_nchw, (0, 2, 3, 1))            # NCHW -> NHWC
    N, H, W, Cin = x.shape

    flat_args = []
    in_specs = [pl.BlockSpec((1, H, W, Cin), lambda n: (n, 0, 0, 0))]
    for name, kh, kw in _LAYER_SPECS:
        p = params[name]
        cin_l, cout = p["w"].shape[2], p["w"].shape[3]
        w_flat = p["w"].reshape(kh * kw * cin_l, cout)          # im2col weight
        scale = p["scale"].reshape(1, cout).astype(jnp.float32)
        bias = p["bias"].reshape(1, cout).astype(jnp.float32)
        flat_args += [w_flat, scale, bias]
        in_specs += [
            pl.BlockSpec((kh * kw * cin_l, cout), lambda n: (0, 0)),
            pl.BlockSpec((1, cout), lambda n: (0, 0)),
            pl.BlockSpec((1, cout), lambda n: (0, 0)),
        ]

    cout_total = (params["branch1x1"]["w"].shape[3]
                  + params["branch7x7_3"]["w"].shape[3]
                  + params["branch7x7dbl_5"]["w"].shape[3]
                  + params["branch_pool"]["w"].shape[3])

    out = pl.pallas_call(
        _make_inception_c_kernel(H, W),
        out_shape=jax.ShapeDtypeStruct((N, H, W, cout_total), x.dtype),
        grid=(N,),
        in_specs=in_specs,
        out_specs=pl.BlockSpec((1, H, W, cout_total), lambda n: (n, 0, 0, 0)),
        compiler_params=pltpu.CompilerParams(
            dimension_semantics=("parallel",)),
    )(x, *flat_args)
    return jnp.transpose(out, (0, 3, 1, 2))             # NHWC -> NCHW


# ----------------------------------------------------------------------------
# Parameter construction (deterministic, synthetic; BN folded into scale/bias)
# ----------------------------------------------------------------------------
def _make_basic_conv_params(key, cin, cout, kh, kw):
    k_w, k_g, k_b, k_m, k_v = jax.random.split(key, 5)
    w = 0.1 * jax.random.normal(k_w, (kh, kw, cin, cout), jnp.float32)  # HWIO
    gamma = 1.0 + 0.1 * jax.random.normal(k_g, (cout,), jnp.float32)
    beta = 0.1 * jax.random.normal(k_b, (cout,), jnp.float32)
    running_mean = 0.1 * jax.random.normal(k_m, (cout,), jnp.float32)
    running_var = jnp.abs(
        1.0 + 0.1 * jax.random.normal(k_v, (cout,), jnp.float32))
    scale = gamma / jnp.sqrt(running_var + _BN_EPS)
    bias = beta - running_mean * scale
    # Arrays only — safe to pass through jax.jit.
    return {"w": w, "scale": scale, "bias": bias}


def make_inception_c_params(key, in_channels, channels_7x7):
    c7 = channels_7x7
    io = {
        "branch1x1": (in_channels, 192),
        "branch7x7_1": (in_channels, c7),
        "branch7x7_2": (c7, c7),
        "branch7x7_3": (c7, 192),
        "branch7x7dbl_1": (in_channels, c7),
        "branch7x7dbl_2": (c7, c7),
        "branch7x7dbl_3": (c7, c7),
        "branch7x7dbl_4": (c7, c7),
        "branch7x7dbl_5": (c7, 192),
        "branch_pool": (in_channels, 192),
    }
    keys = jax.random.split(key, len(_LAYER_SPECS))
    return {
        name: _make_basic_conv_params(k, io[name][0], io[name][1], kh, kw)
        for k, (name, kh, kw) in zip(keys, _LAYER_SPECS)
    }


# ----------------------------------------------------------------------------
# Pure-JAX reference (sanity check)
# ----------------------------------------------------------------------------
def _conv_bn_relu_ref(x_nhwc, p, kh, kw):
    ph, pw = (kh - 1) // 2, (kw - 1) // 2
    y = lax.conv_general_dilated(
        x_nhwc, p["w"], window_strides=(1, 1),
        padding=((ph, ph), (pw, pw)),
        dimension_numbers=("NHWC", "HWIO", "NHWC"))
    y = y * p["scale"] + p["bias"]
    return jnp.maximum(y, 0.0)


def inception_c_ref(params, x_nchw):
    sp = {name: (kh, kw) for name, kh, kw in _LAYER_SPECS}
    x = jnp.transpose(x_nchw, (0, 2, 3, 1))

    def conv(name, v):
        kh, kw = sp[name]
        return _conv_bn_relu_ref(v, params[name], kh, kw)

    b1 = conv("branch1x1", x)
    b7 = conv("branch7x7_3", conv("branch7x7_2", conv("branch7x7_1", x)))
    b7d = conv("branch7x7dbl_5",
               conv("branch7x7dbl_4",
                    conv("branch7x7dbl_3",
                         conv("branch7x7dbl_2",
                              conv("branch7x7dbl_1", x)))))
    xp = jnp.pad(x, ((0, 0), (1, 1), (1, 1), (0, 0)))
    bp = lax.reduce_window(xp, 0.0, lax.add, (1, 3, 3, 1), (1, 1, 1, 1),
                           "VALID") / 9.0
    bp = conv("branch_pool", bp)
    out = jnp.concatenate([b1, b7, b7d, bp], axis=-1)
    return jnp.transpose(out, (0, 3, 1, 2))


# ----------------------------------------------------------------------------
if __name__ == "__main__":
    key = jax.random.PRNGKey(0)
    k_params, k_x = jax.random.split(key)

    # Small shapes consistent with InceptionC (original: 768 ch, 17x17, c7=128)
    N, IN_CH, H, W = 2, 64, 8, 8
    CH_7X7 = 32

    params = make_inception_c_params(k_params, IN_CH, CH_7X7)
    x = jax.random.normal(k_x, (N, IN_CH, H, W), jnp.float32)  # NCHW like torch

    out = jax.block_until_ready(inception_c_forward(params, x))
    assert out.shape == (N, 192 * 4, H, W), out.shape

    ref = jax.block_until_ready(inception_c_ref(params, x))
    err = float(jnp.max(jnp.abs(out - ref)))
    if not err < 1e-2:
        raise AssertionError(f"mismatch vs reference, max abs err = {err}")

    print("KERNEL_OK")
</pallas_src>

<mosaic_0001>
module attributes {stable_mosaic.version = 11 : i64} {
  func.func @kernel(%arg0: i32, %arg1: memref<1x8x8x64xf32, #tpu.memory_space<vmem>>, %arg2: memref<64x192xf32, #tpu.memory_space<vmem>>, %arg3: memref<1x192xf32, #tpu.memory_space<vmem>>, %arg4: memref<1x192xf32, #tpu.memory_space<vmem>>, %arg5: memref<64x32xf32, #tpu.memory_space<vmem>>, %arg6: memref<1x32xf32, #tpu.memory_space<vmem>>, %arg7: memref<1x32xf32, #tpu.memory_space<vmem>>, %arg8: memref<224x32xf32, #tpu.memory_space<vmem>>, %arg9: memref<1x32xf32, #tpu.memory_space<vmem>>, %arg10: memref<1x32xf32, #tpu.memory_space<vmem>>, %arg11: memref<224x192xf32, #tpu.memory_space<vmem>>, %arg12: memref<1x192xf32, #tpu.memory_space<vmem>>, %arg13: memref<1x192xf32, #tpu.memory_space<vmem>>, %arg14: memref<64x32xf32, #tpu.memory_space<vmem>>, %arg15: memref<1x32xf32, #tpu.memory_space<vmem>>, %arg16: memref<1x32xf32, #tpu.memory_space<vmem>>, %arg17: memref<224x32xf32, #tpu.memory_space<vmem>>, %arg18: memref<1x32xf32, #tpu.memory_space<vmem>>, %arg19: memref<1x32xf32, #tpu.memory_space<vmem>>, %arg20: memref<224x32xf32, #tpu.memory_space<vmem>>, %arg21: memref<1x32xf32, #tpu.memory_space<vmem>>, %arg22: memref<1x32xf32, #tpu.memory_space<vmem>>, %arg23: memref<224x32xf32, #tpu.memory_space<vmem>>, %arg24: memref<1x32xf32, #tpu.memory_space<vmem>>, %arg25: memref<1x32xf32, #tpu.memory_space<vmem>>, %arg26: memref<224x192xf32, #tpu.memory_space<vmem>>, %arg27: memref<1x192xf32, #tpu.memory_space<vmem>>, %arg28: memref<1x192xf32, #tpu.memory_space<vmem>>, %arg29: memref<64x192xf32, #tpu.memory_space<vmem>>, %arg30: memref<1x192xf32, #tpu.memory_space<vmem>>, %arg31: memref<1x192xf32, #tpu.memory_space<vmem>>, %arg32: memref<1x8x8x768xf32, #tpu.memory_space<vmem>>) attributes {dimension_semantics = [#tpu.dimension_semantics<parallel>], iteration_bounds = array<i64: 2>, scalar_prefetch = 0 : i64, scratch_operands = 0 : i64, tpu.core_type = #tpu.core_type<tc>, window_params = [{transform_indices = @transform_0, window_bounds = array<i64: 1, 8, 8, 64>}, {pipeline_mode = #tpu.pipeline_mode<synchronous>, transform_indices = @transform_1, window_bounds = array<i64: 64, 192>}, {pipeline_mode = #tpu.pipeline_mode<synchronous>, transform_indices = @transform_2, window_bounds = array<i64: 1, 192>}, {pipeline_mode = #tpu.pipeline_mode<synchronous>, transform_indices = @transform_3, window_bounds = array<i64: 1, 192>}, {pipeline_mode = #tpu.pipeline_mode<synchronous>, transform_indices = @transform_4, window_bounds = array<i64: 64, 32>}, {pipeline_mode = #tpu.pipeline_mode<synchronous>, transform_indices = @transform_5, window_bounds = array<i64: 1, 32>}, {pipeline_mode = #tpu.pipeline_mode<synchronous>, transform_indices = @transform_6, window_bounds = array<i64: 1, 32>}, {pipeline_mode = #tpu.pipeline_mode<synchronous>, transform_indices = @transform_7, window_bounds = array<i64: 224, 32>}, {pipeline_mode = #tpu.pipeline_mode<synchronous>, transform_indices = @transform_8, window_bounds = array<i64: 1, 32>}, {pipeline_mode = #tpu.pipeline_mode<synchronous>, transform_indices = @transform_9, window_bounds = array<i64: 1, 32>}, {pipeline_mode = #tpu.pipeline_mode<synchronous>, transform_indices = @transform_10, window_bounds = array<i64: 224, 192>}, {pipeline_mode = #tpu.pipeline_mode<synchronous>, transform_indices = @transform_11, window_bounds = array<i64: 1, 192>}, {pipeline_mode = #tpu.pipeline_mode<synchronous>, transform_indices = @transform_12, window_bounds = array<i64: 1, 192>}, {pipeline_mode = #tpu.pipeline_mode<synchronous>, transform_indices = @transform_13, window_bounds = array<i64: 64, 32>}, {pipeline_mode = #tpu.pipeline_mode<synchronous>, transform_indices = @transform_14, window_bounds = array<i64: 1, 32>}, {pipeline_mode = #tpu.pipeline_mode<synchronous>, transform_indices = @transform_15, window_bounds = array<i64: 1, 32>}, {pipeline_mode = #tpu.pipeline_mode<synchronous>, transform_indices = @transform_16, window_bounds = array<i64: 224, 32>}, {pipeline_mode = #tpu.pipeline_mode<synchronous>, transform_indices = @transform_17, window_bounds = array<i64: 1, 32>}, {pipeline_mode = #tpu.pipeline_mode<synchronous>, transform_indices = @transform_18, window_bounds = array<i64: 1, 32>}, {pipeline_mode = #tpu.pipeline_mode<synchronous>, transform_indices = @transform_19, window_bounds = array<i64: 224, 32>}, {pipeline_mode = #tpu.pipeline_mode<synchronous>, transform_indices = @transform_20, window_bounds = array<i64: 1, 32>}, {pipeline_mode = #tpu.pipeline_mode<synchronous>, transform_indices = @transform_21, window_bounds = array<i64: 1, 32>}, {pipeline_mode = #tpu.pipeline_mode<synchronous>, transform_indices = @transform_22, window_bounds = array<i64: 224, 32>}, {pipeline_mode = #tpu.pipeline_mode<synchronous>, transform_indices = @transform_23, window_bounds = array<i64: 1, 32>}, {pipeline_mode = #tpu.pipeline_mode<synchronous>, transform_indices = @transform_24, window_bounds = array<i64: 1, 32>}, {pipeline_mode = #tpu.pipeline_mode<synchronous>, transform_indices = @transform_25, window_bounds = array<i64: 224, 192>}, {pipeline_mode = #tpu.pipeline_mode<synchronous>, transform_indices = @transform_26, window_bounds = array<i64: 1, 192>}, {pipeline_mode = #tpu.pipeline_mode<synchronous>, transform_indices = @transform_27, window_bounds = array<i64: 1, 192>}, {pipeline_mode = #tpu.pipeline_mode<synchronous>, transform_indices = @transform_28, window_bounds = array<i64: 64, 192>}, {pipeline_mode = #tpu.pipeline_mode<synchronous>, transform_indices = @transform_29, window_bounds = array<i64: 1, 192>}, {pipeline_mode = #tpu.pipeline_mode<synchronous>, transform_indices = @transform_30, window_bounds = array<i64: 1, 192>}, {transform_indices = @transform_31, window_bounds = array<i64: 1, 8, 8, 768>}]} {
    %c0 = arith.constant 0 : index
    %c0_0 = arith.constant 0 : index
    %c0_1 = arith.constant 0 : index
    %c0_2 = arith.constant 0 : index
    %0 = vector.load %arg1[%c0, %c0_0, %c0_1, %c0_2] : memref<1x8x8x64xf32, #tpu.memory_space<vmem>>, vector<1x8x8x64xf32>
    %1 = vector.shape_cast %0 : vector<1x8x8x64xf32> to vector<8x8x64xf32>
    %2 = vector.shape_cast %1 : vector<8x8x64xf32> to vector<64x64xf32>
    %c0_3 = arith.constant 0 : index
    %c0_4 = arith.constant 0 : index
    %3 = vector.load %arg2[%c0_3, %c0_4] : memref<64x192xf32, #tpu.memory_space<vmem>>, vector<64x192xf32>
    %cst = arith.constant dense<0.000000e+00> : vector<64x192xf32>
    %4 = tpu.matmul %2, %3, %cst {dimension_numbers = #tpu.dot_dimension_numbers<[1], [0], [0], [1], [0, 0, 1, 1], [], []>} : vector<64x64xf32>, vector<64x192xf32>, vector<64x192xf32> -> vector<64x192xf32>
    %c0_5 = arith.constant 0 : index
    %c0_6 = arith.constant 0 : index
    %5 = vector.load %arg3[%c0_5, %c0_6] : memref<1x192xf32, #tpu.memory_space<vmem>>, vector<1x192xf32>
    %6 = vector.broadcast %5 : vector<1x192xf32> to vector<64x192xf32>
    %7 = arith.mulf %4, %6 : vector<64x192xf32>
    %c0_7 = arith.constant 0 : index
    %c0_8 = arith.constant 0 : index
    %8 = vector.load %arg4[%c0_7, %c0_8] : memref<1x192xf32, #tpu.memory_space<vmem>>, vector<1x192xf32>
    %9 = vector.broadcast %8 : vector<1x192xf32> to vector<64x192xf32>
    %10 = arith.addf %7, %9 : vector<64x192xf32>
    %cst_9 = arith.constant 0.000000e+00 : f32
    %11 = vector.broadcast %cst_9 : f32 to vector<64x192xf32>
    %12 = arith.maximumf %10, %11 : vector<64x192xf32>
    %c0_10 = arith.constant 0 : index
    %c0_11 = arith.constant 0 : index
    %13 = vector.load %arg5[%c0_10, %c0_11] : memref<64x32xf32, #tpu.memory_space<vmem>>, vector<64x32xf32>
    %cst_12 = arith.constant dense<0.000000e+00> : vector<64x32xf32>
    %14 = tpu.matmul %2, %13, %cst_12 {dimension_numbers = #tpu.dot_dimension_numbers<[1], [0], [0], [1], [0, 0, 1, 1], [], []>} : vector<64x64xf32>, vector<64x32xf32>, vector<64x32xf32> -> vector<64x32xf32>
    %c0_13 = arith.constant 0 : index
    %c0_14 = arith.constant 0 : index
    %15 = vector.load %arg6[%c0_13, %c0_14] : memref<1x32xf32, #tpu.memory_space<vmem>>, vector<1x32xf32>
    %16 = vector.broadcast %15 : vector<1x32xf32> to vector<64x32xf32>
    %17 = arith.mulf %14, %16 : vector<64x32xf32>
    %c0_15 = arith.constant 0 : index
    %c0_16 = arith.constant 0 : index
    %18 = vector.load %arg7[%c0_15, %c0_16] : memref<1x32xf32, #tpu.memory_space<vmem>>, vector<1x32xf32>
    %19 = vector.broadcast %18 : vector<1x32xf32> to vector<64x32xf32>
    %20 = arith.addf %17, %19 : vector<64x32xf32>
    %cst_17 = arith.constant 0.000000e+00 : f32
    %21 = vector.broadcast %cst_17 : f32 to vector<64x32xf32>
    %22 = arith.maximumf %20, %21 : vector<64x32xf32>
    %23 = vector.shape_cast %22 : vector<64x32xf32> to vector<8x8x32xf32>
    %cst_18 = arith.constant 0.000000e+00 : f32
    %24 = vector.broadcast %cst_18 : f32 to vector<8x3x32xf32>
    %25 = tpu.concatenate %24, %23, %24 in 1 : vector<8x3x32xf32>, vector<8x8x32xf32>, vector<8x3x32xf32> -> vector<8x14x32xf32>
    %26 = vector.extract_strided_slice %25 {offsets = [0, 0, 0], sizes = [8, 8, 32], strides = [1, 1, 1]} : vector<8x14x32xf32> to vector<8x8x32xf32>
    %27 = vector.extract_strided_slice %25 {offsets = [0, 1, 0], sizes = [8, 8, 32], strides = [1, 1, 1]} : vector<8x14x32xf32> to vector<8x8x32xf32>
    %28 = vector.extract_strided_slice %25 {offsets = [0, 2, 0], sizes = [8, 8, 32], strides = [1, 1, 1]} : vector<8x14x32xf32> to vector<8x8x32xf32>
    %29 = vector.extract_strided_slice %25 {offsets = [0, 3, 0], sizes = [8, 8, 32], strides = [1, 1, 1]} : vector<8x14x32xf32> to vector<8x8x32xf32>
    %30 = vector.extract_strided_slice %25 {offsets = [0, 4, 0], sizes = [8, 8, 32], strides = [1, 1, 1]} : vector<8x14x32xf32> to vector<8x8x32xf32>
    %31 = vector.extract_strided_slice %25 {offsets = [0, 5, 0], sizes = [8, 8, 32], strides = [1, 1, 1]} : vector<8x14x32xf32> to vector<8x8x32xf32>
    %32 = vector.extract_strided_slice %25 {offsets = [0, 6, 0], sizes = [8, 8, 32], strides = [1, 1, 1]} : vector<8x14x32xf32> to vector<8x8x32xf32>
    %33 = tpu.concatenate %26, %27, %28, %29, %30, %31, %32 in 2 : vector<8x8x32xf32>, vector<8x8x32xf32>, vector<8x8x32xf32>, vector<8x8x32xf32>, vector<8x8x32xf32>, vector<8x8x32xf32>, vector<8x8x32xf32> -> vector<8x8x224xf32>
    %34 = vector.shape_cast %33 : vector<8x8x224xf32> to vector<64x224xf32>
    %c0_19 = arith.constant 0 : index
    %c0_20 = arith.constant 0 : index
    %35 = vector.load %arg8[%c0_19, %c0_20] : memref<224x32xf32, #tpu.memory_space<vmem>>, vector<224x32xf32>
    %cst_21 = arith.constant dense<0.000000e+00> : vector<64x32xf32>
    %36 = tpu.matmul %34, %35, %cst_21 {dimension_numbers = #tpu.dot_dimension_numbers<[1], [0], [0], [1], [0, 0, 1, 1], [], []>} : vector<64x224xf32>, vector<224x32xf32>, vector<64x32xf32> -> vector<64x32xf32>
    %c0_22 = arith.constant 0 : index
    %c0_23 = arith.constant 0 : index
    %37 = vector.load %arg9[%c0_22, %c0_23] : memref<1x32xf32, #tpu.memory_space<vmem>>, vector<1x32xf32>
    %38 = vector.broadcast %37 : vector<1x32xf32> to vector<64x32xf32>
    %39 = arith.mulf %36, %38 : vector<64x32xf32>
    %c0_24 = arith.constant 0 : index
    %c0_25 = arith.constant 0 : index
    %40 = vector.load %arg10[%c0_24, %c0_25] : memref<1x32xf32, #tpu.memory_space<vmem>>, vector<1x32xf32>
    %41 = vector.broadcast %40 : vector<1x32xf32> to vector<64x32xf32>
    %42 = arith.addf %39, %41 : vector<64x32xf32>
    %cst_26 = arith.constant 0.000000e+00 : f32
    %43 = vector.broadcast %cst_26 : f32 to vector<64x32xf32>
    %44 = arith.maximumf %42, %43 : vector<64x32xf32>
    %45 = vector.shape_cast %44 : vector<64x32xf32> to vector<8x8x32xf32>
    %cst_27 = arith.constant 0.000000e+00 : f32
    %46 = vector.broadcast %cst_27 : f32 to vector<3x8x32xf32>
    %47 = tpu.concatenate %46, %45, %46 in 0 : vector<3x8x32xf32>, vector<8x8x32xf32>, vector<3x8x32xf32> -> vector<14x8x32xf32>
    %48 = vector.extract_strided_slice %47 {offsets = [0, 0, 0], sizes = [8, 8, 32], strides = [1, 1, 1]} : vector<14x8x32xf32> to vector<8x8x32xf32>
    %49 = vector.extract_strided_slice %47 {offsets = [1, 0, 0], sizes = [8, 8, 32], strides = [1, 1, 1]} : vector<14x8x32xf32> to vector<8x8x32xf32>
    %50 = vector.extract_strided_slice %47 {offsets = [2, 0, 0], sizes = [8, 8, 32], strides = [1, 1, 1]} : vector<14x8x32xf32> to vector<8x8x32xf32>
    %51 = vector.extract_strided_slice %47 {offsets = [3, 0, 0], sizes = [8, 8, 32], strides = [1, 1, 1]} : vector<14x8x32xf32> to vector<8x8x32xf32>
    %52 = vector.extract_strided_slice %47 {offsets = [4, 0, 0], sizes = [8, 8, 32], strides = [1, 1, 1]} : vector<14x8x32xf32> to vector<8x8x32xf32>
    %53 = vector.extract_strided_slice %47 {offsets = [5, 0, 0], sizes = [8, 8, 32], strides = [1, 1, 1]} : vector<14x8x32xf32> to vector<8x8x32xf32>
    %54 = vector.extract_strided_slice %47 {offsets = [6, 0, 0], sizes = [8, 8, 32], strides = [1, 1, 1]} : vector<14x8x32xf32> to vector<8x8x32xf32>
    %55 = tpu.concatenate %48, %49, %50, %51, %52, %53, %54 in 2 : vector<8x8x32xf32>, vector<8x8x32xf32>, vector<8x8x32xf32>, vector<8x8x32xf32>, vector<8x8x32xf32>, vector<8x8x32xf32>, vector<8x8x32xf32> -> vector<8x8x224xf32>
    %56 = vector.shape_cast %55 : vector<8x8x224xf32> to vector<64x224xf32>
    %c0_28 = arith.constant 0 : index
    %c0_29 = arith.constant 0 : index
    %57 = vector.load %arg11[%c0_28, %c0_29] : memref<224x192xf32, #tpu.memory_space<vmem>>, vector<224x192xf32>
    %cst_30 = arith.constant dense<0.000000e+00> : vector<64x192xf32>
    %58 = tpu.matmul %56, %57, %cst_30 {dimension_numbers = #tpu.dot_dimension_numbers<[1], [0], [0], [1], [0, 0, 1, 1], [], []>} : vector<64x224xf32>, vector<224x192xf32>, vector<64x192xf32> -> vector<64x192xf32>
    %c0_31 = arith.constant 0 : index
    %c0_32 = arith.constant 0 : index
    %59 = vector.load %arg12[%c0_31, %c0_32] : memref<1x192xf32, #tpu.memory_space<vmem>>, vector<1x192xf32>
    %60 = vector.broadcast %59 : vector<1x192xf32> to vector<64x192xf32>
    %61 = arith.mulf %58, %60 : vector<64x192xf32>
    %c0_33 = arith.constant 0 : index
    %c0_34 = arith.constant 0 : index
    %62 = vector.load %arg13[%c0_33, %c0_34] : memref<1x192xf32, #tpu.memory_space<vmem>>, vector<1x192xf32>
    %63 = vector.broadcast %62 : vector<1x192xf32> to vector<64x192xf32>
    %64 = arith.addf %61, %63 : vector<64x192xf32>
    %cst_35 = arith.constant 0.000000e+00 : f32
    %65 = vector.broadcast %cst_35 : f32 to vector<64x192xf32>
    %66 = arith.maximumf %64, %65 : vector<64x192xf32>
    %c0_36 = arith.constant 0 : index
    %c0_37 = arith.constant 0 : index
    %67 = vector.load %arg14[%c0_36, %c0_37] : memref<64x32xf32, #tpu.memory_space<vmem>>, vector<64x32xf32>
    %cst_38 = arith.constant dense<0.000000e+00> : vector<64x32xf32>
    %68 = tpu.matmul %2, %67, %cst_38 {dimension_numbers = #tpu.dot_dimension_numbers<[1], [0], [0], [1], [0, 0, 1, 1], [], []>} : vector<64x64xf32>, vector<64x32xf32>, vector<64x32xf32> -> vector<64x32xf32>
    %c0_39 = arith.constant 0 : index
    %c0_40 = arith.constant 0 : index
    %69 = vector.load %arg15[%c0_39, %c0_40] : memref<1x32xf32, #tpu.memory_space<vmem>>, vector<1x32xf32>
    %70 = vector.broadcast %69 : vector<1x32xf32> to vector<64x32xf32>
    %71 = arith.mulf %68, %70 : vector<64x32xf32>
    %c0_41 = arith.constant 0 : index
    %c0_42 = arith.constant 0 : index
    %72 = vector.load %arg16[%c0_41, %c0_42] : memref<1x32xf32, #tpu.memory_space<vmem>>, vector<1x32xf32>
    %73 = vector.broadcast %72 : vector<1x32xf32> to vector<64x32xf32>
    %74 = arith.addf %71, %73 : vector<64x32xf32>
    %cst_43 = arith.constant 0.000000e+00 : f32
    %75 = vector.broadcast %cst_43 : f32 to vector<64x32xf32>
    %76 = arith.maximumf %74, %75 : vector<64x32xf32>
    %77 = vector.shape_cast %76 : vector<64x32xf32> to vector<8x8x32xf32>
    %cst_44 = arith.constant 0.000000e+00 : f32
    %78 = vector.broadcast %cst_44 : f32 to vector<3x8x32xf32>
    %79 = tpu.concatenate %78, %77, %78 in 0 : vector<3x8x32xf32>, vector<8x8x32xf32>, vector<3x8x32xf32> -> vector<14x8x32xf32>
    %80 = vector.extract_strided_slice %79 {offsets = [0, 0, 0], sizes = [8, 8, 32], strides = [1, 1, 1]} : vector<14x8x32xf32> to vector<8x8x32xf32>
    %81 = vector.extract_strided_slice %79 {offsets = [1, 0, 0], sizes = [8, 8, 32], strides = [1, 1, 1]} : vector<14x8x32xf32> to vector<8x8x32xf32>
    %82 = vector.extract_strided_slice %79 {offsets = [2, 0, 0], sizes = [8, 8, 32], strides = [1, 1, 1]} : vector<14x8x32xf32> to vector<8x8x32xf32>
    %83 = vector.extract_strided_slice %79 {offsets = [3, 0, 0], sizes = [8, 8, 32], strides = [1, 1, 1]} : vector<14x8x32xf32> to vector<8x8x32xf32>
    %84 = vector.extract_strided_slice %79 {offsets = [4, 0, 0], sizes = [8, 8, 32], strides = [1, 1, 1]} : vector<14x8x32xf32> to vector<8x8x32xf32>
    %85 = vector.extract_strided_slice %79 {offsets = [5, 0, 0], sizes = [8, 8, 32], strides = [1, 1, 1]} : vector<14x8x32xf32> to vector<8x8x32xf32>
    %86 = vector.extract_strided_slice %79 {offsets = [6, 0, 0], sizes = [8, 8, 32], strides = [1, 1, 1]} : vector<14x8x32xf32> to vector<8x8x32xf32>
    %87 = tpu.concatenate %80, %81, %82, %83, %84, %85, %86 in 2 : vector<8x8x32xf32>, vector<8x8x32xf32>, vector<8x8x32xf32>, vector<8x8x32xf32>, vector<8x8x32xf32>, vector<8x8x32xf32>, vector<8x8x32xf32> -> vector<8x8x224xf32>
    %88 = vector.shape_cast %87 : vector<8x8x224xf32> to vector<64x224xf32>
    %c0_45 = arith.constant 0 : index
    %c0_46 = arith.constant 0 : index
    %89 = vector.load %arg17[%c0_45, %c0_46] : memref<224x32xf32, #tpu.memory_space<vmem>>, vector<224x32xf32>
    %cst_47 = arith.constant dense<0.000000e+00> : vector<64x32xf32>
    %90 = tpu.matmul %88, %89, %cst_47 {dimension_numbers = #tpu.dot_dimension_numbers<[1], [0], [0], [1], [0, 0, 1, 1], [], []>} : vector<64x224xf32>, vector<224x32xf32>, vector<64x32xf32> -> vector<64x32xf32>
    %c0_48 = arith.constant 0 : index
    %c0_49 = arith.constant 0 : index
    %91 = vector.load %arg18[%c0_48, %c0_49] : memref<1x32xf32, #tpu.memory_space<vmem>>, vector<1x32xf32>
    %92 = vector.broadcast %91 : vector<1x32xf32> to vector<64x32xf32>
    %93 = arith.mulf %90, %92 : vector<64x32xf32>
    %c0_50 = arith.constant 0 : index
    %c0_51 = arith.constant 0 : index
    %94 = vector.load %arg19[%c0_50, %c0_51] : memref<1x32xf32, #tpu.memory_space<vmem>>, vector<1x32xf32>
    %95 = vector.broadcast %94 : vector<1x32xf32> to vector<64x32xf32>
    %96 = arith.addf %93, %95 : vector<64x32xf32>
    %cst_52 = arith.constant 0.000000e+00 : f32
    %97 = vector.broadcast %cst_52 : f32 to vector<64x32xf32>
    %98 = arith.maximumf %96, %97 : vector<64x32xf32>
    %99 = vector.shape_cast %98 : vector<64x32xf32> to vector<8x8x32xf32>
    %cst_53 = arith.constant 0.000000e+00 : f32
    %100 = vector.broadcast %cst_53 : f32 to vector<8x3x32xf32>
    %101 = tpu.concatenate %100, %99, %100 in 1 : vector<8x3x32xf32>, vector<8x8x32xf32>, vector<8x3x32xf32> -> vector<8x14x32xf32>
    %102 = vector.extract_strided_slice %101 {offsets = [0, 0, 0], sizes = [8, 8, 32], strides = [1, 1, 1]} : vector<8x14x32xf32> to vector<8x8x32xf32>
    %103 = vector.extract_strided_slice %101 {offsets = [0, 1, 0], sizes = [8, 8, 32], strides = [1, 1, 1]} : vector<8x14x32xf32> to vector<8x8x32xf32>
    %104 = vector.extract_strided_slice %101 {offsets = [0, 2, 0], sizes = [8, 8, 32], strides = [1, 1, 1]} : vector<8x14x32xf32> to vector<8x8x32xf32>
    %105 = vector.extract_strided_slice %101 {offsets = [0, 3, 0], sizes = [8, 8, 32], strides = [1, 1, 1]} : vector<8x14x32xf32> to vector<8x8x32xf32>
    %106 = vector.extract_strided_slice %101 {offsets = [0, 4, 0], sizes = [8, 8, 32], strides = [1, 1, 1]} : vector<8x14x32xf32> to vector<8x8x32xf32>
    %107 = vector.extract_strided_slice %101 {offsets = [0, 5, 0], sizes = [8, 8, 32], strides = [1, 1, 1]} : vector<8x14x32xf32> to vector<8x8x32xf32>
    %108 = vector.extract_strided_slice %101 {offsets = [0, 6, 0], sizes = [8, 8, 32], strides = [1, 1, 1]} : vector<8x14x32xf32> to vector<8x8x32xf32>
    %109 = tpu.concatenate %102, %103, %104, %105, %106, %107, %108 in 2 : vector<8x8x32xf32>, vector<8x8x32xf32>, vector<8x8x32xf32>, vector<8x8x32xf32>, vector<8x8x32xf32>, vector<8x8x32xf32>, vector<8x8x32xf32> -> vector<8x8x224xf32>
    %110 = vector.shape_cast %109 : vector<8x8x224xf32> to vector<64x224xf32>
    %c0_54 = arith.constant 0 : index
    %c0_55 = arith.constant 0 : index
    %111 = vector.load %arg20[%c0_54, %c0_55] : memref<224x32xf32, #tpu.memory_space<vmem>>, vector<224x32xf32>
    %cst_56 = arith.constant dense<0.000000e+00> : vector<64x32xf32>
    %112 = tpu.matmul %110, %111, %cst_56 {dimension_numbers = #tpu.dot_dimension_numbers<[1], [0], [0], [1], [0, 0, 1, 1], [], []>} : vector<64x224xf32>, vector<224x32xf32>, vector<64x32xf32> -> vector<64x32xf32>
    %c0_57 = arith.constant 0 : index
    %c0_58 = arith.constant 0 : index
    %113 = vector.load %arg21[%c0_57, %c0_58] : memref<1x32xf32, #tpu.memory_space<vmem>>, vector<1x32xf32>
    %114 = vector.broadcast %113 : vector<1x32xf32> to vector<64x32xf32>
    %115 = arith.mulf %112, %114 : vector<64x32xf32>
    %c0_59 = arith.constant 0 : index
    %c0_60 = arith.constant 0 : index
    %116 = vector.load %arg22[%c0_59, %c0_60] : memref<1x32xf32, #tpu.memory_space<vmem>>, vector<1x32xf32>
    %117 = vector.broadcast %116 : vector<1x32xf32> to vector<64x32xf32>
    %118 = arith.addf %115, %117 : vector<64x32xf32>
    %cst_61 = arith.constant 0.000000e+00 : f32
    %119 = vector.broadcast %cst_61 : f32 to vector<64x32xf32>
    %120 = arith.maximumf %118, %119 : vector<64x32xf32>
    %121 = vector.shape_cast %120 : vector<64x32xf32> to vector<8x8x32xf32>
    %cst_62 = arith.constant 0.000000e+00 : f32
    %122 = vector.broadcast %cst_62 : f32 to vector<3x8x32xf32>
    %123 = tpu.concatenate %122, %121, %122 in 0 : vector<3x8x32xf32>, vector<8x8x32xf32>, vector<3x8x32xf32> -> vector<14x8x32xf32>
    %124 = vector.extract_strided_slice %123 {offsets = [0, 0, 0], sizes = [8, 8, 32], strides = [1, 1, 1]} : vector<14x8x32xf32> to vector<8x8x32xf32>
    %125 = vector.extract_strided_slice %123 {offsets = [1, 0, 0], sizes = [8, 8, 32], strides = [1, 1, 1]} : vector<14x8x32xf32> to vector<8x8x32xf32>
    %126 = vector.extract_strided_slice %123 {offsets = [2, 0, 0], sizes = [8, 8, 32], strides = [1, 1, 1]} : vector<14x8x32xf32> to vector<8x8x32xf32>
    %127 = vector.extract_strided_slice %123 {offsets = [3, 0, 0], sizes = [8, 8, 32], strides = [1, 1, 1]} : vector<14x8x32xf32> to vector<8x8x32xf32>
    %128 = vector.extract_strided_slice %123 {offsets = [4, 0, 0], sizes = [8, 8, 32], strides = [1, 1, 1]} : vector<14x8x32xf32> to vector<8x8x32xf32>
    %129 = vector.extract_strided_slice %123 {offsets = [5, 0, 0], sizes = [8, 8, 32], strides = [1, 1, 1]} : vector<14x8x32xf32> to vector<8x8x32xf32>
    %130 = vector.extract_strided_slice %123 {offsets = [6, 0, 0], sizes = [8, 8, 32], strides = [1, 1, 1]} : vector<14x8x32xf32> to vector<8x8x32xf32>
    %131 = tpu.concatenate %124, %125, %126, %127, %128, %129, %130 in 2 : vector<8x8x32xf32>, vector<8x8x32xf32>, vector<8x8x32xf32>, vector<8x8x32xf32>, vector<8x8x32xf32>, vector<8x8x32xf32>, vector<8x8x32xf32> -> vector<8x8x224xf32>
    %132 = vector.shape_cast %131 : vector<8x8x224xf32> to vector<64x224xf32>
    %c0_63 = arith.constant 0 : index
    %c0_64 = arith.constant 0 : index
    %133 = vector.load %arg23[%c0_63, %c0_64] : memref<224x32xf32, #tpu.memory_space<vmem>>, vector<224x32xf32>
    %cst_65 = arith.constant dense<0.000000e+00> : vector<64x32xf32>
    %134 = tpu.matmul %132, %133, %cst_65 {dimension_numbers = #tpu.dot_dimension_numbers<[1], [0], [0], [1], [0, 0, 1, 1], [], []>} : vector<64x224xf32>, vector<224x32xf32>, vector<64x32xf32> -> vector<64x32xf32>
    %c0_66 = arith.constant 0 : index
    %c0_67 = arith.constant 0 : index
    %135 = vector.load %arg24[%c0_66, %c0_67] : memref<1x32xf32, #tpu.memory_space<vmem>>, vector<1x32xf32>
    %136 = vector.broadcast %135 : vector<1x32xf32> to vector<64x32xf32>
    %137 = arith.mulf %134, %136 : vector<64x32xf32>
    %c0_68 = arith.constant 0 : index
    %c0_69 = arith.constant 0 : index
    %138 = vector.load %arg25[%c0_68, %c0_69] : memref<1x32xf32, #tpu.memory_space<vmem>>, vector<1x32xf32>
    %139 = vector.broadcast %138 : vector<1x32xf32> to vector<64x32xf32>
    %140 = arith.addf %137, %139 : vector<64x32xf32>
    %cst_70 = arith.constant 0.000000e+00 : f32
    %141 = vector.broadcast %cst_70 : f32 to vector<64x32xf32>
    %142 = arith.maximumf %140, %141 : vector<64x32xf32>
    %143 = vector.shape_cast %142 : vector<64x32xf32> to vector<8x8x32xf32>
    %cst_71 = arith.constant 0.000000e+00 : f32
    %144 = vector.broadcast %cst_71 : f32 to vector<8x3x32xf32>
    %145 = tpu.concatenate %144, %143, %144 in 1 : vector<8x3x32xf32>, vector<8x8x32xf32>, vector<8x3x32xf32> -> vector<8x14x32xf32>
    %146 = vector.extract_strided_slice %145 {offsets = [0, 0, 0], sizes = [8, 8, 32], strides = [1, 1, 1]} : vector<8x14x32xf32> to vector<8x8x32xf32>
    %147 = vector.extract_strided_slice %145 {offsets = [0, 1, 0], sizes = [8, 8, 32], strides = [1, 1, 1]} : vector<8x14x32xf32> to vector<8x8x32xf32>
    %148 = vector.extract_strided_slice %145 {offsets = [0, 2, 0], sizes = [8, 8, 32], strides = [1, 1, 1]} : vector<8x14x32xf32> to vector<8x8x32xf32>
    %149 = vector.extract_strided_slice %145 {offsets = [0, 3, 0], sizes = [8, 8, 32], strides = [1, 1, 1]} : vector<8x14x32xf32> to vector<8x8x32xf32>
    %150 = vector.extract_strided_slice %145 {offsets = [0, 4, 0], sizes = [8, 8, 32], strides = [1, 1, 1]} : vector<8x14x32xf32> to vector<8x8x32xf32>
    %151 = vector.extract_strided_slice %145 {offsets = [0, 5, 0], sizes = [8, 8, 32], strides = [1, 1, 1]} : vector<8x14x32xf32> to vector<8x8x32xf32>
    %152 = vector.extract_strided_slice %145 {offsets = [0, 6, 0], sizes = [8, 8, 32], strides = [1, 1, 1]} : vector<8x14x32xf32> to vector<8x8x32xf32>
    %153 = tpu.concatenate %146, %147, %148, %149, %150, %151, %152 in 2 : vector<8x8x32xf32>, vector<8x8x32xf32>, vector<8x8x32xf32>, vector<8x8x32xf32>, vector<8x8x32xf32>, vector<8x8x32xf32>, vector<8x8x32xf32> -> vector<8x8x224xf32>
    %154 = vector.shape_cast %153 : vector<8x8x224xf32> to vector<64x224xf32>
    %c0_72 = arith.constant 0 : index
    %c0_73 = arith.constant 0 : index
    %155 = vector.load %arg26[%c0_72, %c0_73] : memref<224x192xf32, #tpu.memory_space<vmem>>, vector<224x192xf32>
    %cst_74 = arith.constant dense<0.000000e+00> : vector<64x192xf32>
    %156 = tpu.matmul %154, %155, %cst_74 {dimension_numbers = #tpu.dot_dimension_numbers<[1], [0], [0], [1], [0, 0, 1, 1], [], []>} : vector<64x224xf32>, vector<224x192xf32>, vector<64x192xf32> -> vector<64x192xf32>
    %c0_75 = arith.constant 0 : index
    %c0_76 = arith.constant 0 : index
    %157 = vector.load %arg27[%c0_75, %c0_76] : memref<1x192xf32, #tpu.memory_space<vmem>>, vector<1x192xf32>
    %158 = vector.broadcast %157 : vector<1x192xf32> to vector<64x192xf32>
    %159 = arith.mulf %156, %158 : vector<64x192xf32>
    %c0_77 = arith.constant 0 : index
    %c0_78 = arith.constant 0 : index
    %160 = vector.load %arg28[%c0_77, %c0_78] : memref<1x192xf32, #tpu.memory_space<vmem>>, vector<1x192xf32>
    %161 = vector.broadcast %160 : vector<1x192xf32> to vector<64x192xf32>
    %162 = arith.addf %159, %161 : vector<64x192xf32>
    %cst_79 = arith.constant 0.000000e+00 : f32
    %163 = vector.broadcast %cst_79 : f32 to vector<64x192xf32>
    %164 = arith.maximumf %162, %163 : vector<64x192xf32>
    %cst_80 = arith.constant 0.000000e+00 : f32
    %165 = vector.broadcast %cst_80 : f32 to vector<1x8x64xf32>
    %166 = tpu.concatenate %165, %1, %165 in 0 : vector<1x8x64xf32>, vector<8x8x64xf32>, vector<1x8x64xf32> -> vector<10x8x64xf32>
    %cst_81 = arith.constant 0.000000e+00 : f32
    %167 = vector.broadcast %cst_81 : f32 to vector<10x1x64xf32>
    %168 = tpu.concatenate %167, %166, %167 in 1 : vector<10x1x64xf32>, vector<10x8x64xf32>, vector<10x1x64xf32> -> vector<10x10x64xf32>
    %cst_82 = arith.constant 0.000000e+00 : f32
    %169 = vector.broadcast %cst_82 : f32 to vector<8x8x64xf32>
    %170 = vector.extract_strided_slice %168 {offsets = [0, 0, 0], sizes = [8, 8, 64], strides = [1, 1, 1]} : vector<10x10x64xf32> to vector<8x8x64xf32>
    %171 = arith.addf %169, %170 : vector<8x8x64xf32>
    %172 = vector.extract_strided_slice %168 {offsets = [0, 1, 0], sizes = [8, 8, 64], strides = [1, 1, 1]} : vector<10x10x64xf32> to vector<8x8x64xf32>
    %173 = arith.addf %171, %172 : vector<8x8x64xf32>
    %174 = vector.extract_strided_slice %168 {offsets = [0, 2, 0], sizes = [8, 8, 64], strides = [1, 1, 1]} : vector<10x10x64xf32> to vector<8x8x64xf32>
    %175 = arith.addf %173, %174 : vector<8x8x64xf32>
    %176 = vector.extract_strided_slice %168 {offsets = [1, 0, 0], sizes = [8, 8, 64], strides = [1, 1, 1]} : vector<10x10x64xf32> to vector<8x8x64xf32>
    %177 = arith.addf %175, %176 : vector<8x8x64xf32>
    %178 = vector.extract_strided_slice %168 {offsets = [1, 1, 0], sizes = [8, 8, 64], strides = [1, 1, 1]} : vector<10x10x64xf32> to vector<8x8x64xf32>
    %179 = arith.addf %177, %178 : vector<8x8x64xf32>
    %180 = vector.extract_strided_slice %168 {offsets = [1, 2, 0], sizes = [8, 8, 64], strides = [1, 1, 1]} : vector<10x10x64xf32> to vector<8x8x64xf32>
    %181 = arith.addf %179, %180 : vector<8x8x64xf32>
    %182 = vector.extract_strided_slice %168 {offsets = [2, 0, 0], sizes = [8, 8, 64], strides = [1, 1, 1]} : vector<10x10x64xf32> to vector<8x8x64xf32>
    %183 = arith.addf %181, %182 : vector<8x8x64xf32>
    %184 = vector.extract_strided_slice %168 {offsets = [2, 1, 0], sizes = [8, 8, 64], strides = [1, 1, 1]} : vector<10x10x64xf32> to vector<8x8x64xf32>
    %185 = arith.addf %183, %184 : vector<8x8x64xf32>
    %186 = vector.extract_strided_slice %168 {offsets = [2, 2, 0], sizes = [8, 8, 64], strides = [1, 1, 1]} : vector<10x10x64xf32> to vector<8x8x64xf32>
    %187 = arith.addf %185, %186 : vector<8x8x64xf32>
    %188 = vector.shape_cast %187 : vector<8x8x64xf32> to vector<64x64xf32>
    %c0_83 = arith.constant 0 : index
    %c0_84 = arith.constant 0 : index
    %189 = vector.load %arg29[%c0_83, %c0_84] : memref<64x192xf32, #tpu.memory_space<vmem>>, vector<64x192xf32>
    %cst_85 = arith.constant dense<0.000000e+00> : vector<64x192xf32>
    %190 = tpu.matmul %188, %189, %cst_85 {dimension_numbers = #tpu.dot_dimension_numbers<[1], [0], [0], [1], [0, 0, 1, 1], [], []>} : vector<64x64xf32>, vector<64x192xf32>, vector<64x192xf32> -> vector<64x192xf32>
    %c0_86 = arith.constant 0 : index
    %c0_87 = arith.constant 0 : index
    %191 = vector.load %arg30[%c0_86, %c0_87] : memref<1x192xf32, #tpu.memory_space<vmem>>, vector<1x192xf32>
    %cst_88 = arith.constant 0.111111112 : f32
    %192 = vector.broadcast %cst_88 : f32 to vector<1x192xf32>
    %193 = arith.mulf %191, %192 : vector<1x192xf32>
    %194 = vector.broadcast %193 : vector<1x192xf32> to vector<64x192xf32>
    %195 = arith.mulf %190, %194 : vector<64x192xf32>
    %c0_89 = arith.constant 0 : index
    %c0_90 = arith.constant 0 : index
    %196 = vector.load %arg31[%c0_89, %c0_90] : memref<1x192xf32, #tpu.memory_space<vmem>>, vector<1x192xf32>
    %197 = vector.broadcast %196 : vector<1x192xf32> to vector<64x192xf32>
    %198 = arith.addf %195, %197 : vector<64x192xf32>
    %cst_91 = arith.constant 0.000000e+00 : f32
    %199 = vector.broadcast %cst_91 : f32 to vector<64x192xf32>
    %200 = arith.maximumf %198, %199 : vector<64x192xf32>
    %201 = tpu.concatenate %12, %66, %164, %200 in 1 : vector<64x192xf32>, vector<64x192xf32>, vector<64x192xf32>, vector<64x192xf32> -> vector<64x768xf32>
    %202 = vector.shape_cast %201 : vector<64x768xf32> to vector<1x8x8x768xf32>
    %c0_92 = arith.constant 0 : index
    %c0_93 = arith.constant 0 : index
    %c0_94 = arith.constant 0 : index
    %c0_95 = arith.constant 0 : index
    %203 = vector.load %arg32[%c0_92, %c0_93, %c0_94, %c0_95] : memref<1x8x8x768xf32, #tpu.memory_space<vmem>>, vector<1x8x8x768xf32>
    tpu.vector_store %arg32[%c0_92, %c0_93, %c0_94, %c0_95], %202 {strides = array<i32>} : memref<1x8x8x768xf32, #tpu.memory_space<vmem>>, vector<1x8x8x768xf32>,
    return
  }
  func.func @transform_0(%arg0: i32) -> (i32, i32, i32, i32) {
    %c0_i32 = arith.constant 0 : i32
    %c0_i32_0 = arith.constant 0 : i32
    %c0_i32_1 = arith.constant 0 : i32
    %c0_i32_2 = arith.constant 0 : i32
    return %arg0, %c0_i32, %c0_i32_0, %c0_i32_1 : i32, i32, i32, i32
  }
  func.func @transform_1(%arg0: i32) -> (i32, i32) {
    %c0_i32 = arith.constant 0 : i32
    %c0_i32_0 = arith.constant 0 : i32
    %c0_i32_1 = arith.constant 0 : i32
    return %c0_i32, %c0_i32_0 : i32, i32
  }
  func.func @transform_2(%arg0: i32) -> (i32, i32) {
    %c0_i32 = arith.constant 0 : i32
    %c0_i32_0 = arith.constant 0 : i32
    %c0_i32_1 = arith.constant 0 : i32
    return %c0_i32, %c0_i32_0 : i32, i32
  }
  func.func @transform_3(%arg0: i32) -> (i32, i32) {
    %c0_i32 = arith.constant 0 : i32
    %c0_i32_0 = arith.constant 0 : i32
    %c0_i32_1 = arith.constant 0 : i32
    return %c0_i32, %c0_i32_0 : i32, i32
  }
  func.func @transform_4(%arg0: i32) -> (i32, i32) {
    %c0_i32 = arith.constant 0 : i32
    %c0_i32_0 = arith.constant 0 : i32
    %c0_i32_1 = arith.constant 0 : i32
    return %c0_i32, %c0_i32_0 : i32, i32
  }
  func.func @transform_5(%arg0: i32) -> (i32, i32) {
    %c0_i32 = arith.constant 0 : i32
    %c0_i32_0 = arith.constant 0 : i32
    %c0_i32_1 = arith.constant 0 : i32
    return %c0_i32, %c0_i32_0 : i32, i32
  }
  func.func @transform_6(%arg0: i32) -> (i32, i32) {
    %c0_i32 = arith.constant 0 : i32
    %c0_i32_0 = arith.constant 0 : i32
    %c0_i32_1 = arith.constant 0 : i32
    return %c0_i32, %c0_i32_0 : i32, i32
  }
  func.func @transform_7(%arg0: i32) -> (i32, i32) {
    %c0_i32 = arith.constant 0 : i32
    %c0_i32_0 = arith.constant 0 : i32
    %c0_i32_1 = arith.constant 0 : i32
    return %c0_i32, %c0_i32_0 : i32, i32
  }
  func.func @transform_8(%arg0: i32) -> (i32, i32) {
    %c0_i32 = arith.constant 0 : i32
    %c0_i32_0 = arith.constant 0 : i32
    %c0_i32_1 = arith.constant 0 : i32
    return %c0_i32, %c0_i32_0 : i32, i32
  }
  func.func @transform_9(%arg0: i32) -> (i32, i32) {
    %c0_i32 = arith.constant 0 : i32
    %c0_i32_0 = arith.constant 0 : i32
    %c0_i32_1 = arith.constant 0 : i32
    return %c0_i32, %c0_i32_0 : i32, i32
  }
  func.func @transform_10(%arg0: i32) -> (i32, i32) {
    %c0_i32 = arith.constant 0 : i32
    %c0_i32_0 = arith.constant 0 : i32
    %c0_i32_1 = arith.constant 0 : i32
    return %c0_i32, %c0_i32_0 : i32, i32
  }
  func.func @transform_11(%arg0: i32) -> (i32, i32) {
    %c0_i32 = arith.constant 0 : i32
    %c0_i32_0 = arith.constant 0 : i32
    %c0_i32_1 = arith.constant 0 : i32
    return %c0_i32, %c0_i32_0 : i32, i32
  }
  func.func @transform_12(%arg0: i32) -> (i32, i32) {
    %c0_i32 = arith.constant 0 : i32
    %c0_i32_0 = arith.constant 0 : i32
    %c0_i32_1 = arith.constant 0 : i32
    return %c0_i32, %c0_i32_0 : i32, i32
  }
  func.func @transform_13(%arg0: i32) -> (i32, i32) {
    %c0_i32 = arith.constant 0 : i32
    %c0_i32_0 = arith.constant 0 : i32
    %c0_i32_1 = arith.constant 0 : i32
    return %c0_i32, %c0_i32_0 : i32, i32
  }
  func.func @transform_14(%arg0: i32) -> (i32, i32) {
    %c0_i32 = arith.constant 0 : i32
    %c0_i32_0 = arith.constant 0 : i32
    %c0_i32_1 = arith.constant 0 : i32
    return %c0_i32, %c0_i32_0 : i32, i32
  }
  func.func @transform_15(%arg0: i32) -> (i32, i32) {
    %c0_i32 = arith.constant 0 : i32
    %c0_i32_0 = arith.constant 0 : i32
    %c0_i32_1 = arith.constant 0 : i32
    return %c0_i32, %c0_i32_0 : i32, i32
  }
  func.func @transform_16(%arg0: i32) -> (i32, i32) {
    %c0_i32 = arith.constant 0 : i32
    %c0_i32_0 = arith.constant 0 : i32
    %c0_i32_1 = arith.constant 0 : i32
    return %c0_i32, %c0_i32_0 : i32, i32
  }
  func.func @transform_17(%arg0: i32) -> (i32, i32) {
    %c0_i32 = arith.constant 0 : i32
    %c0_i32_0 = arith.constant 0 : i32
    %c0_i32_1 = arith.constant 0 : i32
    return %c0_i32, %c0_i32_0 : i32, i32
  }
  func.func @transform_18(%arg0: i32) -> (i32, i32) {
    %c0_i32 = arith.constant 0 : i32
    %c0_i32_0 = arith.constant 0 : i32
    %c0_i32_1 = arith.constant 0 : i32
    return %c0_i32, %c0_i32_0 : i32, i32
  }
  func.func @transform_19(%arg0: i32) -> (i32, i32) {
    %c0_i32 = arith.constant 0 : i32
    %c0_i32_0 = arith.constant 0 : i32
    %c0_i32_1 = arith.constant 0 : i32
    return %c0_i32, %c0_i32_0 : i32, i32
  }
  func.func @transform_20(%arg0: i32) -> (i32, i32) {
    %c0_i32 = arith.constant 0 : i32
    %c0_i32_0 = arith.constant 0 : i32
    %c0_i32_1 = arith.constant 0 : i32
    return %c0_i32, %c0_i32_0 : i32, i32
  }
  func.func @transform_21(%arg0: i32) -> (i32, i32) {
    %c0_i32 = arith.constant 0 : i32
    %c0_i32_0 = arith.constant 0 : i32
    %c0_i32_1 = arith.constant 0 : i32
    return %c0_i32, %c0_i32_0 : i32, i32
  }
  func.func @transform_22(%arg0: i32) -> (i32, i32) {
    %c0_i32 = arith.constant 0 : i32
    %c0_i32_0 = arith.constant 0 : i32
    %c0_i32_1 = arith.constant 0 : i32
    return %c0_i32, %c0_i32_0 : i32, i32
  }
  func.func @transform_23(%arg0: i32) -> (i32, i32) {
    %c0_i32 = arith.constant 0 : i32
    %c0_i32_0 = arith.constant 0 : i32
    %c0_i32_1 = arith.constant 0 : i32
    return %c0_i32, %c0_i32_0 : i32, i32
  }
  func.func @transform_24(%arg0: i32) -> (i32, i32) {
    %c0_i32 = arith.constant 0 : i32
    %c0_i32_0 = arith.constant 0 : i32
    %c0_i32_1 = arith.constant 0 : i32
    return %c0_i32, %c0_i32_0 : i32, i32
  }
  func.func @transform_25(%arg0: i32) -> (i32, i32) {
    %c0_i32 = arith.constant 0 : i32
    %c0_i32_0 = arith.constant 0 : i32
    %c0_i32_1 = arith.constant 0 : i32
    return %c0_i32, %c0_i32_0 : i32, i32
  }
  func.func @transform_26(%arg0: i32) -> (i32, i32) {
    %c0_i32 = arith.constant 0 : i32
    %c0_i32_0 = arith.constant 0 : i32
    %c0_i32_1 = arith.constant 0 : i32
    return %c0_i32, %c0_i32_0 : i32, i32
  }
  func.func @transform_27(%arg0: i32) -> (i32, i32) {
    %c0_i32 = arith.constant 0 : i32
    %c0_i32_0 = arith.constant 0 : i32
    %c0_i32_1 = arith.constant 0 : i32
    return %c0_i32, %c0_i32_0 : i32, i32
  }
  func.func @transform_28(%arg0: i32) -> (i32, i32) {
    %c0_i32 = arith.constant 0 : i32
    %c0_i32_0 = arith.constant 0 : i32
    %c0_i32_1 = arith.constant 0 : i32
    return %c0_i32, %c0_i32_0 : i32, i32
  }
  func.func @transform_29(%arg0: i32) -> (i32, i32) {
    %c0_i32 = arith.constant 0 : i32
    %c0_i32_0 = arith.constant 0 : i32
    %c0_i32_1 = arith.constant 0 : i32
    return %c0_i32, %c0_i32_0 : i32, i32
  }
  func.func @transform_30(%arg0: i32) -> (i32, i32) {
    %c0_i32 = arith.constant 0 : i32
    %c0_i32_0 = arith.constant 0 : i32
    %c0_i32_1 = arith.constant 0 : i32
    return %c0_i32, %c0_i32_0 : i32, i32
  }
  func.func @transform_31(%arg0: i32) -> (i32, i32, i32, i32) {
    %c0_i32 = arith.constant 0 : i32
    %c0_i32_0 = arith.constant 0 : i32
    %c0_i32_1 = arith.constant 0 : i32
    %c0_i32_2 = arith.constant 0 : i32
    return %arg0, %c0_i32, %c0_i32_0, %c0_i32_1 : i32, i32, i32, i32
  }
}

</mosaic_0001>

<bundles_post_ra>
// kernel: inception_c_forward.1
= control target key start
LH: loop header
LB: loop body
LE: loop exit
PB: predicated region body
PF: predicated region fallthrough
CT: control target
= control target key end

     0   :  { %s6881_s6 = smov 1   ;;  %s6882_s10 = smov 2   ;;  %s9407_s0 = inlined_call_operand.smem [shape: u32[32], index: -1, kind: input, shape index: {}] }
   0x1   :  { %s6947_s5 = sld [smem:[%s9407_s0]]   ;;  %s6883_s14 = smov 3  }
   0x2   :  { %s6952_s9 = sld [smem:[%s9407_s0 + %s6881_s6]]   ;;  %s6884_s18 = smov 4  }
   0x3   :  { %s6957_s13 = sld [smem:[%s9407_s0 + %s6882_s10]]   ;;  %s6885_s22 = smov 5  }
   0x4   :  { %s6962_s17 = sld [smem:[%s9407_s0 + %s6883_s14]]   ;;  %s6886_s26 = smov 6  }
   0x5   :  { %s6967_s21 = sld [smem:[%s9407_s0 + %s6884_s18]]   ;;  %s6887_s30 = smov 7  }
   0x6   :  { %s6972_s25 = sld [smem:[%s9407_s0 + %s6885_s22]]   ;;  %s6888_s4 = smov 8  }
   0x7   :  { %9433 = sst [smem:[#allocation36_spill]] %s6947_s5  ;;  %s6889_s10 = smov 9  }
   0x8   :  { %s6977_s29 = sld [smem:[%s9407_s0 + %s6886_s26]]   ;;  %s6890_s15 = smov 10  }
   0x9   :  { %9434 = sst [smem:[#allocation37_spill]] %s6957_s13  ;;  %s6891_s20 = smov 11  }
   0xa   :  { %9435 = sst [smem:[#allocation38_spill]] %s6962_s17  ;;  %s6892_s26 = smov 12  }
   0xb   :  { %9436 = sst [smem:[#allocation39_spill]] %s6967_s21  ;;  %s6893_s1 = smov 13  }
   0xc   :  { %9437 = sst [smem:[#allocation40_spill]] %s6972_s25  ;;  %s6894_s7 = smov 14  }
   0xd   :  { %s6982_s3 = sld [smem:[%s9407_s0 + %s6887_s30]]   ;;  %s6896_s22 = smov 16  }
   0xe   :  { %s6987_s8 = sld [smem:[%s9407_s0 + %s6888_s4]]   ;;  %s6897_s28 = smov 17  }
   0xf   :  { %s6992_s14 = sld [smem:[%s9407_s0 + %s6889_s10]]  }
  0x10   :  { %s6997_s19 = sld [smem:[%s9407_s0 + %s6890_s15]]   ;;  %s6895_s15 = smov 15  }
  0x11   :  { %s7002_s24 = sld [smem:[%s9407_s0 + %s6891_s20]]  }
  0x12   :  { %s7007_s30 = sld [smem:[%s9407_s0 + %s6892_s26]]  }
  0x13   :  { %9438 = sst [smem:[#allocation41_spill]] %s6982_s3 }
  0x14   :  { %9439 = sst [smem:[#allocation42_spill]] %s6987_s8 }
  0x15   :  { %s7012_s6 = sld [smem:[%s9407_s0 + %s6893_s1]]  }
  0x16   :  { %s7017_s12 = sld [smem:[%s9407_s0 + %s6894_s7]]   ;;  %s6898_s7 = smov 18  }
  0x17   :  { %9440 = sst [smem:[#allocation43_spill]] %s7002_s24 }
  0x18   :  { %s7022_s20 = sld [smem:[%s9407_s0 + %s6895_s15]]   ;;  %s6899_s15 = smov 19  }
  0x19   :  { %s7027_s27 = sld [smem:[%s9407_s0 + %s6896_s22]]   ;;  %s6900_s22 = smov 20  }
  0x1a   :  { %s7032_s4 = sld [smem:[%s9407_s0 + %s6897_s28]]   ;;  %s6901_s28 = smov 21  }
  0x1b   :  { %9441 = sst [smem:[#allocation44_spill]] %s7012_s6 }
  0x1c   :  { %s7037_s24 = sld [smem:[%s9407_s0 + %s6898_s7]]   ;;  %s6902_s7 = smov 22  }
  0x1d   :  { %s7042_s17 = sld [smem:[%s9407_s0 + %s6899_s15]]   ;;  %s6903_s15 = smov 23  }
  0x1e   :  { %s7047_s13 = sld [smem:[%s9407_s0 + %s6900_s22]]   ;;  %s6904_s22 = smov 24  }
  0x1f   :  { %s7057_s6 = sld [smem:[%s9407_s0 + %s6902_s7]]   ;;  %s6906_s7 = smov 26  }
  0x20   :  { %9442 = sst [smem:[#allocation45_spill]] %s7032_s4 }
  0x21   :  { %s7052_s4 = sld [smem:[%s9407_s0 + %s6901_s28]]   ;;  %s6905_s28 = smov 25  }
  0x22   :  { %s7062_s3 = sld [smem:[%s9407_s0 + %s6903_s15]]   ;;  %s6907_s15 = smov 27  }
  0x23   :  { %s7077_s21 = sld [smem:[%s9407_s0 + %s6906_s7]]   ;;  %s6910_s7 = smov 30  }
  0x24   :  { %9443 = sst [smem:[#allocation46_spill]] %s7047_s13 }
  0x25   :  { %s7067_s13 = sld [smem:[%s9407_s0 + %s6904_s22]]   ;;  %s6908_s22 = smov 28  }
  0x27   :  { %9444 = sst [smem:[#allocation47_spill]] %s7052_s4 }
  0x28   :  { %9445 = sst [smem:[#allocation48_spill]] %s7062_s3 }
  0x29   :  { %s7072_s4 = sld [smem:[%s9407_s0 + %s6905_s28]]   ;;  %s6909_s28 = smov 29  }
  0x2a   :  { %9448 = sst [smem:[#allocation51_spill]] %s7077_s21 }
  0x2b   :  { %9446 = sst [smem:[#allocation49_spill]] %s7067_s13 }
  0x2c   :  { %s7082_s3 = sld [smem:[%s9407_s0 + %s6907_s15]]   ;;  %s6911_s15 = smov 31  }
  0x2d   :  { %s7087_s13 = sld [smem:[%s9407_s0 + %s6908_s22]]  }
  0x2e   :  { %s7092_s5 = sld [smem:[%s9407_s0 + %s6909_s28]]  }
  0x2f   :  { %9447 = sst [smem:[#allocation50_spill]] %s7072_s4 }
  0x30   :  { %s7097_s21 = sld [smem:[%s9407_s0 + %s6910_s7]]  }
  0x32   :  { %9449 = sst [smem:[#allocation52_spill]] %s7082_s3 }
  0x33   :  { %s7102_s3 = sld [smem:[%s9407_s0 + %s6911_s15]]  }
  0x34   :  { %68 = vsyncpa [#allocation3], 0 }
  0x35   :  { %69 = vsyncpa [#allocation6], 0 }
  0x36   :  { %70 = vsyncpa [#allocation9], 0 }
  0x37   :  { %71 = vsyncpa [#allocation12], 0 }
  0x38   :  { %72 = vsyncpa [#allocation15], 0 }
  0x39   :  { %73 = vsyncpa [#allocation18], 0 }
  0x3a   :  { %74 = vsyncpa [#allocation21], 0 }
  0x3b   :  { %75 = vsyncpa [#allocation24], 0 }
  0x3c   :  { %76 = vsyncpa [#allocation4], 0 }
  0x3d   :  { %78 = vsyncpa [#allocation4 + $0x1], 0  ;;  %s7104_s22 = smov 0   ;;  %s7106_s23 = smov 0  }
  0x3e   :  { %s7108_s26 = smov 0   ;;  %s7110_s28 = smov 0  }
  0x3f LB: > { %s9450_s4 = sld [smem:[#allocation50_spill]]  ;;  %s9451_s25 = sld [smem:[#allocation40_spill]]  ;;  %s6875_s26 = sphi %s7108_s26, %s9519_s26   ;;  %s6871_s23 = sphi %s7106_s23, %s9521_s23   ;;  %s6867_s22 = sphi %s7104_s22, %s9520_s22   ;;  %s6879_s28 = sphi %s7110_s28, %s9517_s28  }
  0x40   : > { %s9452_s8 = sld [smem:[#allocation42_spill]]  ;;  %9453 = sst [smem:[#allocation53_spill]] %s6867_s22 }
  0x41   : > { %9454 = sst [smem:[#allocation54_spill]] %s6875_s26  ;;  %s7125_s0 = sadd.s32 4294967295, %s6879_s28  }
  0x42   : > { %9455 = sst [smem:[#allocation55_spill]] %s6879_s28  ;;  %s5326_s1 = sadd.s32 4294967294, %s6879_s28  }
  0x43   : > { %s7129_s2 = sadd.s32 1, %s6879_s28   ;;  %s747_s7 = sadd.s32 1, %s6875_s26 }
  0x44   : > { %9456 = sst [smem:[#allocation56_spill]] %s7129_s2  ;;  %s744_s10 = ssub.s32 %s6879_s28, %s7129_s2 }
  0x45   : > { %p757_p0 = scmp.ne.s32.totalorder %s6875_s26, %s6871_s23  ;;  %p745_p1 = scmp.eq.s32.totalorder %s744_s10, 0 }
  0x46   : > { %p758_p2 = scmp.eq.s32.totalorder %s7125_s0, 1  ;;  %p763_p3 = scmp.ne.s32.totalorder %s6871_s23, %s6867_s22 }
  0x47   : > { %p764_p4 = scmp.eq.s32.totalorder %s5326_s1, 1  ;;  %p5327_p7 = scmp.ge.s32.totalorder %s6879_s28, 1 }
  0x48   : > { %s7140_s11 = scalar_select %p745_p1, %s6875_s26, %s747_s7  }
  0x49   : > { %p7142_p5 = por %p758_p2, %p757_p0  ;;  %p7146_p6 = por %p764_p4, %p763_p3 }
  0x4a   : > { %9457 = sst [smem:[#allocation57_spill]] %s7140_s11  ;;  %p771_p8 = scmp.lt.s32.totalorder %s6879_s28, 3 }
  0x4b   : > { %s9458_s15 = scalar_select %p7142_p5, 1, 0 }
  0x4c   : > { %s9459_s16 = scalar_select %p7146_p6, 1, 0 }
  0x4d   : > { %p9416_p9 = scmp.eq.s32.totalorder %s7125_s0, 0  ;;  %p7153_p10 = pnand %p5327_p7, %p771_p8 }
  0x4e   : > { %9460 = sst [smem:[#allocation58_spill]] %s9459_s16  ;;  %s6912_s1 = smov [#allocation5]  }
  0x4f   : > { %s9461_s18 = scalar_select %p7153_p10, 1, 0 }
  0x50   : > { %s806_s7 = sshll.u32 %s6912_s1, 4  ;;  %p5954_p11 = pneg %p7153_p10  ;;  %s807_s7 = int_to_ptr.vmem [resolvable:$true] %s806_s7 }
  0x51   : > { %s6913_s10 = smov [#allocation8]   ;;  %s6914_s2 = smov [#allocation11]  }
  0x52   : > { %s831_s11 = sshll.u32 %s6913_s10, 4  ;;  %p7161_p12 = pnand %p9416_p9, %p5954_p11  ;;  %s7165_s11 = int_to_ptr.vmem [resolvable:$true] %s831_s11 }
  0x53   : > { %s7167_s16 = sshll.u32 %s6914_s2, 4  ;;  %s6365_s22 = scalar_lea.hbm %s9451_s25, 16  ;;  %s853_s16 = int_to_ptr.vmem [resolvable:$true] %s7167_s16 }
  0x54   : > { %p6366_p13 = scmp.ne.s32.totalorder %s9451_s25, %s6365_s22  ;;  %p7173_p0 = pneg %p7161_p12 }
  0x55   : > { %p6372_p3 = scmp.lt.u32.totalorder %s6365_s22, %s9451_s25 }
  0x56   : > { %p6368_p1 = pnand %p7173_p0, %p6366_p13 }
  0x58   : > { %p6369_p2 = pneg %p6368_p1 }
  0x5a   : > { %p6374_p4 = pnand %p6372_p3, %p6369_p2 }
  0x5c   : > { %6377 = shalt.err (!%p6374_p4)
}
  0x5d   : > { %s6378_s10 = scalar_lea.vmem %s807_s7, 16  ;;  %s6385_s2 = scalar_lea.vmem %s807_s7, 32 }
  0x5e   : > { %p6379_p7 = scmp.ne.s32.totalorder %s807_s7, %s6378_s10  ;;  %p6386_p9 = scmp.lt.s32.totalorder %s807_s7, %s807_s7 }
  0x5f   : > { %p6387_p6 = scmp.lt.s32.totalorder %s6385_s2, %s6378_s10 }
  0x60   : > { %p6381_p8 = pnand %p6379_p7, %p7173_p0 }
  0x61   : > { %p6388_p5 = por %p6387_p6, %p6386_p9 }
  0x62   : > { %p6382_p11 = pneg %p6381_p8 }
  0x64   : > { %p6389_p10 = pnand %p6388_p5, %p6382_p11 }
  0x66   : > { %6392 = shalt.err (!%p6389_p10)
}
  0x67   : > { %5960 = dma.hbm_to_vmem [thread:$0]  (!%p7161_p12), %s9451_s25, 16, %s807_s7, [#allocation6]  }
  0x68   : > { %s6393_s22 = scalar_lea.hbm %s9452_s8, 16 }
  0x69   : > { %p6394_p13 = scmp.ne.s32.totalorder %s9452_s8, %s6393_s22  ;;  %p6400_p3 = scmp.lt.u32.totalorder %s6393_s22, %s9452_s8 }
  0x6b   : > { %p6396_p1 = pnand %p6394_p13, %p7173_p0 }
  0x6d   : > { %p6397_p2 = pneg %p6396_p1 }
  0x6f   : > { %p6402_p4 = pnand %p6400_p3, %p6397_p2 }
  0x71   : > { %6405 = shalt.err (!%p6402_p4)
}
  0x72   : > { %s6406_s10 = scalar_lea.vmem %s7165_s11, 16  ;;  %s6413_s2 = scalar_lea.vmem %s7165_s11, 32 }
  0x73   : > { %p6407_p5 = scmp.ne.s32.totalorder %s7165_s11, %s6406_s10  ;;  %p6414_p10 = scmp.lt.s32.totalorder %s7165_s11, %s7165_s11 }
  0x74   : > { %p6415_p7 = scmp.lt.s32.totalorder %s6413_s2, %s6406_s10 }
  0x75   : > { %p6409_p6 = pnand %p6407_p5, %p7173_p0 }
  0x76   : > { %p6416_p8 = por %p6415_p7, %p6414_p10 }
  0x77   : > { %p6410_p9 = pneg %p6409_p6 }
  0x79   : > { %p6417_p11 = pnand %p6416_p8, %p6410_p9 }
  0x7b   : > { %6420 = shalt.err (!%p6417_p11)
}
  0x7c   : > { %5966 = dma.hbm_to_vmem [thread:$0]  (!%p7161_p12), %s9452_s8, 16, %s7165_s11, [#allocation9]  }
  0x7d   : > { %s6421_s7 = scalar_lea.hbm %s6997_s19, 7168 }
  0x7e   : > { %p6422_p13 = scmp.ne.s32.totalorder %s6997_s19, %s6421_s7  ;;  %p6428_p3 = scmp.lt.u32.totalorder %s6421_s7, %s6997_s19 }
  0x80   : > { %p6424_p1 = pnand %p6422_p13, %p7173_p0 }
  0x82   : > { %p6425_p2 = pneg %p6424_p1 }
  0x84   : > { %p6430_p4 = pnand %p6428_p3, %p6425_p2 }
  0x86   : > { %6433 = shalt.err (!%p6430_p4)
}
  0x87   : > { %s6434_s22 = scalar_lea.vmem %s853_s16, 7168  ;;  %p6442_p10 = scmp.lt.s32.totalorder %s853_s16, %s853_s16 }
  0x88   : > { %p6435_p5 = scmp.ne.s32.totalorder %s853_s16, %s6434_s22  ;;  %p6443_p7 = scmp.lt.s32.totalorder %s6434_s22, %s6434_s22 }
  0x8a   : > { %p6437_p6 = pnand %p6435_p5, %p7173_p0  ;;  %p6444_p8 = por %p6443_p7, %p6442_p10 }
  0x8c   : > { %p6438_p9 = pneg %p6437_p6 }
  0x8e   : > { %p6445_p11 = pnand %p6444_p8, %p6438_p9 }
  0x90   : > { %6448 = shalt.err (!%p6445_p11)
}
  0x91   : > { %s9422_s11 = smov 256   ;;  %s9424_s10 = smov 16  }
  0x92   : > { %5972 = dma.hbm_to_vmem [thread:$0]  (!%p7161_p12), %s6997_s19, 7168, %s853_s16, [#allocation12], %s9422_s11, %s9422_s11, %s9424_s10  }
  0x93   : > { %s6917_s2 = smov [#allocation14]   ;;  %s6918_s22 = smov [#allocation17]  }
  0x94   : > { %s883_s7 = sshll.u32 %s6917_s2, 4  ;;  %s904_s8 = sshll.u32 %s6918_s22, 4  ;;  %s884_s7 = int_to_ptr.vmem [resolvable:$true] %s883_s7  ;;  %s905_s8 = int_to_ptr.vmem [resolvable:$true] %s904_s8 }
  0x95   : > { %s6449_s25 = scalar_lea.hbm %s7017_s12, 16 }
  0x96   : > { %p6450_p13 = scmp.ne.s32.totalorder %s7017_s12, %s6449_s25  ;;  %p6456_p3 = scmp.lt.u32.totalorder %s6449_s25, %s7017_s12 }
  0x98   : > { %p6452_p1 = pnand %p6450_p13, %p7173_p0 }
  0x9a   : > { %p6453_p2 = pneg %p6452_p1 }
  0x9c   : > { %p6458_p4 = pnand %p6456_p3, %p6453_p2 }
  0x9e   : > { %6461 = shalt.err (!%p6458_p4)
}
  0x9f   : > { %s6462_s28 = scalar_lea.vmem %s884_s7, 16  ;;  %s6469_s16 = scalar_lea.vmem %s884_s7, 32 }
  0xa0   : > { %p6463_p5 = scmp.ne.s32.totalorder %s884_s7, %s6462_s28  ;;  %p6470_p10 = scmp.lt.s32.totalorder %s884_s7, %s884_s7 }
  0xa1   : > { %p6471_p7 = scmp.lt.s32.totalorder %s6469_s16, %s6462_s28 }
  0xa2   : > { %p6465_p6 = pnand %p6463_p5, %p7173_p0 }
  0xa3   : > { %p6472_p8 = por %p6471_p7, %p6470_p10 }
  0xa4   : > { %p6466_p9 = pneg %p6465_p6 }
  0xa6   : > { %p6473_p11 = pnand %p6472_p8, %p6466_p9 }
  0xa8   : > { %6476 = shalt.err (!%p6473_p11)
}
  0xa9   : > { %5978 = dma.hbm_to_vmem [thread:$0]  (!%p7161_p12), %s7017_s12, 16, %s884_s7, [#allocation15]  }
  0xaa   : > { %s6477_s25 = scalar_lea.hbm %s7027_s27, 3584 }
  0xab   : > { %p6478_p13 = scmp.ne.s32.totalorder %s7027_s27, %s6477_s25  ;;  %p6484_p3 = scmp.lt.u32.totalorder %s6477_s25, %s7027_s27 }
  0xad   : > { %p6480_p1 = pnand %p6478_p13, %p7173_p0 }
  0xaf   : > { %p6481_p2 = pneg %p6480_p1 }
  0xb1   : > { %p6486_p4 = pnand %p6484_p3, %p6481_p2 }
  0xb3   : > { %6489 = shalt.err (!%p6486_p4)
}
  0xb4   : > { %s6490_s28 = scalar_lea.vmem %s905_s8, 3584  ;;  %p6498_p10 = scmp.lt.s32.totalorder %s905_s8, %s905_s8 }
  0xb5   : > { %p6491_p5 = scmp.ne.s32.totalorder %s905_s8, %s6490_s28  ;;  %p6499_p7 = scmp.lt.s32.totalorder %s6490_s28, %s6490_s28 }
  0xb7   : > { %p6493_p6 = pnand %p6491_p5, %p7173_p0  ;;  %p6500_p8 = por %p6499_p7, %p6498_p10 }
  0xb9   : > { %p6494_p9 = pneg %p6493_p6 }
  0xbb   : > { %p6501_p11 = pnand %p6500_p8, %p6494_p9 }
  0xbd   : > { %6504 = shalt.err (!%p6501_p11)
}
  0xbe   : > { %s9426_s2 = smov 128   ;;  %s9427_s7 = smov 8  }
  0xbf   : > { %5984 = dma.hbm_to_vmem [thread:$0]  (!%p7161_p12), %s7027_s27, 3584, %s905_s8, [#allocation18], %s9426_s2, %s9426_s2, %s9427_s7  }
  0xc0   : > { %s6921_s22 = smov [#allocation20]   ;;  %s6922_s25 = smov [#allocation23]  }
  0xc1   : > { %s931_s16 = sshll.u32 %s6921_s22, 4  ;;  %s969_s28 = sshll.u32 %s6922_s25, 4  ;;  %s932_s16 = int_to_ptr.vmem [resolvable:$true] %s931_s16  ;;  %s970_s28 = int_to_ptr.vmem [resolvable:$true] %s969_s28 }
  0xc2   : > { %s6505_s11 = scalar_lea.hbm %s7042_s17, 3584 }
  0xc3   : > { %p6506_p13 = scmp.ne.s32.totalorder %s7042_s17, %s6505_s11  ;;  %p6512_p3 = scmp.lt.u32.totalorder %s6505_s11, %s7042_s17 }
  0xc5   : > { %p6508_p1 = pnand %p6506_p13, %p7173_p0 }
  0xc7   : > { %p6509_p2 = pneg %p6508_p1 }
  0xc9   : > { %p6514_p4 = pnand %p6512_p3, %p6509_p2 }
  0xcb   : > { %6517 = shalt.err (!%p6514_p4)
}
  0xcc   : > { %s6518_s10 = scalar_lea.vmem %s932_s16, 3584  ;;  %p6526_p10 = scmp.lt.s32.totalorder %s932_s16, %s932_s16 }
  0xcd   : > { %p6519_p5 = scmp.ne.s32.totalorder %s932_s16, %s6518_s10  ;;  %p6527_p7 = scmp.lt.s32.totalorder %s6518_s10, %s6518_s10 }
  0xcf   : > { %p6521_p6 = pnand %p6519_p5, %p7173_p0  ;;  %p6528_p8 = por %p6527_p7, %p6526_p10 }
  0xd1   : > { %p6522_p9 = pneg %p6521_p6 }
  0xd3   : > { %p6529_p11 = pnand %p6528_p8, %p6522_p9 }
  0xd5   : > { %6532 = shalt.err (!%p6529_p11)
}
  0xd6   : > { %5990 = dma.hbm_to_vmem [thread:$0]  (!%p7161_p12), %s7042_s17, 3584, %s932_s16, [#allocation21], %s9426_s2, %s9426_s2, %s9427_s7  }
  0xd7   : > { %s6533_s8 = scalar_lea.hbm %s9450_s4, 7168 }
  0xd8   : > { %p6534_p13 = scmp.ne.s32.totalorder %s9450_s4, %s6533_s8  ;;  %p6540_p3 = scmp.lt.u32.totalorder %s6533_s8, %s9450_s4 }
  0xda   : > { %p6536_p1 = pnand %p6534_p13, %p7173_p0 }
  0xdc   : > { %p6537_p2 = pneg %p6536_p1 }
  0xde   : > { %p6542_p4 = pnand %p6540_p3, %p6537_p2 }
  0xe0   : > { %6545 = shalt.err (!%p6542_p4)
}
  0xe1   : > { %s6546_s11 = scalar_lea.vmem %s970_s28, 7168  ;;  %p6554_p10 = scmp.lt.s32.totalorder %s970_s28, %s970_s28 }
  0xe2   : > { %p6547_p5 = scmp.ne.s32.totalorder %s970_s28, %s6546_s11  ;;  %p6555_p7 = scmp.lt.s32.totalorder %s6546_s11, %s6546_s11 }
  0xe4   : > { %p6549_p6 = pnand %p6547_p5, %p7173_p0  ;;  %p6556_p8 = por %p6555_p7, %p6554_p10 }
  0xe6   : > { %p6550_p9 = pneg %p6549_p6 }
  0xe8   : > { %p6557_p11 = pnand %p6556_p8, %p6550_p9 }
  0xea   : > { %6560 = shalt.err (!%p6557_p11)
}
  0xeb   : > { %s9464_s10 = smov 16   ;;  %s9465_s22 = smov 256  }
  0xec   : > { %5996 = dma.hbm_to_vmem [thread:$0]  (!%p7161_p12), %s9450_s4, 7168, %s970_s28, [#allocation24], %s9465_s22, %s9465_s22, %s9464_s10  }
  0xed   : > { %s6923_s16 = smov [#allocation2]   ;;  %s6924_s8 = smov [#allocation7]  }
  0xee   : > { %s783_s25 = sshll.u32 %s6923_s16, 4  ;;  %s817_s2 = sshll.u32 %s6924_s8, 4  ;;  %s784_s25 = int_to_ptr.vmem [resolvable:$true] %s783_s25  ;;  %s818_s2 = int_to_ptr.vmem [resolvable:$true] %s817_s2 }
  0xef   : > { %s6561_s11 = scalar_lea.hbm %s6952_s9, 2048 }
  0xf0   : > { %p6562_p13 = scmp.ne.s32.totalorder %s6952_s9, %s6561_s11  ;;  %p6568_p3 = scmp.lt.u32.totalorder %s6561_s11, %s6952_s9 }
  0xf2   : > { %p6564_p1 = pnand %p6562_p13, %p7173_p0 }
  0xf4   : > { %p6565_p2 = pneg %p6564_p1 }
  0xf6   : > { %p6570_p4 = pnand %p6568_p3, %p6565_p2 }
  0xf8   : > { %6573 = shalt.err (!%p6570_p4)
}
  0xf9   : > { %s6574_s7 = scalar_lea.vmem %s784_s25, 2048  ;;  %p6582_p10 = scmp.lt.s32.totalorder %s784_s25, %s784_s25 }
  0xfa   : > { %p6575_p5 = scmp.ne.s32.totalorder %s784_s25, %s6574_s7  ;;  %p6583_p7 = scmp.lt.s32.totalorder %s6574_s7, %s6574_s7 }
  0xfc   : > { %p6577_p6 = pnand %p6575_p5, %p7173_p0  ;;  %p6584_p8 = por %p6583_p7, %p6582_p10 }
  0xfe   : > { %p6578_p9 = pneg %p6577_p6 }
 0x100   : > { %p6585_p11 = pnand %p6584_p8, %p6578_p9 }
 0x102   : > { %6588 = shalt.err (!%p6585_p11)
}
 0x103   : > { %5957 = dma.hbm_to_vmem [thread:$0]  (!%p7161_p12), %s6952_s9, 2048, %s784_s25, [#allocation3], %s9465_s22, %s9465_s22, %s9464_s10  }
 0x104   : > { %s6589_s28 = scalar_lea.hbm %s6977_s29, 16 }
 0x105   : > { %p6590_p13 = scmp.ne.s32.totalorder %s6977_s29, %s6589_s28  ;;  %p6596_p3 = scmp.lt.u32.totalorder %s6589_s28, %s6977_s29 }
 0x107   : > { %p6592_p1 = pnand %p6590_p13, %p7173_p0 }
 0x109   : > { %p6593_p2 = pneg %p6592_p1 }
 0x10b   : > { %p6598_p4 = pnand %p6596_p3, %p6593_p2 }
 0x10d   : > { %6601 = shalt.err (!%p6598_p4)
}
 0x10e   : > { %s6602_s7 = scalar_lea.vmem %s818_s2, 16  ;;  %s6609_s16 = scalar_lea.vmem %s818_s2, 32 }
 0x10f   : > { %p6603_p5 = scmp.ne.s32.totalorder %s818_s2, %s6602_s7  ;;  %p6610_p10 = scmp.lt.s32.totalorder %s818_s2, %s818_s2 }
 0x110   : > { %p6611_p7 = scmp.lt.s32.totalorder %s6609_s16, %s6602_s7 }
 0x111   : > { %p6605_p6 = pnand %p6603_p5, %p7173_p0 }
 0x112   : > { %p6612_p8 = por %p6611_p7, %p6610_p10 }
 0x113   : > { %p6606_p9 = pneg %p6605_p6 }
 0x115   : > { %p6613_p11 = pnand %p6612_p8, %p6606_p9 }
 0x117   : > { %6616 = shalt.err (!%p6613_p11)
}
 0x118   : > { %5963 = dma.hbm_to_vmem [thread:$0]  (!%p7161_p12), %s6977_s29, 16, %s818_s2, [#allocation6]  }
 0x119   : > { %s6925_s25 = smov [#allocation10]   ;;  %s6926_s11 = smov [#allocation13]  }
 0x11a   : > { %s842_s8 = sshll.u32 %s6925_s25, 4  ;;  %s869_s28 = sshll.u32 %s6926_s11, 4  ;;  %s843_s8 = int_to_ptr.vmem [resolvable:$true] %s842_s8  ;;  %s870_s28 = int_to_ptr.vmem [resolvable:$true] %s869_s28 }
 0x11b   : > { %s6617_s4 = scalar_lea.hbm %s6992_s14, 16 }
 0x11c   : > { %p6618_p13 = scmp.ne.s32.totalorder %s6992_s14, %s6617_s4  ;;  %p6624_p3 = scmp.lt.u32.totalorder %s6617_s4, %s6992_s14 }
 0x11e   : > { %p6620_p1 = pnand %p6618_p13, %p7173_p0 }
 0x120   : > { %p6621_p2 = pneg %p6620_p1 }
 0x122   : > { %p6626_p4 = pnand %p6624_p3, %p6621_p2 }
 0x124   : > { %6629 = shalt.err (!%p6626_p4)
}
 0x125   : > { %s6630_s7 = scalar_lea.vmem %s843_s8, 16  ;;  %s6637_s2 = scalar_lea.vmem %s843_s8, 32 }
 0x126   : > { %p6631_p5 = scmp.ne.s32.totalorder %s843_s8, %s6630_s7  ;;  %p6638_p10 = scmp.lt.s32.totalorder %s843_s8, %s843_s8 }
 0x127   : > { %p6639_p7 = scmp.lt.s32.totalorder %s6637_s2, %s6630_s7 }
 0x128   : > { %p6633_p6 = pnand %p6631_p5, %p7173_p0 }
 0x129   : > { %p6640_p8 = por %p6639_p7, %p6638_p10 }
 0x12a   : > { %p6634_p9 = pneg %p6633_p6 }
 0x12c   : > { %p6641_p11 = pnand %p6640_p8, %p6634_p9 }
 0x12e   : > { %6644 = shalt.err (!%p6641_p11)
}
 0x12f   : > { %5969 = dma.hbm_to_vmem [thread:$0]  (!%p7161_p12), %s6992_s14, 16, %s843_s8, [#allocation9]  }
 0x130   : > { %s6645_s4 = scalar_lea.hbm %s7007_s30, 32 }
 0x131   : > { %p6646_p13 = scmp.ne.s32.totalorder %s7007_s30, %s6645_s4  ;;  %p6652_p3 = scmp.lt.u32.totalorder %s6645_s4, %s7007_s30 }
 0x133   : > { %p6648_p1 = pnand %p6646_p13, %p7173_p0 }
 0x135   : > { %p6649_p2 = pneg %p6648_p1 }
 0x137   : > { %p6654_p4 = pnand %p6652_p3, %p6649_p2 }
 0x139   : > { %6657 = shalt.err (!%p6654_p4)
}
 0x13a   : > { %s6658_s16 = scalar_lea.vmem %s870_s28, 32  ;;  %p6666_p10 = scmp.lt.s32.totalorder %s870_s28, %s870_s28 }
 0x13b   : > { %p6659_p5 = scmp.ne.s32.totalorder %s870_s28, %s6658_s16  ;;  %p6667_p7 = scmp.lt.s32.totalorder %s6658_s16, %s6658_s16 }
 0x13d   : > { %p6661_p6 = pnand %p6659_p5, %p7173_p0  ;;  %p6668_p8 = por %p6667_p7, %p6666_p10 }
 0x13f   : > { %p6662_p9 = pneg %p6661_p6 }
 0x141   : > { %p6669_p11 = pnand %p6668_p8, %p6662_p9 }
 0x143   : > { %6672 = shalt.err (!%p6669_p11)
}
 0x144   : > { %5975 = dma.hbm_to_vmem [thread:$0]  (!%p7161_p12), %s7007_s30, 32, %s870_s28, [#allocation12]  }
 0x145   : > { %s6927_s25 = smov [#allocation16]   ;;  %s6928_s11 = smov [#allocation19]  }
 0x146   : > { %s894_s8 = sshll.u32 %s6927_s25, 4  ;;  %s921_s7 = sshll.u32 %s6928_s11, 4  ;;  %s895_s8 = int_to_ptr.vmem [resolvable:$true] %s894_s8  ;;  %s922_s7 = int_to_ptr.vmem [resolvable:$true] %s921_s7 }
 0x147   : > { %s6673_s2 = scalar_lea.hbm %s7022_s20, 16 }
 0x148   : > { %p6674_p13 = scmp.ne.s32.totalorder %s7022_s20, %s6673_s2  ;;  %p6680_p3 = scmp.lt.u32.totalorder %s6673_s2, %s7022_s20 }
 0x14a   : > { %p6676_p1 = pnand %p6674_p13, %p7173_p0 }
 0x14c   : > { %p6677_p2 = pneg %p6676_p1 }
 0x14e   : > { %p6682_p4 = pnand %p6680_p3, %p6677_p2 }
 0x150   : > { %6685 = shalt.err (!%p6682_p4)
}
 0x151   : > { %s6686_s4 = scalar_lea.vmem %s895_s8, 16  ;;  %s6693_s28 = scalar_lea.vmem %s895_s8, 32 }
 0x152   : > { %p6687_p5 = scmp.ne.s32.totalorder %s895_s8, %s6686_s4  ;;  %p6694_p10 = scmp.lt.s32.totalorder %s895_s8, %s895_s8 }
 0x153   : > { %p6695_p7 = scmp.lt.s32.totalorder %s6693_s28, %s6686_s4 }
 0x154   : > { %p6689_p6 = pnand %p6687_p5, %p7173_p0 }
 0x155   : > { %p6696_p8 = por %p6695_p7, %p6694_p10 }
 0x156   : > { %p6690_p9 = pneg %p6689_p6 }
 0x158   : > { %p6697_p11 = pnand %p6696_p8, %p6690_p9 }
 0x15a   : > { %6700 = shalt.err (!%p6697_p11)
}
 0x15b   : > { %5981 = dma.hbm_to_vmem [thread:$0]  (!%p7161_p12), %s7022_s20, 16, %s895_s8, [#allocation15]  }
 0x15c   : > { %s6701_s16 = scalar_lea.hbm %s7037_s24, 16 }
 0x15d   : > { %p6702_p13 = scmp.ne.s32.totalorder %s7037_s24, %s6701_s16  ;;  %p6708_p3 = scmp.lt.u32.totalorder %s6701_s16, %s7037_s24 }
 0x15f   : > { %p6704_p1 = pnand %p6702_p13, %p7173_p0 }
 0x161   : > { %p6705_p2 = pneg %p6704_p1 }
 0x163   : > { %p6710_p4 = pnand %p6708_p3, %p6705_p2 }
 0x165   : > { %6713 = shalt.err (!%p6710_p4)
}
 0x166   : > { %s6714_s25 = scalar_lea.vmem %s922_s7, 16  ;;  %s6721_s11 = scalar_lea.vmem %s922_s7, 32 }
 0x167   : > { %p6715_p5 = scmp.ne.s32.totalorder %s922_s7, %s6714_s25  ;;  %p6722_p10 = scmp.lt.s32.totalorder %s922_s7, %s922_s7 }
 0x168   : > { %p6723_p7 = scmp.lt.s32.totalorder %s6721_s11, %s6714_s25 }
 0x169   : > { %p6717_p6 = pnand %p6715_p5, %p7173_p0 }
 0x16a   : > { %p6724_p8 = por %p6723_p7, %p6722_p10 }
 0x16b   : > { %p6718_p9 = pneg %p6717_p6 }
 0x16d   : > { %p6725_p11 = pnand %p6724_p8, %p6718_p9 }
 0x16f   : > { %6728 = shalt.err (!%p6725_p11)
}
 0x170   : > { %5987 = dma.hbm_to_vmem [thread:$0]  (!%p7161_p12), %s7037_s24, 16, %s922_s7, [#allocation18]  }
 0x171   : > { %s6929_s8 = smov [#allocation22]   ;;  %s6930_s4 = smov [#allocation25]  }
 0x172   : > { %s950_s2 = sshll.u32 %s6929_s8, 4  ;;  %s988_s28 = sshll.u32 %s6930_s4, 4  ;;  %s951_s2 = int_to_ptr.vmem [resolvable:$true] %s950_s2  ;;  %s989_s28 = int_to_ptr.vmem [resolvable:$true] %s988_s28 }
 0x173   : > { %s6729_s16 = scalar_lea.hbm %s7057_s6, 3584 }
 0x174   : > { %p6730_p13 = scmp.ne.s32.totalorder %s7057_s6, %s6729_s16  ;;  %p6736_p3 = scmp.lt.u32.totalorder %s6729_s16, %s7057_s6 }
 0x176   : > { %p6732_p1 = pnand %p6730_p13, %p7173_p0 }
 0x178   : > { %p6733_p2 = pneg %p6732_p1 }
 0x17a   : > { %p6738_p4 = pnand %p6736_p3, %p6733_p2 }
 0x17c   : > { %6741 = shalt.err (!%p6738_p4)
}
 0x17d   : > { %s6742_s25 = scalar_lea.vmem %s951_s2, 3584  ;;  %p6750_p10 = scmp.lt.s32.totalorder %s951_s2, %s951_s2 }
 0x17e   : > { %p6743_p5 = scmp.ne.s32.totalorder %s951_s2, %s6742_s25  ;;  %p6751_p7 = scmp.lt.s32.totalorder %s6742_s25, %s6742_s25 }
 0x180   : > { %p6745_p6 = pnand %p6743_p5, %p7173_p0  ;;  %p6752_p8 = por %p6751_p7, %p6750_p10 }
 0x182   : > { %p6746_p9 = pneg %p6745_p6 }
 0x184   : > { %p6753_p11 = pnand %p6752_p8, %p6746_p9 }
 0x186   : > { %6756 = shalt.err (!%p6753_p11)
}
 0x187   : > { %s9466_s7 = smov 8   ;;  %s9467_s11 = smov 128  }
 0x188   : > { %5993 = dma.hbm_to_vmem [thread:$0]  (!%p7161_p12), %s7057_s6, 3584, %s951_s2, [#allocation21], %s9467_s11, %s9467_s11, %s9466_s7  }
 0x189   : > { %s6757_s8 = scalar_lea.hbm %s7087_s13, 2048 }
 0x18a   : > { %p6758_p13 = scmp.ne.s32.totalorder %s7087_s13, %s6757_s8  ;;  %p6764_p3 = scmp.lt.u32.totalorder %s6757_s8, %s7087_s13 }
 0x18c   : > { %p6760_p1 = pnand %p6758_p13, %p7173_p0 }
 0x18e   : > { %p6761_p2 = pneg %p6760_p1 }
 0x190   : > { %p6766_p4 = pnand %p6764_p3, %p6761_p2 }
 0x192   : > { %6769 = shalt.err (!%p6766_p4)
}
 0x193   : > { %s6770_s4 = scalar_lea.vmem %s989_s28, 2048  ;;  %p6778_p10 = scmp.lt.s32.totalorder %s989_s28, %s989_s28 }
 0x194   : > { %p6771_p5 = scmp.ne.s32.totalorder %s989_s28, %s6770_s4  ;;  %p6779_p7 = scmp.lt.s32.totalorder %s6770_s4, %s6770_s4 }
 0x196   : > { %p6773_p6 = pnand %p6771_p5, %p7173_p0  ;;  %p6780_p8 = por %p6779_p7, %p6778_p10 }
 0x198   : > { %p6774_p9 = pneg %p6773_p6 }
 0x19a   : > { %p6781_p11 = pnand %p6780_p8, %p6774_p9 }
 0x19c   : > { %6784 = shalt.err (!%p6781_p11)
}
 0x19d   : > { %5999 = dma.hbm_to_vmem [thread:$0]  (!%p7161_p12), %s7087_s13, 2048, %s989_s28, [#allocation24], %s9465_s22, %s9465_s22, %s9464_s10  }
 0x19e   : > { %p9468_p13 = scmp.ne.s32.totalorder %s9461_s18, 0 }
 0x1a0   : > { %1018 = sbr.rel (%p9468_p13) target bundleno = 2589 (0xa1d), region = 144 }
 0x1a7   : > { %p9469_p1 = scmp.eq.s32.totalorder %s7125_s0, 0 }
 0x1a9   : > { %6830 = dma.done.wait (%p9469_p1), [#allocation3], 2048   ;;  %p9470_p0 = pmov %p9469_p1 }
 0x1ab   : > { %6832 = vsyncadd (%p9470_p0), [#allocation3], 4294965248  ;;  %p9471_p2 = pmov %p9470_p0 }
 0x1ac   : > { %p9472_p3 = pmov %p9470_p0 }
 0x1ad   : > { %6834 = dma.done.wait (%p9471_p2), [#allocation6], 32  }
 0x1ae   : > { %6836 = vsyncadd (%p9472_p3), [#allocation6], 4294967264  ;;  %p9473_p4 = pmov %p9470_p0 }
 0x1af   : > { %p9474_p12 = pmov %p9470_p0 }
 0x1b0   : > { %6838 = dma.done.wait (%p9473_p4), [#allocation9], 32  }
 0x1b1   : > { %6840 = vsyncadd (%p9474_p12), [#allocation9], 4294967264  ;;  %p9475_p5 = pmov %p9470_p0 }
 0x1b2   : > { %p9476_p6 = pmov %p9470_p0 }
 0x1b3   : > { %6842 = dma.done.wait (%p9475_p5), [#allocation12], 7200  }
 0x1b4   : > { %6844 = vsyncadd (%p9476_p6), [#allocation12], 4294960096  ;;  %p9477_p9 = pmov %p9470_p0 }
 0x1b5   : > { %p9478_p10 = pmov %p9470_p0 }
 0x1b6   : > { %6846 = dma.done.wait (%p9477_p9), [#allocation15], 32  }
 0x1b7   : > { %6848 = vsyncadd (%p9478_p10), [#allocation15], 4294967264  ;;  %p9479_p7 = pmov %p9470_p0 }
 0x1b8   : > { %p9480_p8 = pmov %p9470_p0 }
 0x1b9   : > { %6850 = dma.done.wait (%p9479_p7), [#allocation18], 3600  }
 0x1ba   : > { %6852 = vsyncadd (%p9480_p8), [#allocation18], 4294963696  ;;  %p9481_p11 = pmov %p9470_p0 }
 0x1bb   : > { %p9482_p13 = pmov %p9470_p0 }
 0x1bc   : > { %6854 = dma.done.wait (%p9481_p11), [#allocation21], 7168  }
 0x1bd   : > { %6856 = vsyncadd (%p9482_p13), [#allocation21], 4294960128  ;;  %p9483_p1 = pmov %p9470_p0 }
 0x1bf   : > { %6858 = dma.done.wait (%p9483_p1), [#allocation24], 9216  }
 0x1c0   : > { %6860 = vsyncadd (%p9470_p0), [#allocation24], 4294958080  ;;  %s9484_s26 = sld [smem:[#allocation36_spill]]  ;;  %s9485_s18 = sld [smem:[#allocation39_spill]]  ;;  %v9429_v0 = vmov 0.0   ;;  %vm1183_vm0 = vcmask 523264  }
 0x1c1   : > { %p1154_p2 = scmp.lt.s32.totalorder %s7125_s0, 1  ;;  %1272 = vmatprep.mubr.f32.mxu0 %v9429_v0  ;;  %v1168_v21 = vld [vmem:[#allocation2 + $0x8] sm:$0xff]  ;;  %v1170_v22 = vld [vmem:[#allocation2 + $0x18] sm:$0xff]  ;;  %v1167_v23 = vld [vmem:[#allocation2] sm:$0xff]  ;;  %s9486_s2 = sld [smem:[#allocation41_spill]]  ;;  %v9431_v48 = vmov 0.0|0.0  }
 0x1c2   : > { %v5546_v24 = vpack.c.bf16 %v1170_v22, %v1168_v21  ;;  %v1169_v25 = vld [vmem:[#allocation2 + $0x10] sm:$0xff]  ;;  %v1172_v26 = vld [vmem:[#allocation2 + $0x28] sm:$0xff]  ;;  %v1174_v27 = vld [vmem:[#allocation2 + $0x38] sm:$0xff]  ;;  %vm1568_vm1 = vcmask 1042432   ;;  %vm1601_vm2 = vcmask 1046528   ;;  %vm1650_vm3 = vcmask 1045504  }
 0x1c3   : > { %s1155_s1 = scalar_select %p1154_p2, %s7125_s0, 1  ;;  %v5548_v28 = vpack.c.bf16 %v1169_v25, %v1167_v23  ;;  %v5550_v29 = vpack.c.bf16 %v1174_v27, %v1172_v26  ;;  %v1171_v30 = vld [vmem:[#allocation2 + $0x20] sm:$0xff]  ;;  %v1173_v31 = vld [vmem:[#allocation2 + $0x30] sm:$0xff]  ;;  %v1176_v32 = vld [vmem:[#allocation2 + $0x48] sm:$0xff]  ;;  %vm1829_vm4 = vcmask 1041408   ;;  %vm1699_vm5 = vcmask 1044480  }
 0x1c4   : > { %5547 = vmatprep.subr.bf16.mxu0 %v5546_v24  ;;  %v1178_v33 = vld [vmem:[#allocation2 + $0x58] sm:$0xff]  ;;  %v5552_v34 = vpack.c.bf16 %v1173_v31, %v1171_v30  ;;  %v1175_v36 = vld [vmem:[#allocation2 + $0x40] sm:$0xff]  ;;  %v1177_v37 = vld [vmem:[#allocation2 + $0x50] sm:$0xff]  ;;  %s6933_s28 = smov 64   ;;  %s6934_s16 = smov 32   ;;  %vm1748_vm6 = vcmask 1043456  }
 0x1c5   : > { %s5457_s10 = sshll.u32 %s1155_s1, 6  ;;  %5549 = vmatpush1.bf16.msra.mxu0 %v5548_v28  ;;  %v5554_v35 = vpack.c.bf16 %v1178_v33, %v1176_v32  ;;  %v1180_v38 = vld [vmem:[#allocation2 + $0x68] sm:$0xff]  ;;  %v1182_v39 = vld [vmem:[#allocation2 + $0x78] sm:$0xff]  ;;  %v5556_v40 = vpack.c.bf16 %v1177_v37, %v1175_v36  ;;  %v1179_v42 = vld [vmem:[#allocation2 + $0x60] sm:$0xff]  ;;  %s6935_s25 = smov 96   ;;  %vm1878_vm7 = vcmask 261120  }
 0x1c6   : > { %s7391_s22 = scalar_lea.vmem %s9484_s26, %s5457_s10  ;;  %v1393_v1 = vld [vmem:[%s9485_s18] sm:$0xff]  ;;  %v1394_v2 = vld [vmem:[%s9485_s18 + $0x8] sm:$0xff]  ;;  %v1395_v3 = vld [vmem:[%s9485_s18 + $0x10] sm:$0xff]  ;;  %5551 = vmatprep.subr.bf16.mxu0 %v5550_v29  ;;  %v5558_v41 = vpack.c.bf16 %v1182_v39, %v1180_v38  ;;  %s9487_s7 = sld [smem:[#allocation44_spill]]  ;;  %vm1895_vm8 = vcmask 785408   ;;  %vm4459_vm9 = vcmask 1040384  }
 0x1c7   : > { %v5562_v4 = vpack.c.bf16 %v1394_v2, %v1393_v1  ;;  %v1396_v5 = vld [vmem:[%s9485_s18 + $0x18] sm:$0xff]  ;;  %v1397_v7 = vld [vmem:[%s9485_s18 + $0x20] sm:$0xff]  ;;  %v1398_v8 = vld [vmem:[%s9485_s18 + $0x28] sm:$0xff]  ;;  %s9488_s11 = sld [smem:[#allocation37_spill]]  ;;  %s9489_s8 = sld [smem:[#allocation38_spill]] }
 0x1c8   : > { %v5566_v6 = vpack.c.bf16 %v1396_v5, %v1395_v3  ;;  %v7400_v9 = vld [vmem:[%s7391_s22] sm:$0xff]  ;;  %v5570_v10 = vpack.c.bf16 %v1398_v8, %v1397_v7  ;;  %v1399_v11 = vld [vmem:[%s9485_s18 + $0x30] sm:$0xff]  ;;  %v1400_v12 = vld [vmem:[%s9485_s18 + $0x38] sm:$0xff]  ;;  %s1151_s4 = sand.u32 1, %s6871_s23   ;;  %s9496_s10 = sld [smem:[#allocation45_spill]] }
 0x1c9   : > { %5563 = vmatprep.subr.bf16.mxu1 %v5562_v4  ;;  %5506 = vmatprep.mubr.msk.f32.mxu1 %vm1183_vm0, %v7400_v9  ;;  %v5574_v13 = vpack.c.bf16 %v1400_v12, %v1399_v11  ;;  %v1160_v14 = vld [vmem:[%s7391_s22 + $0x8] sm:$0xff]  ;;  %v7408_v15 = vld [vmem:[%s7391_s22 + $0x10] sm:$0xff]  ;;  %v7414_v16 = vld [vmem:[%s7391_s22 + $0x18] sm:$0xff]  ;;  %s7820_s26 = smul.u32 384, %s1151_s4  ;;  %p9512_p4 = scmp.ne.s32.totalorder %s9458_s15, 0 }
 0x1ca   : > { %5565 = vmatpush3.bf16.msra.mxu1 %v5562_v4  ;;  %v7417_v17 = vld [vmem:[%s7391_s22 + $0x20] sm:$0xff]  ;;  %v7424_v18 = vld [vmem:[%s7391_s22 + $0x28] sm:$0xff]  ;;  %v7427_v19 = vld [vmem:[%s7391_s22 + $0x30] sm:$0xff]  ;;  %5553 = vmatpush1.bf16.msra.mxu0 %v5552_v34 }
 0x1cb   : > { %5567 = vmatprep.subr.bf16.mxu1 %v5566_v6  ;;  %v7434_v20 = vld [vmem:[%s7391_s22 + $0x38] sm:$0xff]  ;;  %5555 = vmatprep.subr.bf16.mxu0 %v5554_v35  ;;  %v1181_v43 = vld [vmem:[#allocation2 + $0x70] sm:$0xff]  ;;  %v1920_v45 = vld [vmem:[%s9486_s2] sm:$0xff]  ;;  %s7845_s1 = scalar_lea.vmem [#allocation26], %s7820_s26  ;;  %s9502_s26 = sld [smem:[#allocation49_spill]] }
 0x1cc   : > { %v5560_v44 = vpack.c.bf16 %v1181_v43, %v1179_v42  ;;  %v1921_v46 = vld [vmem:[%s9486_s2 + $0x8] sm:$0xff]  ;;  %v1922_v49 = vld [vmem:[%s9486_s2 + $0x10] sm:$0xff]  ;;  %v1923_v50 = vld [vmem:[%s9486_s2 + $0x18] sm:$0xff] }
 0x1cd   : > { %v5579_v47 = vpack.c.bf16 %v1921_v46, %v1920_v45  ;;  %v5582_v51 = vpack.c.bf16 %v1923_v50, %v1922_v49  ;;  %v1924_v52 = vld [vmem:[%s9486_s2 + $0x20] sm:$0xff]  ;;  %v1925_v53 = vld [vmem:[%s9486_s2 + $0x28] sm:$0xff]  ;;  %v1926_v55 = vld [vmem:[%s9486_s2 + $0x30] sm:$0xff] }
 0x1ce   : > { %5569 = vmatpush3.bf16.msra.mxu1 %v5566_v6  ;;  %5557 = vmatpush1.bf16.msra.mxu0 %v5556_v40  ;;  %v5585_v54 = vpack.c.bf16 %v1925_v53, %v1924_v52  ;;  %v1927_v56 = vld [vmem:[%s9486_s2 + $0x38] sm:$0xff]  ;;  %v1928_v58 = vld [vmem:[%s9486_s2 + $0x40] sm:$0xff]  ;;  %v1929_v59 = vld [vmem:[%s9486_s2 + $0x48] sm:$0xff] }
 0x1cf   : > { %5571 = vmatprep.subr.bf16.mxu1 %v5570_v10  ;;  %5559 = vmatprep.subr.bf16.mxu0 %v5558_v41  ;;  %v5588_v57 = vpack.c.bf16 %v1927_v56, %v1926_v55  ;;  %v5591_v60 = vpack.c.bf16 %v1929_v59, %v1928_v58  ;;  %v1930_v61 = vld [vmem:[%s9486_s2 + $0x50] sm:$0xff]  ;;  %v1931_v62 = vld [vmem:[%s9486_s2 + $0x58] sm:$0xff]  ;;  %v1932_v1 = vld [vmem:[%s9486_s2 + $0x60] sm:$0xff] }
 0x1d0   : > { %v5594_v63 = vpack.c.bf16 %v1931_v62, %v1930_v61  ;;  %v1933_v2 = vld [vmem:[%s9486_s2 + $0x68] sm:$0xff]  ;;  %v1934_v4 = vld [vmem:[%s9486_s2 + $0x70] sm:$0xff]  ;;  %v1935_v5 = vld [vmem:[%s9486_s2 + $0x78] sm:$0xff] }
 0x1d1   : > { %v5597_v3 = vpack.c.bf16 %v1933_v2, %v1932_v1  ;;  %v5600_v6 = vpack.c.bf16 %v1935_v5, %v1934_v4  ;;  %v1936_v7 = vld [vmem:[%s9486_s2 + $0x80] sm:$0xff]  ;;  %v1937_v8 = vld [vmem:[%s9486_s2 + $0x88] sm:$0xff]  ;;  %v1939_v11 = vld [vmem:[%s9486_s2 + $0x98] sm:$0xff] }
 0x1d2   : > { %5573 = vmatpush3.bf16.msra.mxu1 %v5570_v10  ;;  %5561 = vmatpush1.bf16.msra.mxu0 %v5560_v44  ;;  %v1938_v10 = vld [vmem:[%s9486_s2 + $0x90] sm:$0xff] }
 0x1d3   : > { %5575 = vmatprep.subr.bf16.mxu1 %v5574_v13  ;;  %5578 = vmatprep.subr.bf16.mxu0 %v9431_v48  ;;  %v5606_v12 = vpack.c.bf16 %v1939_v11, %v1938_v10 }
 0x1d5   : > { %5362 = vmatmul.mubr.msk.f32.vlgmr.msra.gmra.mrb[0].mxu0 %vm1183_vm0, %v7400_v9  ;;  %v5603_v9 = vpack.c.bf16 %v1937_v8, %v1936_v7 }
 0x1d6   : > { %5577 = vmatpush3.bf16.msra.mxu1 %v5574_v13  ;;  %5580 = vmatpush1.bf16.msra.mxu0 %v5579_v47  ;;  %v7490_v13 = vld [vmem:[#allocation5] ss:$0 sm:$0xff] }
 0x1d7   : > { %1278 = vmatprep.mubr.f32.mxu0 %v9429_v0  ;;  %5581 = vmatprep.subr.bf16.mxu0 %v9431_v48 }
 0x1d9   : > { %5507 = vmatmul.mubr.msk.f32.vlgmr.msra.gmra.mrb[0].mxu1 %vm1183_vm0, %v1160_v14  ;;  %5363 = vmatmul.mubr.msk.f32.gmra.mrb[2].mxu0 %vm1183_vm0, %v1160_v14 }
 0x1da   : > { %5509 = vmatprep.mubr.msk.f32.mxu1 %vm1183_vm0, %v7408_v15  ;;  %5583 = vmatpush1.bf16.msra.mxu0 %v5582_v51 }
 0x1db   : > { %1284 = vmatprep.mubr.f32.mxu0 %v9429_v0  ;;  %5584 = vmatprep.subr.bf16.mxu0 %v9431_v48 }
 0x1dd   : > { %5510 = vmatmul.mubr.msk.f32.gmra.mrb[2].mxu1 %vm1183_vm0, %v7414_v16  ;;  %5364 = vmatmul.mubr.msk.f32.gmra.mrb[4].mxu0 %vm1183_vm0, %v7408_v15  ;;  %v7492_v15 = vld [vmem:[#allocation7] ss:$0 sm:$0xff] }
 0x1de   : > { %5512 = vmatprep.mubr.msk.f32.mxu1 %vm1183_vm0, %v7417_v17  ;;  %5586 = vmatpush1.bf16.msra.mxu0 %v5585_v54 }
 0x1df   : > { %1290 = vmatprep.mubr.f32.mxu0 %v9429_v0  ;;  %5587 = vmatprep.subr.bf16.mxu0 %v9431_v48 }
 0x1e1   : > { %5513 = vmatmul.mubr.msk.f32.gmra.mrb[4].mxu1 %vm1183_vm0, %v7424_v18  ;;  %5365 = vmatmul.mubr.msk.f32.gmra.mrb[6].mxu0 %vm1183_vm0, %v7414_v16 }
 0x1e2   : > { %5515 = vmatprep.mubr.msk.f32.mxu1 %vm1183_vm0, %v7427_v19  ;;  %5589 = vmatpush1.bf16.msra.mxu0 %v5588_v57 }
 0x1e3   : > { %1296 = vmatprep.mubr.f32.mxu0 %v9429_v0  ;;  %5590 = vmatprep.subr.bf16.mxu0 %v9431_v48 }
 0x1e5   : > { %5516 = vmatmul.mubr.msk.f32.gmra.mrb[6].mxu1 %vm1183_vm0, %v7434_v20  ;;  %5366 = vmatmul.mubr.msk.f32.gmra.mrb[8].mxu0 %vm1183_vm0, %v7417_v17 }
 0x1e6   : > { %5592 = vmatpush1.bf16.msra.mxu0 %v5591_v60  ;;  %1302 = vmatprep.mubr.f32.mxu0 %v9429_v0 }
 0x1e7   : > { %5593 = vmatprep.subr.bf16.mxu0 %v9431_v48 }
 0x1e9   : > { %5367 = vmatmul.mubr.msk.f32.gmra.mrb[10].mxu0 %vm1183_vm0, %v7424_v18  ;;  %v1940_v18 = vld [vmem:[%s9486_s2 + $0xa0] sm:$0xff] }
 0x1ea   : > { %5595 = vmatpush1.bf16.msra.mxu0 %v5594_v63  ;;  %1308 = vmatprep.mubr.f32.mxu0 %v9429_v0 }
 0x1eb   : > { %5596 = vmatprep.subr.bf16.mxu0 %v9431_v48 }
 0x1ed   : > { %5368 = vmatmul.mubr.msk.f32.gmra.mrb[12].mxu0 %vm1183_vm0, %v7427_v19  ;;  %v1941_v19 = vld [vmem:[%s9486_s2 + $0xa8] sm:$0xff] }
 0x1ee   : > { %5598 = vmatpush1.bf16.msra.mxu0 %v5597_v3  ;;  %1314 = vmatprep.mubr.f32.mxu0 %v9429_v0  ;;  %v5609_v21 = vpack.c.bf16 %v1941_v19, %v1940_v18 }
 0x1ef   : > { %5599 = vmatprep.subr.bf16.mxu0 %v9431_v48 }
 0x1f1   : > { %5369 = vmatmul.mubr.msk.f32.gmra.mrb[14].mxu0 %vm1183_vm0, %v7434_v20 }
 0x1f2   : > { %5601 = vmatpush1.bf16.msra.mxu0 %v5600_v6 }
 0x1f3   : > { %5602 = vmatprep.subr.bf16.mxu0 %v9431_v48 }
 0x1f6   : > { %5604 = vmatpush1.bf16.msra.mxu0 %v5603_v9 }
 0x1f7   : > { %5605 = vmatprep.subr.bf16.mxu0 %v9431_v48 }
 0x1fa   : > { %5607 = vmatpush1.bf16.msra.mxu0 %v5606_v12 }
 0x1fb   : > { %5608 = vmatprep.subr.bf16.mxu0 %v9431_v48 }
 0x1fe   : > { %5610 = vmatpush1.bf16.msra.mxu0 %v5609_v21 }
 0x1ff   : > { %5611 = vmatprep.subr.bf16.mxu0 %v9431_v48 }
 0x2ac   : > { %v5508_v14 = vpop.f32.mrb[0].mxu1 }
 0x2ad   : > { %v1514_v16 = vmul.f32 %v5508_v14, %v7490_v13  ;;  %v1467_v17 = vpop.f32.mrb[1].mxu1 }
 0x2ae   : > { %v1513_v20 = vmul.f32 %v7490_v13, %v1467_v17 }
 0x2af   : > { %v1529_v22 = vadd.f32 %v7492_v15, %v1514_v16 }
 0x2b0   : > { %v1528_v23 = vadd.f32 %v7492_v15, %v1513_v20  ;;  %v5511_v24 = vpop.f32.mrb[2].mxu1 }
 0x2b1   : > { %v1537_v25 = vmax.f32 %v1529_v22, 0.0  ;;  %v1516_v26 = vmul.f32 %v5511_v24, %v7490_v13  ;;  %v1477_v27 = vpop.f32.mrb[3].mxu1 }
 0x2b2   : > { %v1536_v28 = vmax.f32 %v1528_v23, 0.0  ;;  %v1515_v29 = vmul.f32 %v7490_v13, %v1477_v27 }
 0x2b3   : > { %v1553_v30 = vrot.slane %v1537_v25, 5  ;;  %v1531_v31 = vadd.f32 %v7492_v15, %v1516_v26 }
 0x2b4   : > { %v1552_v32 = vrot.slane %v1536_v28, 5  ;;  %v1530_v33 = vadd.f32 %v7492_v15, %v1515_v29  ;;  %v5514_v34 = vpop.f32.mrb[4].mxu1 }
 0x2b5   : > { %v7507_v35 = vsel %vm1568_vm1, 0.0, %v1553_v30  ;;  %v7510_v36 = vsel %vm1568_vm1, %v1553_v30, 0.0  ;;  %v1539_v37 = vmax.f32 %v1531_v31, 0.0  ;;  %v1518_v38 = vmul.f32 %v5514_v34, %v7490_v13  ;;  %v7513_v39 = vpop.f32.mrb[5].mxu1 }
 0x2b6   : > { %v7516_v40 = vsel %vm1568_vm1, 0.0, %v1552_v32  ;;  %v7519_v41 = vsel %vm1568_vm1, %v1552_v32, 0.0  ;;  %v1538_v42 = vmax.f32 %v1530_v33, 0.0  ;;  %v1833_v43 = vrot.slane %v7507_v35, 6 }
 0x2b7   : > { %v1555_v44 = vrot.slane %v1539_v37, 5  ;;  %v1834_v45 = vrot.slane %v7510_v36, 6  ;;  %v1784_v46 = vrot.slane %v7507_v35, 5  ;;  %v1785_v47 = vrot.slane %v7510_v36, 5 }
 0x2b8   : > { %v1554_v49 = vrot.slane %v1538_v42, 5  ;;  %v1651_v50 = vrot.slane %v7516_v40, 2  ;;  %v1652_v51 = vrot.slane %v7519_v41, 2  ;;  %v1654_v52 = vrot.slane %v7507_v35, 2  ;;  %v7528_v53 = vpop.f32.mrb[6].mxu1 }
 0x2b9   : > { %v7531_v54 = vsel %vm1568_vm1, 0.0, %v1555_v44  ;;  %v7534_v55 = vsel %vm1568_vm1, %v1555_v44, 0.0  ;;  %v1835_v56 = vsel %vm1829_vm4, %v1833_v43, %v1834_v45  ;;  %v1786_v57 = vsel %vm1568_vm1, %v1784_v46, %v1785_v47  ;;  %v7538_v58 = vpop.f32.mrb[7].mxu1 }
 0x2ba   : > { %v7541_v59 = vsel %vm1568_vm1, 0.0, %v1554_v49  ;;  %v7544_v60 = vsel %vm1568_vm1, %v1554_v49, 0.0  ;;  %1856 = vrot.lane.b32.xlu0 %v1835_v56, %s6933_s28  ;;  %1807 = vrot.lane.b32.xlu1 %v1786_v57, %s6934_s16  ;;  %v1653_v61 = vsel %vm1650_vm3, %v1651_v50, %v1652_v51  ;;  %v1655_v62 = vrot.slane %v7510_v36, 2 }
 0x2bb   : > { %v1602_v63 = vrot.slane %v7516_v40, 1  ;;  %v1603_v1 = vrot.slane %v7519_v41, 1  ;;  %v1605_v2 = vrot.slane %v7507_v35, 1  ;;  %v1606_v3 = vrot.slane %v7510_v36, 1 }
 0x2bc   : > { %v1656_v4 = vsel %vm1650_vm3, %v1654_v52, %v1655_v62  ;;  %v1830_v5 = vrot.slane %v7516_v40, 6  ;;  %v1831_v6 = vrot.slane %v7519_v41, 6  ;;  %v1781_v7 = vrot.slane %v7516_v40, 5 }
 0x2bd   : > { %v6129_v8 = vpack.i.bf16 %v1656_v4, %v1653_v61  ;;  %v1604_v9 = vsel %vm1601_vm2, %v1602_v63, %v1603_v1  ;;  %v1607_v10 = vsel %vm1601_vm2, %v1605_v2, %v1606_v3  ;;  %v1782_v11 = vrot.slane %v7519_v41, 5 }
 0x2be   : > { %v6124_v12 = vpack.i.bf16 %v1607_v10, %v1604_v9  ;;  %v1700_v14 = vrot.slane %v7516_v40, 3  ;;  %v1701_v16 = vrot.slane %v7519_v41, 3  ;;  %v1703_v17 = vrot.slane %v7507_v35, 3 }
 0x2bf   : > { %6130 = vrot.lane.b32.xlu1 %v6129_v8, %s6933_s28  ;;  %v1704_v18 = vrot.slane %v7510_v36, 3  ;;  %v1608_v19 = vrot.slane %v7541_v59, 1  ;;  %v1609_v21 = vrot.slane %v7544_v60, 1  ;;  %v1611_v22 = vrot.slane %v7531_v54, 1 }
 0x2c0   : > { %6125 = vrot.lane.b32.xlu0 %v6124_v12, %s6934_s16  ;;  %v1702_v20 = vsel %vm1699_vm5, %v1700_v14, %v1701_v16  ;;  %v1612_v23 = vrot.slane %v7534_v55, 1  ;;  %v1832_v24 = vsel %vm1829_vm4, %v1830_v5, %v1831_v6  ;;  %v1783_v25 = vsel %vm1568_vm1, %v1781_v7, %v1782_v11 }
 0x2c1   : > { %v1705_v26 = vsel %vm1699_vm5, %v1703_v17, %v1704_v18  ;;  %v1533_v27 = vadd.f32 %v7492_v15, %v1518_v38  ;;  %v1610_v29 = vsel %vm1601_vm2, %v1608_v19, %v1609_v21  ;;  %v1657_v31 = vrot.slane %v7541_v59, 2 }
 0x2c2   : > { %v6134_v28 = vpack.i.bf16 %v1705_v26, %v1702_v20  ;;  %v1613_v30 = vsel %vm1601_vm2, %v1611_v22, %v1612_v23  ;;  %v1787_v34 = vrot.slane %v7541_v59, 5  ;;  %v1658_v37 = vrot.slane %v7544_v60, 2 }
 0x2c3   : > { %1854 = vrot.lane.b32.xlu1 %v1832_v24, %s6933_s28  ;;  %v6139_v32 = vpack.i.bf16 %v1613_v30, %v1610_v29  ;;  %v1541_v33 = vmax.f32 %v1533_v27, 0.0  ;;  %v1788_v42 = vrot.slane %v7544_v60, 5  ;;  %v1660_v38 = vrot.slane %v7531_v54, 2 }
 0x2c4   : > { %1805 = vrot.lane.b32.xlu0 %v1783_v25, %s6934_s16  ;;  %v1661_v43 = vrot.slane %v7534_v55, 2  ;;  %v1517_v44 = vmul.f32 %v7490_v13, %v7513_v39  ;;  %v1659_v46 = vsel %vm1650_vm3, %v1657_v31, %v1658_v37  ;;  %v1836_v47 = vrot.slane %v7541_v59, 6 }
 0x2c5   : > { %v1557_v45 = vrot.slane %v1541_v33, 5  ;;  %v1837_v49 = vrot.slane %v7544_v60, 6  ;;  %v1706_v52 = vrot.slane %v7541_v59, 3  ;;  %v1707_v56 = vrot.slane %v7544_v60, 3 }
 0x2c6   : > { %v1662_v50 = vsel %vm1650_vm3, %v1660_v38, %v1661_v43  ;;  %v1532_v51 = vadd.f32 %v7492_v15, %v1517_v44  ;;  %v1789_v39 = vsel %vm1568_vm1, %v1787_v34, %v1788_v42  ;;  %v1790_v2 = vrot.slane %v7531_v54, 5 }
 0x2c7   : > { %6140 = vrot.lane.b32.xlu1 %v6139_v32, %s6934_s16  ;;  %v6144_v57 = vpack.i.bf16 %v1662_v50, %v1659_v46  ;;  %v7599_v62 = vsel %vm1568_vm1, 0.0, %v1557_v45  ;;  %v7602_v63 = vsel %vm1568_vm1, %v1557_v45, 0.0  ;;  %v1838_v1 = vsel %vm1829_vm4, %v1836_v47, %v1837_v49 }
 0x2c8   : > { %6135 = vrot.lane.b32.xlu0 %v6134_v28, %s6935_s25  ;;  %v1540_v61 = vmax.f32 %v1532_v51, 0.0  ;;  %v1708_v4 = vsel %vm1699_vm5, %v1706_v52, %v1707_v56  ;;  %v1791_v5 = vrot.slane %v7534_v55, 5  ;;  %v1520_v6 = vmul.f32 %v7528_v53, %v7490_v13 }
 0x2c9   : > { %v1839_v7 = vrot.slane %v7531_v54, 6  ;;  %v1840_v8 = vrot.slane %v7534_v55, 6  ;;  %v1709_v9 = vrot.slane %v7531_v54, 3  ;;  %v1519_v10 = vmul.f32 %v7490_v13, %v7538_v58 }
 0x2ca   : > { %v1556_v3 = vrot.slane %v1540_v61, 5  ;;  %v1710_v53 = vrot.slane %v7534_v55, 3  ;;  %v1535_v14 = vadd.f32 %v7492_v15, %v1520_v6  ;;  %v1845_v16 = vrot.slane %v7599_v62, 6 }
 0x2cb   : > { %6145 = vrot.lane.b32.xlu1 %v6144_v57, %s6933_s28  ;;  %v1534_v17 = vadd.f32 %v7492_v15, %v1519_v10  ;;  %v1846_v58 = vrot.slane %v7602_v63, 6  ;;  %v1617_v20 = vrot.slane %v7599_v62, 1  ;;  %v1618_v21 = vrot.slane %v7602_v63, 1 }
 0x2cc   : > { %1809 = vrot.lane.b32.xlu0 %v1789_v39, %s6934_s16  ;;  %v7618_v11 = vsel %vm1568_vm1, 0.0, %v1556_v3  ;;  %v7621_v12 = vsel %vm1568_vm1, %v1556_v3, 0.0  ;;  %v1543_v19 = vmax.f32 %v1535_v14, 0.0  ;;  %v1792_v22 = vsel %vm1568_vm1, %v1790_v2, %v1791_v5 }
 0x2cd   : > { %v1614_v18 = vrot.slane %v7618_v11, 1  ;;  %v1615_v13 = vrot.slane %v7621_v12, 1  ;;  %v1841_v23 = vsel %vm1829_vm4, %v1839_v7, %v1840_v8  ;;  %v1542_v24 = vmax.f32 %v1534_v17, 0.0 }
 0x2ce   : > { %v1559_v25 = vrot.slane %v1543_v19, 5  ;;  %v1619_v26 = vsel %vm1601_vm2, %v1617_v20, %v1618_v21  ;;  %v1663_v27 = vrot.slane %v7618_v11, 2  ;;  %v1664_v28 = vrot.slane %v7621_v12, 2  ;;  %v1944_v21 = vld [vmem:[%s9486_s2 + $0xc0] sm:$0xff] }
 0x2cf   : > { %1728 = vrot.lane.b32.xlu1 %v1708_v4, %s6935_s25  ;;  %v1616_v15 = vsel %vm1601_vm2, %v1614_v18, %v1615_v13  ;;  %v1558_v29 = vrot.slane %v1542_v24, 5  ;;  %v1796_v30 = vrot.slane %v7599_v62, 5  ;;  %v1666_v32 = vrot.slane %v7599_v62, 2  ;;  %v1942_v13 = vld [vmem:[%s9486_s2 + $0xb0] sm:$0xff] }
 0x2d0   : > { %1858 = vrot.lane.b32.xlu0 %v1838_v1, %s6933_s28  ;;  %v6149_v31 = vpack.i.bf16 %v1619_v26, %v1616_v15  ;;  %v1847_v33 = vsel %vm1829_vm4, %v1845_v16, %v1846_v58  ;;  %v1797_v34 = vrot.slane %v7602_v63, 5  ;;  %v1665_v37 = vsel %vm1650_vm3, %v1663_v27, %v1664_v28  ;;  %v1943_v58 = vld [vmem:[%s9486_s2 + $0xb8] sm:$0xff] }
 0x2d1   : > { %v1667_v42 = vrot.slane %v7602_v63, 2  ;;  %v7648_v38 = vsel %vm1568_vm1, 0.0, %v1559_v25  ;;  %v7651_v43 = vsel %vm1568_vm1, %v1559_v25, 0.0  ;;  %v7654_v44 = vsel %vm1568_vm1, 0.0, %v1558_v29 }
 0x2d2   : > { %v7657_v45 = vsel %vm1568_vm1, %v1558_v29, 0.0  ;;  %v1712_v47 = vrot.slane %v7618_v11, 3  ;;  %v1713_v49 = vrot.slane %v7621_v12, 3  ;;  %v1715_v50 = vrot.slane %v7599_v62, 3  ;;  %v1946_v29 = vld [vmem:[%s9486_s2 + $0xd0] sm:$0xff] }
 0x2d3   : > { %1860 = vrot.lane.b32.xlu1 %v1841_v23, %s6933_s28  ;;  %v1668_v46 = vsel %vm1650_vm3, %v1666_v32, %v1667_v42  ;;  %v1716_v52 = vrot.slane %v7602_v63, 3  ;;  %v1620_v57 = vrot.slane %v7654_v44, 1  ;;  %v1621_v39 = vrot.slane %v7657_v45, 1  ;;  %v2497_v32 = vld [vmem:[%s9487_s7 + $0x8] sm:$0xff] }
 0x2d4   : > { %1811 = vrot.lane.b32.xlu0 %v1792_v22, %s6934_s16  ;;  %v6154_v51 = vpack.i.bf16 %v1668_v46, %v1665_v37  ;;  %v1714_v56 = vsel %vm1699_vm5, %v1712_v47, %v1713_v49  ;;  %v1711_v61 = vsel %vm1699_vm5, %v1709_v9, %v1710_v53  ;;  %v1623_v2 = vrot.slane %v7648_v38, 1  ;;  %v1945_v22 = vld [vmem:[%s9486_s2 + $0xc8] sm:$0xff] }
 0x2d5   : > { %v1717_v1 = vsel %vm1699_vm5, %v1715_v50, %v1716_v52  ;;  %v1624_v3 = vrot.slane %v7651_v43, 1  ;;  %v1798_v4 = vsel %vm1568_vm1, %v1796_v30, %v1797_v34  ;;  %v1622_v6 = vsel %vm1601_vm2, %v1620_v57, %v1621_v39  ;;  %v1947_v30 = vld [vmem:[%s9486_s2 + $0xd8] sm:$0xff] }
 0x2d6   : > { %v6159_v5 = vpack.i.bf16 %v1717_v1, %v1714_v56  ;;  %v1669_v8 = vrot.slane %v7654_v44, 2  ;;  %v1670_v9 = vrot.slane %v7657_v45, 2  ;;  %v1672_v10 = vrot.slane %v7648_v38, 2 }
 0x2d7   : > { %1864 = vrot.lane.b32.xlu1 %v1847_v33, %s6933_s28  ;;  %v1625_v7 = vsel %vm1601_vm2, %v1623_v2, %v1624_v3  ;;  %v1673_v14 = vrot.slane %v7651_v43, 2  ;;  %v1793_v16 = vrot.slane %v7618_v11, 5  ;;  %v1794_v17 = vrot.slane %v7621_v12, 5 }
 0x2d8   : > { %1730 = vrot.lane.b32.xlu0 %v1711_v61, %s6935_s25  ;;  %v6164_v53 = vpack.i.bf16 %v1625_v7, %v1622_v6  ;;  %v1671_v18 = vsel %vm1650_vm3, %v1669_v8, %v1670_v9  ;;  %v5612_v23 = vpack.c.bf16 %v1943_v58, %v1942_v13  ;;  %v1842_v15 = vrot.slane %v7618_v11, 6 }
 0x2d9   : > { %v1674_v19 = vsel %vm1650_vm3, %v1672_v10, %v1673_v14  ;;  %v1795_v24 = vsel %vm1568_vm1, %v1793_v16, %v1794_v17  ;;  %v1843_v25 = vrot.slane %v7621_v12, 6  ;;  %v1799_v26 = vrot.slane %v7654_v44, 5 }
 0x2da   : > { %v6169_v20 = vpack.i.bf16 %v1674_v19, %v1671_v18  ;;  %v1800_v27 = vrot.slane %v7657_v45, 5  ;;  %5613 = vmatpush1.bf16.msra.mxu0 %v5612_v23  ;;  %v5615_v28 = vpack.c.bf16 %v1945_v22, %v1944_v21  ;;  %v5618_v37 = vpack.c.bf16 %v1947_v30, %v1946_v29 }
 0x2db   : > { %6150 = vrot.lane.b32.xlu1 %v6149_v31, %s6934_s16  ;;  %5614 = vmatprep.subr.bf16.mxu0 %v9431_v48  ;;  %v2496_v31 = vld [vmem:[%s9487_s7] sm:$0xff]  ;;  %v1844_v33 = vsel %vm1829_vm4, %v1842_v15, %v1843_v25  ;;  %v1848_v46 = vrot.slane %v7654_v44, 6  ;;  %v1849_v47 = vrot.slane %v7657_v45, 6  ;;  %v1802_v50 = vrot.slane %v7648_v38, 5 }
 0x2dc   : > { %1815 = vrot.lane.b32.xlu0 %v1798_v4, %s6934_s16  ;;  %v1801_v34 = vsel %vm1568_vm1, %v1799_v26, %v1800_v27  ;;  %v7708_v42 = vpack.c.bf16 %v2497_v32, %v2496_v31  ;;  %v1718_v52 = vrot.slane %v7654_v44, 3  ;;  %v1719_v56 = vrot.slane %v7657_v45, 3 }
 0x2dd   : > { %v1850_v49 = vsel %vm1829_vm4, %v1848_v46, %v1849_v47  ;;  %v1721_v39 = vrot.slane %v7648_v38, 3  ;;  %v1722_v61 = vrot.slane %v7651_v43, 3  ;;  %v1851_v2 = vrot.slane %v7648_v38, 6  ;;  %v2500_v47 = vld [vmem:[%s9487_s7 + $0x20] sm:$0xff] }
 0x2de   : > { %5616 = vmatpush1.bf16.msra.mxu0 %v5615_v28  ;;  %v1720_v1 = vsel %vm1699_vm5, %v1718_v52, %v1719_v56  ;;  %v1852_v3 = vrot.slane %v7651_v43, 6  ;;  %v1749_v10 = vrot.slane %v7516_v40, 4  ;;  %v1753_v17 = vrot.slane %v7510_v36, 4  ;;  %v2499_v36 = vld [vmem:[%s9487_s7 + $0x18] sm:$0xff] }
 0x2df   : > { %6155 = vrot.lane.b32.xlu1 %v6154_v51, %s6933_s28  ;;  %5617 = vmatprep.subr.bf16.mxu0 %v9431_v48  ;;  %v1803_v51 = vrot.slane %v7651_v43, 5  ;;  %v1723_v4 = vsel %vm1699_vm5, %v1721_v39, %v1722_v61  ;;  %v1752_v18 = vrot.slane %v7507_v35, 4  ;;  %v1756_v28 = vrot.slane %v7544_v60, 4 }
 0x2e0   : > { %1813 = vrot.lane.b32.xlu0 %v1795_v24, %s6934_s16  ;;  %v2498_v24 = vld [vmem:[%s9487_s7 + $0x10] sm:$0xff]  ;;  %v1755_v30 = vrot.slane %v7541_v59, 4 }
 0x2e1   : > { %v1804_v57 = vsel %vm1568_vm1, %v1802_v50, %v1803_v51  ;;  %v1754_v15 = vsel %vm1748_vm6, %v1752_v18, %v1753_v17  ;;  %v5680_v31 = vpack.c.bf16 %v2499_v36, %v2498_v24  ;;  %v1765_v24 = vrot.slane %v7602_v63, 4 }
 0x2e2   : > { %5619 = vmatpush1.bf16.msra.mxu0 %v5618_v37  ;;  %v1764_v36 = vrot.slane %v7599_v62, 4 }
 0x2e3   : > { %6160 = vrot.lane.b32.xlu1 %v6159_v5, %s6935_s25  ;;  %5677 = vmatprep.subr.bf16.mxu0 %v7708_v42  ;;  %v1853_v5 = vsel %vm1829_vm4, %v1851_v2, %v1852_v3  ;;  %v2503_v2 = vld [vmem:[%s9487_s7 + $0x38] sm:$0xff] }
 0x2e4   : > { %1862 = vrot.lane.b32.xlu0 %v1844_v33, %s6933_s28 }
 0x2e7   : > { %1817 = vrot.lane.b32.xlu1 %v1801_v34, %s6934_s16 }
 0x2e8   : > { %6165 = vrot.lane.b32.xlu0 %v6164_v53, %s6934_s16  ;;  %v1750_v53 = vrot.slane %v7519_v41, 4 }
 0x2ea   : > { %v1751_v13 = vsel %vm1748_vm6, %v1749_v10, %v1750_v53 }
 0x2eb   : > { %1866 = vrot.lane.b32.xlu1 %v1850_v49, %s6933_s28  ;;  %v2501_v49 = vld [vmem:[%s9487_s7 + $0x28] sm:$0xff] }
 0x2ec   : > { %6170 = vrot.lane.b32.xlu0 %v6169_v20, %s6933_s28  ;;  %v5684_v56 = vpack.c.bf16 %v2501_v49, %v2500_v47 }
 0x2ef   : > { %1819 = vrot.lane.b32.xlu1 %v1804_v57, %s6934_s16  ;;  %v1757_v57 = vsel %vm1748_vm6, %v1755_v30, %v1756_v28  ;;  %v1321_v30 = vld [vmem:[%s9488_s11] sm:$0x3]  ;;  %s9498_s11 = sld [smem:[#allocation46_spill]] }
 0x2f0   : > { %1736 = vrot.lane.b32.xlu0 %v1720_v1, %s6935_s25  ;;  %v2502_v1 = vld [vmem:[%s9487_s7 + $0x30] sm:$0xff] }
 0x2f3   : > { %1738 = vrot.lane.b32.xlu1 %v1723_v4, %s6935_s25 }
 0x2f4   : > { %1868 = vrot.lane.b32.xlu0 %v1853_v5, %s6933_s28  ;;  %v1759_v5 = vrot.slane %v7534_v55, 4 }
 0x32c   : > { %v1857_v6 = vpop.permute.xlu0 %1856  ;;  %v1808_v7 = vpop.permute.xlu1 %1807 }
 0x32d   : > { %v1905_v26 = vsel %vm1878_vm7, %v1754_v15, %v1808_v7  ;;  %v1761_v15 = vrot.slane %v7618_v11, 4 }
 0x32e   : > { %v1913_v51 = vsel %vm1183_vm0, %v1905_v26, %v1857_v6 }
 0x331   : > { %v6131_v8 = vpop.permute.xlu1 %6130 }
 0x332   : > { %v6126_v9 = vpop.permute.xlu0 %6125  ;;  %v6132_v20 = vunpack.i.l.bf16 %v6131_v8  ;;  %v6133_v29 = vunpack.i.h.bf16 %v6131_v8  ;;  %v5688_v8 = vpack.c.bf16 %v2503_v2, %v2502_v1 }
 0x333   : > { %v6127_v14 = vunpack.i.l.bf16 %v6126_v9  ;;  %v6128_v41 = vunpack.i.h.bf16 %v6126_v9 }
 0x335   : > { %v1855_v16 = vpop.permute.xlu1 %1854  ;;  %v1879_v22 = vsel %vm1878_vm7, %v7516_v40, %v6127_v14  ;;  %v1880_v46 = vsel %vm1878_vm7, %v7507_v35, %v6128_v41 }
 0x336   : > { %v1806_v58 = vpop.permute.xlu0 %1805  ;;  %v1887_v40 = vsel %vm1183_vm0, %v1879_v22, %v6132_v20  ;;  %v1888_v52 = vsel %vm1183_vm0, %v1880_v46, %v6133_v29 }
 0x337   : > { %v1904_v19 = vsel %vm1878_vm7, %v1751_v13, %v1806_v58 }
 0x338   : > { %v1912_v21 = vsel %vm1183_vm0, %v1904_v19, %v1855_v16 }
 0x339   : > { %5380 = vmatprep.mubr.msk.f32.mxu0 %vm1895_vm8, %v1912_v21  ;;  %v6141_v23 = vpop.permute.xlu1 %6140  ;;  %v1323_v21 = vlaneseq }
 0x33a   : > { %v6136_v25 = vpop.permute.xlu0 %6135  ;;  %v6142_v33 = vunpack.i.l.bf16 %v6141_v23 }
 0x33b   : > { %v6137_v27 = vunpack.i.l.bf16 %v6136_v25  ;;  %v6138_v32 = vunpack.i.h.bf16 %v6136_v25 }
 0x33c   : > { %v1881_v61 = vsel %vm1878_vm7, %v7541_v59, %v6142_v33  ;;  %v6143_v59 = vunpack.i.h.bf16 %v6141_v23  ;;  %v1324_v23 = vshrl.u32 %v1323_v21, 7 }
 0x33d   : > { %v6146_v34 = vpop.permute.xlu1 %6145  ;;  %v1896_v37 = vsel %vm1895_vm8, %v1887_v40, %v6137_v27  ;;  %v1897_v39 = vsel %vm1895_vm8, %v1888_v52, %v6138_v32 }
 0x33e   : > { %v1810_v50 = vpop.permute.xlu0 %1809  ;;  %v6147_v60 = vunpack.i.l.bf16 %v6146_v34  ;;  %2037 = vmatmul.mubr.f32.vlgmr.msra.gmra.mrb[16].mxu0 %v1896_v37  ;;  %v6148_v53 = vunpack.i.h.bf16 %v6146_v34  ;;  %v1882_v13 = vsel %vm1878_vm7, %v7531_v54, %v6143_v59  ;;  %v7786_v29 = vsub.s32 0, %v1324_v23 }
 0x33f   : > { %5381 = vmatprep.mubr.msk.f32.mxu0 %vm1895_vm8, %v1913_v51  ;;  %5679 = vmatpush3.bf16.msra.mxu0 %v7708_v42  ;;  %v1906_v3 = vsel %vm1878_vm7, %v1757_v57, %v1810_v50  ;;  %v1758_v42 = vrot.slane %v7531_v54, 4  ;;  %v1762_v54 = vrot.slane %v7621_v12, 4  ;;  %v7789_v40 = vsub.s32 1, %v1324_v23  ;;  %v1349_v50 = vld [vmem:[%s9489_s8] sm:$0x3]  ;;  %s9499_s8 = sld [smem:[#allocation47_spill]] }
 0x340   : > { %5681 = vmatprep.subr.bf16.mxu0 %v5680_v31  ;;  %v1889_v6 = vsel %vm1183_vm0, %v1881_v61, %v6147_v60  ;;  %v1890_v19 = vsel %vm1183_vm0, %v1882_v13, %v6148_v53  ;;  %v1768_v12 = vrot.slane %v7657_v45, 4  ;;  %v1767_v57 = vrot.slane %v7654_v44, 4 }
 0x341   : > { %v1729_v35 = vpop.permute.xlu1 %1728  ;;  %v1760_v14 = vsel %vm1748_vm6, %v1758_v42, %v1759_v5  ;;  %v1763_v32 = vsel %vm1748_vm6, %v1761_v15, %v1762_v54  ;;  %v7813_v1 = vrot.slane %v1349_v50, %v7786_v29  ;;  %v7823_v42 = vrot.slane %v1349_v50, %v7789_v40 }
 0x342   : > { %v1859_v4 = vpop.permute.xlu0 %1858  ;;  %2042 = vmatmul.mubr.f32.gmra.mrb[18].mxu0 %v1897_v39  ;;  %v1898_v10 = vsel %vm1895_vm8, %v1889_v6, %v1729_v35 }
 0x343   : > { %v1914_v7 = vsel %vm1183_vm0, %v1906_v3, %v1859_v4  ;;  %5683 = vmatpush3.bf16.msra.mxu0 %v5680_v31  ;;  %v1766_v31 = vsel %vm1748_vm6, %v1764_v36, %v1765_v24  ;;  %v1274_v4 = vpop.f32.mrb[0].mxu0  ;;  %v1771_v36 = vrot.slane %v7651_v43, 4 }
 0x344   : > { %5382 = vmatprep.mubr.msk.f32.mxu0 %vm1895_vm8, %v1914_v7  ;;  %5685 = vmatprep.subr.bf16.mxu0 %v5684_v56  ;;  %v1276_v7 = vpop.f32.mrb[1].mxu0 }
 0x345   : > { %v1861_v9 = vpop.permute.xlu1 %1860 }
 0x346   : > { %v1812_v16 = vpop.permute.xlu0 %1811  ;;  %2047 = vmatmul.mubr.f32.gmra.mrb[20].mxu0 %v1898_v10 }
 0x347   : > { %v1907_v55 = vsel %vm1878_vm7, %v1760_v14, %v1812_v16  ;;  %5687 = vmatpush3.bf16.msra.mxu0 %v5684_v56  ;;  %v7803_v56 = vrot.slane %v1321_v30, %v7786_v29 }
 0x348   : > { %v1915_v17 = vsel %vm1183_vm0, %v1907_v55, %v1861_v9  ;;  %5689 = vmatprep.subr.bf16.mxu0 %v5688_v8 }
 0x349   : > { %5383 = vmatprep.mubr.msk.f32.mxu0 %vm1895_vm8, %v1915_v17  ;;  %v1865_v18 = vpop.permute.xlu1 %1864  ;;  %v1333_v6 = vmul.f32 %v7803_v56, %v1274_v4 }
 0x34a   : > { %v1731_v58 = vpop.permute.xlu0 %1730 }
 0x34b   : > { %v1899_v20 = vsel %vm1895_vm8, %v1890_v19, %v1731_v58  ;;  %5691 = vmatpush3.bf16.msra.mxu0 %v5688_v8  ;;  %v1769_v8 = vsel %vm1748_vm6, %v1767_v57, %v1768_v12  ;;  %v1361_v14 = vadd.f32 %v7813_v1, %v1333_v6 }
 0x34c   : > { %2052 = vmatmul.mubr.f32.gmra.mrb[22].mxu0 %v1899_v20  ;;  %5734 = vmatprep.subr.bf16.mxu0 %v9431_v48 }
 0x34d   : > { %v6151_v41 = vpop.permute.xlu1 %6150  ;;  %v1377_v58 = vmax.f32 %v1361_v14, 0.0 }
 0x34e   : > { %v1816_v22 = vpop.permute.xlu0 %1815  ;;  %v6152_v26 = vunpack.i.l.bf16 %v6151_v41  ;;  %v6153_v63 = vunpack.i.h.bf16 %v6151_v41  ;;  %v1770_v41 = vrot.slane %v7648_v38, 4 }
 0x34f   : > { %v1909_v34 = vsel %vm1878_vm7, %v1766_v31, %v1816_v22  ;;  %5026 = vst [vmem:[%s7845_s1] sm:$0xff] %v1377_v58 }
 0x350   : > { %v1883_v49 = vsel %vm1878_vm7, %v7618_v11, %v6152_v26  ;;  %v7809_v11 = vrot.slane %v1321_v30, %v7789_v40  ;;  %v1917_v61 = vsel %vm1183_vm0, %v1909_v34, %v1865_v18  ;;  %v1884_v3 = vsel %vm1878_vm7, %v7599_v62, %v6153_v63  ;;  %v1280_v18 = vpop.f32.mrb[2].mxu0 }
 0x351   : > { %v6156_v25 = vpop.permute.xlu1 %6155  ;;  %v1335_v19 = vmul.f32 %v7803_v56, %v1280_v18  ;;  %v1282_v20 = vpop.f32.mrb[3].mxu0 }
 0x352   : > { %v1814_v27 = vpop.permute.xlu0 %1813  ;;  %v6157_v28 = vunpack.i.l.bf16 %v6156_v25  ;;  %v6158_v60 = vunpack.i.h.bf16 %v6156_v25  ;;  %v1334_v10 = vmul.f32 %v7809_v11, %v1276_v7  ;;  %v1336_v23 = vmul.f32 %v7809_v11, %v1282_v20  ;;  %v6350_v7 = vld [vmem:[%s7391_s22 + $0x8] sm:$0xff] }
 0x353   : > { %v1908_v37 = vsel %vm1878_vm7, %v1763_v32, %v1814_v27  ;;  %v1363_v25 = vadd.f32 %v7813_v1, %v1335_v19 }
 0x354   : > { %v1891_v52 = vsel %vm1183_vm0, %v1883_v49, %v6157_v28  ;;  %v1892_v5 = vsel %vm1183_vm0, %v1884_v3, %v6158_v60  ;;  %v7834_v17 = vadd.f32 %v7823_v42, %v1334_v10  ;;  %v7850_v27 = vadd.f32 %v7823_v42, %v1336_v23  ;;  %v6354_v23 = vld [vmem:[%s7391_s22 + $0x28] sm:$0xff] }
 0x355   : > { %v6161_v33 = vpop.permute.xlu1 %6160  ;;  %v1379_v30 = vmax.f32 %v1363_v25, 0.0 }
 0x356   : > { %v1863_v46 = vpop.permute.xlu0 %1862  ;;  %v6162_v47 = vunpack.i.l.bf16 %v6161_v33  ;;  %v6163_v45 = vunpack.i.h.bf16 %v6161_v33  ;;  %v1772_v33 = vsel %vm1748_vm6, %v1770_v41, %v1771_v36  ;;  %v6355_v36 = vld [vmem:[%s7391_s22 + $0x30] sm:$0xff] }
 0x357   : > { %v1916_v51 = vsel %vm1183_vm0, %v1908_v37, %v1863_v46  ;;  %5032 = vst [vmem:[%s7845_s1 + $0x30] sm:$0xff] %v1379_v30  ;;  %v6356_v30 = vld [vmem:[%s7391_s22 + $0x38] sm:$0xff] }
 0x358   : > { %5384 = vmatprep.mubr.msk.f32.mxu0 %vm1895_vm8, %v1916_v51  ;;  %v1900_v35 = vsel %vm1895_vm8, %v1891_v52, %v6162_v47  ;;  %v1901_v9 = vsel %vm1895_vm8, %v1892_v5, %v6163_v45 }
 0x359   : > { %v1818_v39 = vpop.permute.xlu1 %1817  ;;  %2057 = vmatmul.mubr.f32.gmra.mrb[24].mxu0 %v1900_v35 }
 0x35a   : > { %v6166_v2 = vpop.permute.xlu0 %6165  ;;  %5385 = vmatprep.mubr.msk.f32.mxu0 %vm1895_vm8, %v1917_v61  ;;  %v1910_v62 = vsel %vm1878_vm7, %v1769_v8, %v1818_v39  ;;  %v6349_v39 = vld [vmem:[%s7391_s22] sm:$0xff] }
 0x35b   : > { %v6167_v59 = vunpack.i.l.bf16 %v6166_v2  ;;  %v6168_v21 = vunpack.i.h.bf16 %v6166_v2 }
 0x35d   : > { %v1867_v53 = vpop.permute.xlu1 %1866  ;;  %2062 = vmatmul.mubr.f32.gmra.mrb[26].mxu0 %v1901_v9  ;;  %v1885_v22 = vsel %vm1878_vm7, %v7654_v44, %v6167_v59  ;;  %v1286_v44 = vpop.f32.mrb[4].mxu0  ;;  %v1886_v63 = vsel %vm1878_vm7, %v7648_v38, %v6168_v21  ;;  %v6351_v59 = vld [vmem:[%s7391_s22 + $0x10] sm:$0xff] }
 0x35e   : > { %v1918_v16 = vsel %vm1183_vm0, %v1910_v62, %v1867_v53  ;;  %v6171_v55 = vpop.permute.xlu0 %6170  ;;  %v1337_v43 = vmul.f32 %v7803_v56, %v1286_v44  ;;  %v1288_v31 = vpop.f32.mrb[5].mxu0 }
 0x35f   : > { %v6172_v13 = vunpack.i.l.bf16 %v6171_v55  ;;  %5386 = vmatprep.mubr.msk.f32.mxu0 %vm1895_vm8, %v1918_v16  ;;  %v6173_v24 = vunpack.i.h.bf16 %v6171_v55  ;;  %v1338_v32 = vmul.f32 %v7809_v11, %v1288_v31  ;;  %v1292_v38 = vpop.f32.mrb[6].mxu0  ;;  %v6352_v55 = vld [vmem:[%s7391_s22 + $0x18] sm:$0xff] }
 0x360   : > { %v1365_v37 = vadd.f32 %v7813_v1, %v1337_v43  ;;  %v1339_v52 = vmul.f32 %v7803_v56, %v1292_v38  ;;  %v1294_v45 = vpop.f32.mrb[7].mxu0  ;;  %v2237_v38 = vld [vmem:[#allocation11 + $0x30] sm:$0xff] }
 0x361   : > { %v1820_v54 = vpop.permute.xlu1 %1819  ;;  %v1893_v15 = vsel %vm1183_vm0, %v1885_v22, %v6172_v13  ;;  %v1894_v34 = vsel %vm1183_vm0, %v1886_v63, %v6173_v24  ;;  %v7864_v50 = vadd.f32 %v7823_v42, %v1338_v32  ;;  %v1340_v57 = vmul.f32 %v7809_v11, %v1294_v45  ;;  %v1298_v2 = vpop.f32.mrb[8].mxu0  ;;  %v6353_v13 = vld [vmem:[%s7391_s22 + $0x20] sm:$0xff]  ;;  %v2232_v32 = vld [vmem:[#allocation11 + $0x8] sm:$0xff]  ;;  %v2241_v45 = vld [vmem:[#allocation11 + $0x50] sm:$0xff] }
 0x362   : > { %v1737_v26 = vpop.permute.xlu0 %1736  ;;  %v1911_v46 = vsel %vm1878_vm7, %v1772_v33, %v1820_v54  ;;  %v1381_v51 = vmax.f32 %v1365_v37, 0.0  ;;  %v1367_v35 = vadd.f32 %v7813_v1, %v1339_v52  ;;  %v1341_v4 = vmul.f32 %v7803_v56, %v1298_v2  ;;  %v1300_v5 = vpop.f32.mrb[9].mxu0  ;;  %v2234_v33 = vld [vmem:[#allocation11 + $0x18] sm:$0xff]  ;;  %v2233_v37 = vld [vmem:[#allocation11 + $0x10] sm:$0xff]  ;;  %v2243_v2 = vld [vmem:[#allocation11 + $0x60] sm:$0xff] }
 0x363   : > { %v1902_v28 = vsel %vm1895_vm8, %v1893_v15, %v1737_v26  ;;  %9490 = vst [vmem:[#allocation59_spill] sm:$0xff] %v7864_v50  ;;  %v7875_v61 = vadd.f32 %v7823_v42, %v1340_v57  ;;  %v1342_v6 = vmul.f32 %v7809_v11, %v1300_v5  ;;  %v1304_v10 = vpop.f32.mrb[10].mxu0 }
 0x364   : > { %2067 = vmatmul.mubr.f32.gmra.mrb[28].mxu0 %v1902_v28  ;;  %5038 = vst [vmem:[%s7845_s1 + $0x60] sm:$0xff] %v1381_v51  ;;  %v1383_v3 = vmax.f32 %v1367_v35, 0.0  ;;  %v1369_v8 = vadd.f32 %v7813_v1, %v1341_v4  ;;  %v1343_v53 = vmul.f32 %v7803_v56, %v1304_v10  ;;  %v1306_v14 = vpop.f32.mrb[11].mxu0  ;;  %v2239_v51 = vld [vmem:[#allocation11 + $0x40] sm:$0xff]  ;;  %v2244_v35 = vld [vmem:[#allocation11 + $0x68] sm:$0xff]  ;;  %v2245_v4 = vld [vmem:[#allocation11 + $0x70] sm:$0xff] }
 0x365   : > { %v1739_v12 = vpop.permute.xlu1 %1738  ;;  %9491 = vst [vmem:[#allocation60_spill] sm:$0xff] %v7875_v61  ;;  %v7886_v9 = vadd.f32 %v7823_v42, %v1342_v6  ;;  %v1344_v16 = vmul.f32 %v7809_v11, %v1306_v14  ;;  %v1310_v19 = vpop.f32.mrb[12].mxu0  ;;  %v5630_v57 = vpack.c.bf16 %v2241_v45, %v2239_v51  ;;  %v5634_v5 = vpack.c.bf16 %v2245_v4, %v2243_v2  ;;  %v2248_v6 = vld [vmem:[#allocation11 + $0x88] sm:$0xff]  ;;  %v2249_v10 = vld [vmem:[#allocation11 + $0x90] sm:$0xff]  ;;  %v2254_v14 = vld [vmem:[#allocation11 + $0xb8] sm:$0xff] }
 0x366   : > { %v1869_v47 = vpop.permute.xlu0 %1868  ;;  %v1903_v49 = vsel %vm1895_vm8, %v1894_v34, %v1739_v12  ;;  %5044 = vst [vmem:[%s7845_s1 + $0x90] sm:$0xff] %v1383_v3  ;;  %v1385_v62 = vmax.f32 %v1369_v8, 0.0  ;;  %v1371_v18 = vadd.f32 %v7813_v1, %v1343_v53  ;;  %v1345_v21 = vmul.f32 %v7803_v56, %v1310_v19  ;;  %v1312_v41 = vpop.f32.mrb[13].mxu0  ;;  %v2231_v12 = vld [vmem:[#allocation11] sm:$0xff]  ;;  %v2252_v53 = vld [vmem:[#allocation11 + $0xa8] sm:$0xff]  ;;  %v2258_v19 = vld [vmem:[#allocation11 + $0xd8] sm:$0xff] }
 0x367   : > { %v1919_v60 = vsel %vm1183_vm0, %v1911_v46, %v1869_v47  ;;  %9492 = vst [vmem:[#allocation61_spill] sm:$0xff] %v7886_v9  ;;  %v7897_v58 = vadd.f32 %v7823_v42, %v1344_v16  ;;  %v1346_v22 = vmul.f32 %v7809_v11, %v1312_v41  ;;  %v1316_v15 = vpop.f32.mrb[14].mxu0  ;;  %v5620_v34 = vpack.c.bf16 %v2234_v33, %v2232_v32  ;;  %v2238_v46 = vld [vmem:[#allocation11 + $0x38] sm:$0xff]  ;;  %v2235_v47 = vld [vmem:[#allocation11 + $0x20] sm:$0xff]  ;;  %v2265_v32 = vld [vmem:[#allocation11 + $0x110] sm:$0xff] }
 0x368   : > { %5387 = vmatprep.mubr.msk.f32.mxu0 %vm1895_vm8, %v1919_v60  ;;  %5050 = vst [vmem:[%s7845_s1 + $0xc0] sm:$0xff] %v1385_v62  ;;  %v1387_v20 = vmax.f32 %v1371_v18, 0.0  ;;  %v1373_v24 = vadd.f32 %v7813_v1, %v1345_v21  ;;  %v1347_v26 = vmul.f32 %v7803_v56, %v1316_v15  ;;  %v1318_v44 = vpop.f32.mrb[15].mxu0  ;;  %v5622_v56 = vpack.c.bf16 %v2233_v37, %v2231_v12  ;;  %v2247_v8 = vld [vmem:[#allocation11 + $0x80] sm:$0xff]  ;;  %v2253_v18 = vld [vmem:[#allocation11 + $0xb0] sm:$0xff]  ;;  %v2268_v33 = vld [vmem:[#allocation11 + $0x128] sm:$0xff] }
 0x369   : > { %2072 = vmatmul.mubr.f32.gmra.mrb[30].mxu0 %v1903_v49  ;;  %9493 = vst [vmem:[#allocation62_spill] sm:$0xff] %v7897_v58  ;;  %v7908_v54 = vadd.f32 %v7823_v42, %v1346_v22  ;;  %v1348_v28 = vmul.f32 %v7809_v11, %v1318_v44  ;;  %5621 = vmatprep.subr.bf16.mxu1 %v5620_v34  ;;  %v2236_v11 = vld [vmem:[#allocation11 + $0x28] sm:$0xff]  ;;  %v2251_v16 = vld [vmem:[#allocation11 + $0xa0] sm:$0xff]  ;;  %v2257_v22 = vld [vmem:[#allocation11 + $0xd0] sm:$0xff] }
 0x36a   : > { %5534 = vmatprep.mubr.msk.f32.mxu0 %vm1183_vm0, %v6349_v39  ;;  %5056 = vst [vmem:[%s7845_s1 + $0xf0] sm:$0xff] %v1387_v20  ;;  %v1389_v25 = vmax.f32 %v1373_v24, 0.0  ;;  %v1375_v43 = vadd.f32 %v7813_v1, %v1347_v26  ;;  %5623 = vmatpush1.bf16.msra.mxu1 %v5622_v56  ;;  %v5624_v49 = vpack.c.bf16 %v2238_v46, %v2236_v11  ;;  %v2240_v1 = vld [vmem:[#allocation11 + $0x48] sm:$0xff]  ;;  %v2246_v39 = vld [vmem:[#allocation11 + $0x78] sm:$0xff]  ;;  %v2255_v41 = vld [vmem:[#allocation11 + $0xc0] sm:$0xff] }
 0x36b   : > { %9494 = vst [vmem:[#allocation63_spill] sm:$0xff] %v7908_v54  ;;  %v7917_v31 = vadd.f32 %v7823_v42, %v1348_v28  ;;  %v5626_v60 = vpack.c.bf16 %v2237_v38, %v2235_v47  ;;  %v2242_v42 = vld [vmem:[#allocation11 + $0x58] sm:$0xff]  ;;  %v5632_v3 = vpack.c.bf16 %v2246_v39, %v2244_v35  ;;  %v5638_v62 = vpack.c.bf16 %v2249_v10, %v2247_v8  ;;  %v2261_v26 = vld [vmem:[#allocation11 + $0xf0] sm:$0xff]  ;;  %v2264_v44 = vld [vmem:[#allocation11 + $0x108] sm:$0xff] }
 0x36c   : > { %5062 = vst [vmem:[%s7845_s1 + $0x120] sm:$0xff] %v1389_v25  ;;  %v1391_v63 = vmax.f32 %v1375_v43, 0.0  ;;  %5625 = vmatprep.subr.bf16.mxu1 %v5624_v49  ;;  %v5628_v52 = vpack.c.bf16 %v2242_v42, %v2240_v1  ;;  %v5642_v20 = vpack.c.bf16 %v2253_v18, %v2251_v16  ;;  %v2262_v24 = vld [vmem:[#allocation11 + $0xf8] sm:$0xff]  ;;  %v2259_v25 = vld [vmem:[#allocation11 + $0xe0] sm:$0xff]  ;;  %v2269_v11 = vld [vmem:[#allocation11 + $0x130] sm:$0xff] }
 0x36d   : > { %5535 = vmatmul.mubr.msk.f32.vlgmr.msra.gmra.mrb[32].mxu0 %vm1183_vm0, %v6350_v7  ;;  %9495 = vst [vmem:[#allocation64_spill] sm:$0xff] %v7917_v31  ;;  %v2250_v7 = vld [vmem:[#allocation11 + $0x98] sm:$0xff]  ;;  %v2267_v56 = vld [vmem:[#allocation11 + $0x120] sm:$0xff]  ;;  %v2272_v46 = vld [vmem:[#allocation11 + $0x148] sm:$0xff] }
 0x36e   : > { %5537 = vmatprep.mubr.msk.f32.mxu0 %vm1183_vm0, %v6351_v59  ;;  %5068 = vst [vmem:[%s7845_s1 + $0x150] sm:$0xff] %v1391_v63  ;;  %5627 = vmatpush1.bf16.msra.mxu1 %v5626_v60  ;;  %v5636_v59 = vpack.c.bf16 %v2250_v7, %v2248_v6  ;;  %v2266_v28 = vld [vmem:[#allocation11 + $0x118] sm:$0xff]  ;;  %v2263_v63 = vld [vmem:[#allocation11 + $0x100] sm:$0xff]  ;;  %v5658_v49 = vpack.c.bf16 %v2269_v11, %v2267_v56  ;;  %v2273_v1 = vld [vmem:[#allocation11 + $0x150] sm:$0xff] }
 0x36f   : > { %5629 = vmatprep.subr.bf16.mxu1 %v5628_v52  ;;  %v5652_v43 = vpack.c.bf16 %v2266_v28, %v2264_v44  ;;  %v2270_v12 = vld [vmem:[#allocation11 + $0x138] sm:$0xff]  ;;  %v5654_v34 = vpack.c.bf16 %v2265_v32, %v2263_v63  ;;  %v2271_v60 = vld [vmem:[#allocation11 + $0x140] sm:$0xff]  ;;  %v2276_v52 = vld [vmem:[#allocation11 + $0x168] sm:$0xff] }
 0x370   : > { %v5656_v37 = vpack.c.bf16 %v2270_v12, %v2268_v33  ;;  %v2274_v47 = vld [vmem:[#allocation11 + $0x158] sm:$0xff]  ;;  %v5662_v42 = vpack.c.bf16 %v2273_v1, %v2271_v60  ;;  %v2277_v39 = vld [vmem:[#allocation11 + $0x170] sm:$0xff]  ;;  %v2279_v10 = vld [vmem:[#allocation11 + $0x180] sm:$0xff] }
 0x371   : > { %5538 = vmatmul.mubr.msk.f32.gmra.mrb[34].mxu0 %vm1183_vm0, %v6352_v55  ;;  %v5640_v55 = vpack.c.bf16 %v2254_v14, %v2252_v53  ;;  %v5660_v38 = vpack.c.bf16 %v2274_v47, %v2272_v46  ;;  %v7920_v51 = vld [vmem:[#allocation8] ss:$0 sm:$0xff] }
 0x372   : > { %5540 = vmatprep.mubr.msk.f32.mxu0 %vm1183_vm0, %v6353_v13  ;;  %5631 = vmatpush1.bf16.msra.mxu1 %v5630_v57  ;;  %v2256_v13 = vld [vmem:[#allocation11 + $0xc8] sm:$0xff]  ;;  %v2278_v45 = vld [vmem:[#allocation11 + $0x178] sm:$0xff]  ;;  %v2275_v57 = vld [vmem:[#allocation11 + $0x160] sm:$0xff] }
 0x373   : > { %5633 = vmatprep.subr.bf16.mxu1 %v5632_v3  ;;  %v5644_v21 = vpack.c.bf16 %v2258_v19, %v2256_v13  ;;  %v5664_v35 = vpack.c.bf16 %v2278_v45, %v2276_v52  ;;  %v7922_v3 = vld [vmem:[#allocation10] ss:$0 sm:$0xff]  ;;  %v5666_v4 = vpack.c.bf16 %v2277_v39, %v2275_v57  ;;  %v2283_v13 = vld [vmem:[#allocation11 + $0x1a0] sm:$0xff] }
 0x374   : > { %v2282_v6 = vld [vmem:[#allocation11 + $0x198] sm:$0xff] }
 0x375   : > { %5541 = vmatmul.mubr.msk.f32.gmra.mrb[36].mxu0 %vm1183_vm0, %v6354_v23  ;;  %v2260_v23 = vld [vmem:[#allocation11 + $0xe8] sm:$0xff]  ;;  %v2286_v18 = vld [vmem:[#allocation11 + $0x1b8] sm:$0xff] }
 0x376   : > { %5543 = vmatprep.mubr.msk.f32.mxu0 %vm1183_vm0, %v6355_v36  ;;  %5635 = vmatpush1.bf16.msra.mxu1 %v5634_v5  ;;  %v5646_v36 = vpack.c.bf16 %v2257_v22, %v2255_v41  ;;  %v5648_v15 = vpack.c.bf16 %v2262_v24, %v2260_v23  ;;  %v2280_v5 = vld [vmem:[#allocation11 + $0x188] sm:$0xff]  ;;  %v2285_v22 = vld [vmem:[#allocation11 + $0x1b0] sm:$0xff] }
 0x377   : > { %5637 = vmatprep.subr.bf16.mxu1 %v5636_v59  ;;  %v5668_v59 = vpack.c.bf16 %v2282_v6, %v2280_v5  ;;  %v5674_v23 = vpack.c.bf16 %v2285_v22, %v2283_v13 }
 0x379   : > { %5544 = vmatmul.mubr.msk.f32.gmra.mrb[38].mxu0 %vm1183_vm0, %v6356_v30  ;;  %v5650_v30 = vpack.c.bf16 %v2261_v26, %v2259_v25 }
 0x37a   : > { %5639 = vmatpush1.bf16.msra.mxu1 %v5638_v62  ;;  %v2281_v62 = vld [vmem:[#allocation11 + $0x190] sm:$0xff] }
 0x37b   : > { %5641 = vmatprep.subr.bf16.mxu1 %v5640_v55  ;;  %v5670_v14 = vpack.c.bf16 %v2281_v62, %v2279_v10  ;;  %v2284_v55 = vld [vmem:[#allocation11 + $0x1a8] sm:$0xff] }
 0x37c   : > { %v5672_v41 = vpack.c.bf16 %v2286_v18, %v2284_v55 }
 0x37e   : > { %5643 = vmatpush1.bf16.msra.mxu1 %v5642_v20 }
 0x37f   : > { %5645 = vmatprep.subr.bf16.mxu1 %v5644_v21 }
 0x382   : > { %5647 = vmatpush1.bf16.msra.mxu1 %v5646_v36 }
 0x383   : > { %5649 = vmatprep.subr.bf16.mxu1 %v5648_v15 }
 0x386   : > { %5651 = vmatpush1.bf16.msra.mxu1 %v5650_v30 }
 0x387   : > { %5653 = vmatprep.subr.bf16.mxu1 %v5652_v43 }
 0x38a   : > { %5655 = vmatpush1.bf16.msra.mxu1 %v5654_v34 }
 0x38b   : > { %5657 = vmatprep.subr.bf16.mxu1 %v5656_v37 }
 0x38e   : > { %5659 = vmatpush1.bf16.msra.mxu1 %v5658_v49 }
 0x38f   : > { %5661 = vmatprep.subr.bf16.mxu1 %v5660_v38 }
 0x392   : > { %5663 = vmatpush1.bf16.msra.mxu1 %v5662_v42 }
 0x393   : > { %5665 = vmatprep.subr.bf16.mxu1 %v5664_v35 }
 0x396   : > { %5667 = vmatpush1.bf16.msra.mxu1 %v5666_v4 }
 0x397   : > { %5669 = vmatprep.subr.bf16.mxu1 %v5668_v59  ;;  %v5406_v59 = vld [vmem:[#allocation14] ss:$0 sm:$0xff] }
 0x39a   : > { %5671 = vmatpush1.bf16.msra.mxu1 %v5670_v14 }
 0x39b   : > { %5673 = vmatprep.subr.bf16.mxu1 %v5672_v41 }
 0x39e   : > { %5675 = vmatpush1.bf16.msra.mxu1 %v5674_v23 }
 0x39f   : > { %5692 = vmatprep.subr.bf16.mxu1 %v9431_v48 }
 0x411   : > { %v2038_v2 = vpop.f32.mrb[16].mxu0 }
 0x412   : > { %v2084_v7 = vmul.f32 %v7920_v51, %v2038_v2  ;;  %v2040_v8 = vpop.f32.mrb[17].mxu0 }
 0x414   : > { %v2099_v53 = vadd.f32 %v7922_v3, %v2084_v7 }
 0x415   : > { %v2043_v16 = vpop.f32.mrb[18].mxu0 }
 0x416   : > { %v7926_v19 = vmax.f32 %v2099_v53, 0.0  ;;  %v2085_v20 = vmul.f32 %v7920_v51, %v2043_v16  ;;  %v2045_v21 = vpop.f32.mrb[19].mxu0  ;;  %v5407_v53 = vld [vmem:[#allocation16] ss:$0 sm:$0xff] }
 0x418   : > { %v2100_v24 = vadd.f32 %v7922_v3, %v2085_v20  ;;  %v6174_v36 = vpack.i.bf16 %v7926_v19, %v9429_v0 }
 0x419   : > { %v2048_v15 = vpop.f32.mrb[20].mxu0 }
 0x41a   : > { %v2086_v25 = vmul.f32 %v7920_v51, %v2048_v15  ;;  %6175 = vrot.lane.b32.xlu0 %v6174_v36, %s6934_s16  ;;  %v2050_v26 = vpop.f32.mrb[21].mxu0  ;;  %v7934_v44 = vmax.f32 %v2100_v24, 0.0 }
 0x41c   : > { %v2101_v28 = vadd.f32 %v7922_v3, %v2086_v25  ;;  %v6184_v33 = vpack.i.bf16 %v7934_v44, %v7926_v19 }
 0x41e   : > { %v7938_v30 = vmax.f32 %v2101_v28, 0.0  ;;  %6180 = vrot.lane.b32.xlu0 %v6174_v36, %s6933_s28 }
 0x41f   : > { %v2053_v43 = vpop.f32.mrb[22].mxu0 }
 0x420   : > { %v2087_v63 = vmul.f32 %v7920_v51, %v2053_v43  ;;  %2128 = vrot.lane.b32.xlu1 %v7938_v30, %s6934_s16  ;;  %v2055_v32 = vpop.f32.mrb[23].mxu0  ;;  %v6189_v37 = vpack.i.bf16 %v7938_v30, %v7934_v44 }
 0x422   : > { %v2102_v12 = vadd.f32 %v7922_v3, %v2087_v63  ;;  %6185 = vrot.lane.b32.xlu0 %v6184_v33, %s6935_s25 }
 0x424   : > { %v7948_v34 = vmax.f32 %v2102_v12, 0.0 }
 0x426   : > { %6190 = vrot.lane.b32.xlu0 %v6189_v37, %s6933_s28  ;;  %2152 = vrot.lane.b32.xlu1 %v7948_v34, %s6933_s28  ;;  %v6194_v56 = vpack.i.bf16 %v7948_v34, %v7938_v30 }
 0x42a   : > { %6195 = vrot.lane.b32.xlu0 %v6194_v56, %s6935_s25  ;;  %2126 = vrot.lane.b32.xlu1 %v7934_v44, %s6934_s16 }
 0x42c   : > { %v2058_v11 = vpop.f32.mrb[24].mxu0 }
 0x42d   : > { %v2088_v46 = vmul.f32 %v7920_v51, %v2058_v11  ;;  %v2060_v47 = vpop.f32.mrb[25].mxu0 }
 0x42e   : > { %2130 = vrot.lane.b32.xlu1 %v7948_v34, %s6934_s16 }
 0x42f   : > { %v2103_v49 = vadd.f32 %v7922_v3, %v2088_v46 }
 0x430   : > { %v2063_v38 = vpop.f32.mrb[26].mxu0 }
 0x431   : > { %v7964_v60 = vmax.f32 %v2103_v49, 0.0  ;;  %v2089_v1 = vmul.f32 %v7920_v51, %v2063_v38  ;;  %v2065_v42 = vpop.f32.mrb[27].mxu0 }
 0x433   : > { %v2104_v52 = vadd.f32 %v7922_v3, %v2089_v1  ;;  %2132 = vrot.lane.b32.xlu1 %v7964_v60, %s6934_s16  ;;  %2154 = vrot.lane.b32.xlu0 %v7964_v60, %s6933_s28 }
 0x435   : > { %v7972_v45 = vmax.f32 %v2104_v52, 0.0 }
 0x437   : > { %v2068_v57 = vpop.f32.mrb[28].mxu0  ;;  %2134 = vrot.lane.b32.xlu0 %v7972_v45, %s6934_s16  ;;  %2156 = vrot.lane.b32.xlu1 %v7972_v45, %s6933_s28  ;;  %v6199_v2 = vpack.i.bf16 %v7972_v45, %v7964_v60 }
 0x438   : > { %v2090_v35 = vmul.f32 %v7920_v51, %v2068_v57  ;;  %v2070_v39 = vpop.f32.mrb[29].mxu0 }
 0x43a   : > { %v2105_v4 = vadd.f32 %v7922_v3, %v2090_v35 }
 0x43b   : > { %6200 = vrot.lane.b32.xlu0 %v6199_v2, %s6935_s25 }
 0x43c   : > { %v7983_v5 = vmax.f32 %v2105_v4, 0.0  ;;  %v2073_v6 = vpop.f32.mrb[30].mxu0 }
 0x43d   : > { %v2091_v7 = vmul.f32 %v7920_v51, %v2073_v6  ;;  %v2075_v8 = vpop.f32.mrb[31].mxu0 }
 0x43e   : > { %2158 = vrot.lane.b32.xlu1 %v7983_v5, %s6933_s28  ;;  %v2754_v8 = vld [vmem:[#allocation17] sm:$0xff] }
 0x43f   : > { %v2106_v10 = vadd.f32 %v7922_v3, %v2091_v7  ;;  %2193 = vrot.lane.b32.xlu0 %v7983_v5, %s6934_s16 }
 0x440   : > { %v5536_v62 = vpop.f32.mrb[32].mxu0 }
 0x441   : > { %v7991_v14 = vmax.f32 %v2106_v10, 0.0  ;;  %v2617_v16 = vmul.f32 %v5536_v62, %v5406_v59  ;;  %v2570_v55 = vpop.f32.mrb[33].mxu0 }
 0x442   : > { %v2616_v18 = vmul.f32 %v5406_v59, %v2570_v55 }
 0x443   : > { %v7993_v13 = vadd.f32 %v5407_v53, %v2617_v16  ;;  %2199 = vrot.lane.b32.xlu1 %v7991_v14, %s6933_s28  ;;  %v6204_v51 = vpack.i.bf16 %v7991_v14, %v7983_v5 }
 0x444   : > { %v7999_v20 = vadd.f32 %v5407_v53, %v2616_v18  ;;  %v5539_v3 = vpop.f32.mrb[34].mxu0 }
 0x445   : > { %v2640_v21 = vmax.f32 %v7993_v13, 0.0  ;;  %v2619_v41 = vmul.f32 %v5539_v3, %v5406_v59  ;;  %6205 = vrot.lane.b32.xlu0 %v6204_v51, %s6935_s25  ;;  %v2580_v22 = vpop.f32.mrb[35].mxu0  ;;  %v2756_v3 = vld [vmem:[#allocation17 + $0x10] sm:$0xff] }
 0x446   : > { %v2639_v23 = vmax.f32 %v7999_v20, 0.0  ;;  %v2618_v26 = vmul.f32 %v5406_v59, %v2580_v22 }
 0x447   : > { %v2634_v24 = vadd.f32 %v5407_v53, %v2619_v41  ;;  %2195 = vrot.lane.b32.xlu1 %v7991_v14, %s6934_s16  ;;  %v2757_v41 = vld [vmem:[#allocation17 + $0x18] sm:$0xff] }
 0x448   : > { %v6209_v36 = vpack.i.bf16 %v2640_v21, %v2639_v23  ;;  %v5542_v15 = vpop.f32.mrb[36].mxu0  ;;  %v2633_v63 = vadd.f32 %v5407_v53, %v2618_v26  ;;  %v2759_v26 = vld [vmem:[#allocation17 + $0x28] sm:$0xff] }
 0x449   : > { %v8010_v25 = vmax.f32 %v2634_v24, 0.0  ;;  %v2590_v28 = vpop.f32.mrb[37].mxu0  ;;  %v2621_v33 = vmul.f32 %v5542_v15, %v5406_v59  ;;  %v2758_v15 = vld [vmem:[#allocation17 + $0x20] sm:$0xff] }
 0x44a   : > { %v2620_v12 = vmul.f32 %v5406_v59, %v2590_v28  ;;  %v8018_v37 = vmax.f32 %v2633_v63, 0.0  ;;  %v5699_v28 = vpack.c.bf16 %v2759_v26, %v2758_v15 }
 0x44b   : > { %6210 = vrot.lane.b32.xlu1 %v6209_v36, %s6935_s25  ;;  %2678 = vrot.lane.b32.xlu0 %v8010_v25, %s6933_s28  ;;  %v2636_v56 = vadd.f32 %v5407_v53, %v2621_v33  ;;  %v2761_v33 = vld [vmem:[#allocation17 + $0x38] sm:$0xff] }
 0x44c   : > { %v5545_v43 = vpop.f32.mrb[38].mxu0  ;;  %v2635_v11 = vadd.f32 %v5407_v53, %v2620_v12 }
 0x44d   : > { %v2600_v32 = vpop.f32.mrb[39].mxu0  ;;  %v8023_v46 = vmax.f32 %v2636_v56, 0.0  ;;  %v2623_v38 = vmul.f32 %v5545_v43, %v5406_v59 }
 0x44e   : > { %v8025_v47 = vmax.f32 %v2635_v11, 0.0  ;;  %v2622_v49 = vmul.f32 %v5406_v59, %v2600_v32  ;;  %v2755_v59 = vld [vmem:[#allocation17 + $0x8] sm:$0xff]  ;;  %v2760_v32 = vld [vmem:[#allocation17 + $0x30] sm:$0xff] }
 0x44f   : > { %6215 = vrot.lane.b32.xlu1 %v6209_v36, %s6933_s28  ;;  %2659 = vrot.lane.b32.xlu0 %v8010_v25, %s6934_s16  ;;  %v2638_v42 = vadd.f32 %v5407_v53, %v2623_v38  ;;  %v5693_v55 = vpack.c.bf16 %v2755_v59, %v2754_v8  ;;  %v5702_v11 = vpack.c.bf16 %v2761_v33, %v2760_v32  ;;  %v2766_v33 = vld [vmem:[#allocation17 + $0x60] sm:$0xff] }
 0x450   : > { %v2637_v1 = vadd.f32 %v5407_v53, %v2622_v49 }
 0x451   : > { %v8041_v57 = vmax.f32 %v2638_v42, 0.0  ;;  %v2762_v42 = vld [vmem:[#allocation17 + $0x40] sm:$0xff] }
 0x452   : > { %v8035_v52 = vmax.f32 %v2637_v1, 0.0 }
 0x453   : > { %6220 = vrot.lane.b32.xlu1 %v6209_v36, %s6934_s16  ;;  %2698 = vrot.lane.b32.xlu0 %v8018_v37, %s6935_s25  ;;  %v5696_v36 = vpack.c.bf16 %v2757_v41, %v2756_v3  ;;  %v2764_v3 = vld [vmem:[#allocation17 + $0x50] sm:$0xff]  ;;  %v2765_v41 = vld [vmem:[#allocation17 + $0x58] sm:$0xff] }
 0x457   : > { %2676 = vrot.lane.b32.xlu0 %v8018_v37, %s6933_s28  ;;  %2657 = vrot.lane.b32.xlu1 %v8018_v37, %s6934_s16 }
 0x45b   : > { %2682 = vrot.lane.b32.xlu1 %v8023_v46, %s6933_s28  ;;  %2680 = vrot.lane.b32.xlu0 %v8025_v47, %s6933_s28 }
 0x45f   : > { %2663 = vrot.lane.b32.xlu1 %v8023_v46, %s6934_s16  ;;  %2661 = vrot.lane.b32.xlu0 %v8025_v47, %s6934_s16 }
 0x463   : > { %2700 = vrot.lane.b32.xlu0 %v8010_v25, %s6935_s25  ;;  %2684 = vrot.lane.b32.xlu1 %v8035_v52, %s6933_s28 }
 0x467   : > { %2724 = vrot.lane.b32.xlu0 %v8041_v57, %s6933_s28  ;;  %2718 = vrot.lane.b32.xlu1 %v8035_v52, %s6934_s16 }
 0x46b   : > { %2720 = vrot.lane.b32.xlu0 %v8041_v57, %s6934_s16  ;;  %2702 = vrot.lane.b32.xlu1 %v8025_v47, %s6935_s25 }
 0x46f   : > { %2706 = vrot.lane.b32.xlu0 %v8035_v52, %s6935_s25  ;;  %2704 = vrot.lane.b32.xlu1 %v8023_v46, %s6935_s25 }
 0x473   : > { %2708 = vrot.lane.b32.xlu1 %v8041_v57, %s6935_s25 }
 0x48c   : > { %v6176_v35 = vpop.permute.xlu0 %6175 }
 0x48d   : > { %v8061_v2 = vunpack.i.l.bf16 %v6176_v35  ;;  %v6178_v8 = vunpack.i.h.bf16 %v6176_v35 }
 0x48f   : > { %v8067_v62 = vsel %vm1878_vm7, 0.0, %v8061_v2 }
 0x490   : > { %v6181_v39 = vpop.permute.xlu0 %6180 }
 0x491   : > { %v8063_v7 = vunpack.i.l.bf16 %v6181_v39  ;;  %v6183_v12 = vunpack.i.h.bf16 %v6181_v39 }
 0x492   : > { %v2129_v4 = vpop.permute.xlu1 %2128 }
 0x493   : > { %v2205_v53 = vsel %vm1878_vm7, %v7934_v44, %v2129_v4  ;;  %v8077_v51 = vsel %vm1183_vm0, %v8067_v62, %v8063_v7  ;;  %v2763_v4 = vld [vmem:[#allocation17 + $0x48] sm:$0xff]  ;;  %v2210_v39 = vsel %vm1183_vm0, %v8067_v62, %v6183_v12 }
 0x494   : > { %v6186_v6 = vpop.permute.xlu0 %6185  ;;  %v2767_v12 = vld [vmem:[#allocation17 + $0x68] sm:$0xff] }
 0x495   : > { %v6187_v10 = vunpack.i.l.bf16 %v6186_v6  ;;  %v6188_v56 = vunpack.i.h.bf16 %v6186_v6 }
 0x497   : > { %v2217_v22 = vsel %vm1895_vm8, %v8077_v51, %v6187_v10 }
 0x498   : > { %v2153_v16 = vpop.permute.xlu1 %2152  ;;  %v6191_v24 = vpop.permute.xlu0 %6190 }
 0x499   : > { %v8072_v18 = vsel %vm1183_vm0, %v2205_v53, %v2153_v16  ;;  %v6192_v10 = vunpack.i.l.bf16 %v6191_v24  ;;  %v5705_v53 = vpack.c.bf16 %v2763_v4, %v2762_v42 }
 0x49a   : > { %5390 = vmatprep.mubr.msk.f32.mxu1 %vm1895_vm8, %v8072_v18 }
 0x49b   : > { %2376 = vmatmul.mubr.f32.vlgmr.msra.gmra.mrb[8].mxu1 %v2217_v22  ;;  %v2203_v22 = vsel %vm1878_vm7, 0.0, %v6178_v8 }
 0x49c   : > { %5694 = vmatpush1.bf16.msra.mxu1 %v5693_v55  ;;  %v2127_v44 = vpop.permute.xlu1 %2126  ;;  %v6196_v43 = vpop.permute.xlu0 %6195  ;;  %v2211_v15 = vsel %vm1183_vm0, %v2203_v22, %v6192_v10 }
 0x49d   : > { %5695 = vmatprep.subr.bf16.mxu1 %v9431_v48  ;;  %v6197_v6 = vunpack.i.l.bf16 %v6196_v43 }
 0x49f   : > { %v2219_v26 = vsel %vm1895_vm8, %v2211_v15, %v6197_v6  ;;  %v2771_v6 = vld [vmem:[#allocation17 + $0x88] sm:$0xff] }
 0x4a0   : > { %5697 = vmatpush1.bf16.msra.mxu1 %v5696_v36  ;;  %v2131_v63 = vpop.permute.xlu1 %2130 }
 0x4a1   : > { %5698 = vmatprep.subr.bf16.mxu1 %v9431_v48  ;;  %v2206_v49 = vsel %vm1878_vm7, %v7938_v30, %v2131_v63  ;;  %v2218_v30 = vsel %vm1895_vm8, %v2210_v39, %v6188_v56  ;;  %v6193_v63 = vunpack.i.h.bf16 %v6191_v24  ;;  %v6198_v56 = vunpack.i.h.bf16 %v6196_v43  ;;  %v2768_v24 = vld [vmem:[#allocation17 + $0x70] sm:$0xff]  ;;  %v2770_v39 = vld [vmem:[#allocation17 + $0x80] sm:$0xff] }
 0x4a4   : > { %5700 = vmatpush1.bf16.msra.mxu1 %v5699_v28  ;;  %v5708_v28 = vpack.c.bf16 %v2765_v41, %v2764_v3  ;;  %v2773_v41 = vld [vmem:[#allocation17 + $0x98] sm:$0xff] }
 0x4a5   : > { %5701 = vmatprep.subr.bf16.mxu1 %v9431_v48  ;;  %v2133_v38 = vpop.permute.xlu1 %2132  ;;  %v2155_v1 = vpop.permute.xlu0 %2154 }
 0x4a6   : > { %v8089_v59 = vsel %vm1183_vm0, %v2206_v49, %v2155_v1  ;;  %v2207_v16 = vsel %vm1878_vm7, %v7948_v34, %v2133_v38  ;;  %v2204_v34 = vsel %vm1878_vm7, %v7926_v19, %v2127_v44  ;;  %v5711_v19 = vpack.c.bf16 %v2767_v12, %v2766_v33  ;;  %v2769_v1 = vld [vmem:[#allocation17 + $0x78] sm:$0xff]  ;;  %v2774_v33 = vld [vmem:[#allocation17 + $0xa0] sm:$0xff]  ;;  %v2775_v12 = vld [vmem:[#allocation17 + $0xa8] sm:$0xff] }
 0x4a7   : > { %5391 = vmatprep.mubr.msk.f32.mxu1 %vm1895_vm8, %v8089_v59  ;;  %v5714_v8 = vpack.c.bf16 %v2769_v1, %v2768_v24 }
 0x4a8   : > { %5703 = vmatpush1.bf16.msra.mxu1 %v5702_v11  ;;  %v2212_v11 = vsel %vm1183_vm0, %v2204_v34, %v6193_v63 }
 0x4a9   : > { %2382 = vmatmul.mubr.f32.gmra.mrb[10].mxu1 %v2218_v30  ;;  %5704 = vmatprep.subr.bf16.mxu1 %v9431_v48  ;;  %v2135_v35 = vpop.permute.xlu0 %2134  ;;  %v2157_v55 = vpop.permute.xlu1 %2156  ;;  %v2220_v4 = vsel %vm1895_vm8, %v2212_v11, %v6198_v56 }
 0x4aa   : > { %v8101_v36 = vsel %vm1183_vm0, %v2207_v16, %v2157_v55  ;;  %v2208_v49 = vsel %vm1878_vm7, %v7964_v60, %v2135_v35  ;;  %v5717_v35 = vpack.c.bf16 %v2771_v6, %v2770_v39  ;;  %v2780_v39 = vld [vmem:[#allocation17 + $0xd0] sm:$0xff]  ;;  %v2781_v6 = vld [vmem:[#allocation17 + $0xd8] sm:$0xff] }
 0x4ab   : > { %5392 = vmatprep.mubr.msk.f32.mxu1 %vm1895_vm8, %v8101_v36 }
 0x4ac   : > { %5706 = vmatpush1.bf16.msra.mxu1 %v5705_v53 }
 0x4ad   : > { %2388 = vmatmul.mubr.f32.gmra.mrb[12].mxu1 %v2219_v26  ;;  %5707 = vmatprep.subr.bf16.mxu1 %v9431_v48  ;;  %v6201_v32 = vpop.permute.xlu0 %6200  ;;  %v2227_v26 = vsel %vm1878_vm7, %v7991_v14, %v8061_v2  ;;  %v5723_v14 = vpack.c.bf16 %v2775_v12, %v2774_v33 }
 0x4ae   : > { %v6202_v43 = vunpack.i.l.bf16 %v6201_v32  ;;  %v6203_v53 = vunpack.i.h.bf16 %v6201_v32 }
 0x4b0   : > { %5709 = vmatpush1.bf16.msra.mxu1 %v5708_v28  ;;  %v2159_v38 = vpop.permute.xlu1 %2158  ;;  %v2221_v16 = vsel %vm1895_vm8, %v8072_v18, %v6202_v43  ;;  %v2222_v18 = vsel %vm1895_vm8, %v8089_v59, %v6203_v53  ;;  %v2779_v43 = vld [vmem:[#allocation17 + $0xc8] sm:$0xff]  ;;  %v5732_v53 = vpack.c.bf16 %v2781_v6, %v2780_v39 }
 0x4b1   : > { %v2216_v44 = vsel %vm1183_vm0, %v2208_v49, %v2159_v38  ;;  %5710 = vmatprep.subr.bf16.mxu1 %v9431_v48  ;;  %v2194_v42 = vpop.permute.xlu0 %2193  ;;  %v2776_v38 = vld [vmem:[#allocation17 + $0xb0] sm:$0xff] }
 0x4b2   : > { %5393 = vmatprep.mubr.msk.f32.mxu1 %vm1895_vm8, %v2216_v44  ;;  %v2225_v60 = vsel %vm1878_vm7, %v7972_v45, %v2194_v42  ;;  %v2772_v45 = vld [vmem:[#allocation17 + $0x90] sm:$0xff] }
 0x4b3   : > { %2394 = vmatmul.mubr.f32.gmra.mrb[14].mxu1 %v2220_v4  ;;  %v5720_v28 = vpack.c.bf16 %v2773_v41, %v2772_v45 }
 0x4b4   : > { %5712 = vmatpush1.bf16.msra.mxu1 %v5711_v19  ;;  %v2777_v19 = vld [vmem:[#allocation17 + $0xb8] sm:$0xff] }
 0x4b5   : > { %v2200_v10 = vpop.permute.xlu1 %2199  ;;  %5713 = vmatprep.subr.bf16.mxu1 %v9431_v48  ;;  %v5726_v1 = vpack.c.bf16 %v2777_v19, %v2776_v38 }
 0x4b6   : > { %v2228_v30 = vsel %vm1183_vm0, %v2225_v60, %v2200_v10 }
 0x4b7   : > { %5394 = vmatprep.mubr.msk.f32.mxu1 %vm1895_vm8, %v2228_v30  ;;  %v6206_v55 = vpop.permute.xlu0 %6205 }
 0x4b8   : > { %5715 = vmatpush1.bf16.msra.mxu1 %v5714_v8  ;;  %v6207_v34 = vunpack.i.l.bf16 %v6206_v55  ;;  %v6208_v56 = vunpack.i.h.bf16 %v6206_v55 }
 0x4b9   : > { %2400 = vmatmul.mubr.f32.gmra.mrb[16].mxu1 %v2221_v16  ;;  %v2196_v3 = vpop.permute.xlu1 %2195  ;;  %5716 = vmatprep.subr.bf16.mxu1 %v9431_v48 }
 0x4ba   : > { %v2226_v22 = vsel %vm1878_vm7, %v7983_v5, %v2196_v3  ;;  %v2230_v5 = vsel %vm1183_vm0, %v2227_v26, %v8063_v7  ;;  %v2223_v59 = vsel %vm1895_vm8, %v8101_v36, %v6207_v34  ;;  %v2224_v24 = vsel %vm1895_vm8, %v2216_v44, %v6208_v56  ;;  %v2778_v36 = vld [vmem:[#allocation17 + $0xc0] sm:$0xff] }
 0x4bb   : > { %v2229_v15 = vsel %vm1183_vm0, %v2226_v22, %v8063_v7  ;;  %v5729_v8 = vpack.c.bf16 %v2779_v43, %v2778_v36 }
 0x4bc   : > { %5718 = vmatpush1.bf16.msra.mxu1 %v5717_v35  ;;  %5395 = vmatprep.mubr.msk.f32.mxu1 %vm1895_vm8, %v2229_v15 }
 0x4bd   : > { %2406 = vmatmul.mubr.f32.gmra.mrb[18].mxu1 %v2222_v18  ;;  %v8135_v63 = vpop.permute.xlu1 %6210  ;;  %v2679_v32 = vpop.permute.xlu0 %2678  ;;  %5719 = vmatprep.subr.bf16.mxu1 %v9431_v48 }
 0x4be   : > { %5396 = vmatprep.mubr.msk.f32.mxu1 %vm1895_vm8, %v2230_v5  ;;  %v6212_v55 = vunpack.i.l.bf16 %v8135_v63  ;;  %v6213_v13 = vunpack.i.h.bf16 %v8135_v63 }
 0x4c0   : > { %5721 = vmatpush1.bf16.msra.mxu1 %v5720_v28  ;;  %v2740_v15 = vsel %vm1895_vm8, %v8077_v51, %v6212_v55  ;;  %v3317_v55 = vld [vmem:[#allocation20 + $0x18] sm:$0xff] }
 0x4c1   : > { %2412 = vmatmul.mubr.f32.gmra.mrb[20].mxu1 %v2223_v59  ;;  %v6216_v11 = vpop.permute.xlu1 %6215  ;;  %v2660_v49 = vpop.permute.xlu0 %2659  ;;  %5722 = vmatprep.subr.bf16.mxu1 %v9431_v48 }
 0x4c2   : > { %5397 = vmatprep.mubr.msk.f32.mxu1 %vm1895_vm8, %v8077_v51  ;;  %v6217_v3 = vunpack.i.l.bf16 %v6216_v11  ;;  %v6218_v63 = vunpack.i.h.bf16 %v6216_v11 }
 0x4c4   : > { %5724 = vmatpush1.bf16.msra.mxu1 %v5723_v14  ;;  %v2733_v18 = vsel %vm1183_vm0, %v8067_v62, %v6217_v3 }
 0x4c5   : > { %2418 = vmatmul.mubr.f32.gmra.mrb[22].mxu1 %v2224_v24  ;;  %v6221_v42 = vpop.permute.xlu1 %6220  ;;  %v2699_v4 = vpop.permute.xlu0 %2698  ;;  %5725 = vmatprep.subr.bf16.mxu1 %v9431_v48  ;;  %v2741_v33 = vsel %vm1895_vm8, %v2733_v18, %v6213_v13  ;;  %v3320_v13 = vld [vmem:[#allocation20 + $0x30] sm:$0xff] }
 0x4c6   : > { %v6222_v45 = vunpack.i.l.bf16 %v6221_v42 }
 0x4c8   : > { %5727 = vmatpush1.bf16.msra.mxu1 %v5726_v1  ;;  %v2727_v26 = vsel %vm1878_vm7, 0.0, %v6222_v45  ;;  %v3318_v45 = vld [vmem:[#allocation20 + $0x20] sm:$0xff] }
 0x4c9   : > { %v2677_v60 = vpop.permute.xlu0 %2676  ;;  %v2658_v10 = vpop.permute.xlu1 %2657  ;;  %5728 = vmatprep.subr.bf16.mxu1 %v9431_v48  ;;  %v2734_v56 = vsel %vm1183_vm0, %v2727_v26, %v6218_v63  ;;  %v3322_v26 = vld [vmem:[#allocation20 + $0x40] sm:$0xff] }
 0x4ca   : > { %v2729_v44 = vsel %vm1878_vm7, %v2640_v21, %v2658_v10  ;;  %v2730_v21 = vsel %vm1878_vm7, %v8018_v37, %v2660_v49  ;;  %v6223_v37 = vunpack.i.h.bf16 %v6221_v42  ;;  %v2742_v49 = vsel %vm1895_vm8, %v2734_v56, %v2699_v4 }
 0x4cb   : > { %v2736_v30 = vsel %vm1183_vm0, %v2729_v44, %v2679_v32 }
 0x4cc   : > { %5730 = vmatpush1.bf16.msra.mxu1 %v5729_v8  ;;  %5408 = vmatprep.mubr.msk.f32.mxu1 %vm1895_vm8, %v2736_v30  ;;  %v2750_v8 = vsel %vm1878_vm7, %v8041_v57, %v8061_v2 }
 0x4cd   : > { %v2683_v16 = vpop.permute.xlu1 %2682  ;;  %v2681_v35 = vpop.permute.xlu0 %2680  ;;  %5731 = vmatprep.subr.bf16.mxu1 %v9431_v48 }
 0x4ce   : > { %v2737_v34 = vsel %vm1183_vm0, %v2730_v21, %v2681_v35  ;;  %v3321_v21 = vld [vmem:[#allocation20 + $0x38] sm:$0xff] }
 0x4cf   : > { %v5744_v18 = vpack.c.bf16 %v3321_v21, %v3320_v13 }
 0x4d0   : > { %5733 = vmatpush1.bf16.msra.mxu1 %v5732_v53  ;;  %v3315_v53 = vld [vmem:[#allocation20 + $0x8] sm:$0xff] }
 0x4d1   : > { %v2664_v41 = vpop.permute.xlu1 %2663  ;;  %v2662_v22 = vpop.permute.xlu0 %2661  ;;  %5776 = vmatprep.subr.bf16.mxu1 %v9431_v48 }
 0x4d2   : > { %v2731_v28 = vsel %vm1878_vm7, %v8010_v25, %v2662_v22  ;;  %v2728_v25 = vsel %vm1878_vm7, %v2639_v23, %v6223_v37  ;;  %v2732_v11 = vsel %vm1878_vm7, %v8025_v47, %v2664_v41  ;;  %v3319_v41 = vld [vmem:[#allocation20 + $0x28] sm:$0xff]  ;;  %v3324_v37 = vld [vmem:[#allocation20 + $0x50] sm:$0xff] }
 0x4d3   : > { %2868 = vmatmul.mubr.f32.vlgmr.msra.gmra.mrb[24].mxu1 %v2740_v15  ;;  %v2738_v12 = vsel %vm1183_vm0, %v2731_v28, %v2683_v16  ;;  %v2735_v24 = vsel %vm1183_vm0, %v2728_v25, %v2677_v60  ;;  %v3316_v16 = vld [vmem:[#allocation20 + $0x10] sm:$0xff]  ;;  %v5741_v22 = vpack.c.bf16 %v3319_v41, %v3318_v45  ;;  %v3323_v28 = vld [vmem:[#allocation20 + $0x48] sm:$0xff] }
 0x4d4   : > { %5409 = vmatprep.mubr.msk.f32.mxu1 %vm1895_vm8, %v2737_v34  ;;  %v5738_v3 = vpack.c.bf16 %v3317_v55, %v3316_v16  ;;  %v3335_v16 = vld [vmem:[#allocation20 + $0xa8] sm:$0xff] }
 0x4d5   : > { %v2701_v32 = vpop.permute.xlu0 %2700  ;;  %v2685_v5 = vpop.permute.xlu1 %2684 }
 0x4d6   : > { %v2739_v38 = vsel %vm1183_vm0, %v2732_v11, %v2685_v5  ;;  %v2743_v20 = vsel %vm1895_vm8, %v2735_v24, %v2701_v32  ;;  %v5747_v5 = vpack.c.bf16 %v3323_v28, %v3322_v26 }
 0x4d7   : > { %2873 = vmatmul.mubr.f32.gmra.mrb[26].mxu1 %v2741_v33  ;;  %v3325_v33 = vld [vmem:[#allocation20 + $0x58] sm:$0xff] }
 0x4d8   : > { %5410 = vmatprep.mubr.msk.f32.mxu1 %vm1895_vm8, %v2738_v12 }
 0x4d9   : > { %v2725_v59 = vpop.permute.xlu0 %2724  ;;  %v2719_v14 = vpop.permute.xlu1 %2718 }
 0x4da   : > { %v2748_v19 = vsel %vm1878_vm7, %v8023_v46, %v2719_v14  ;;  %v3327_v14 = vld [vmem:[#allocation20 + $0x68] sm:$0xff] }
 0x4db   : > { %2878 = vmatmul.mubr.f32.gmra.mrb[28].mxu1 %v2742_v49  ;;  %v2751_v23 = vsel %vm1183_vm0, %v2748_v19, %v2725_v59  ;;  %v3326_v59 = vld [vmem:[#allocation20 + $0x60] sm:$0xff]  ;;  %v3328_v49 = vld [vmem:[#allocation20 + $0x70] sm:$0xff] }
 0x4dc   : > { %5411 = vmatprep.mubr.msk.f32.mxu1 %vm1895_vm8, %v2739_v38  ;;  %v5753_v11 = vpack.c.bf16 %v3327_v14, %v3326_v59 }
 0x4dd   : > { %v2721_v1 = vpop.permute.xlu0 %2720  ;;  %v2703_v42 = vpop.permute.xlu1 %2702 }
 0x4de   : > { %v2749_v47 = vsel %vm1878_vm7, %v8035_v52, %v2721_v1  ;;  %v2744_v4 = vsel %vm1895_vm8, %v2736_v30, %v2703_v42  ;;  %v2753_v52 = vsel %vm1183_vm0, %v2750_v8, %v8063_v7  ;;  %v3314_v30 = vld [vmem:[#allocation20] sm:$0xff] }
 0x4df   : > { %2883 = vmatmul.mubr.f32.gmra.mrb[30].mxu1 %v2743_v20  ;;  %v2752_v46 = vsel %vm1183_vm0, %v2749_v47, %v8063_v7  ;;  %v5735_v35 = vpack.c.bf16 %v3315_v53, %v3314_v30  ;;  %v3330_v42 = vld [vmem:[#allocation20 + $0x80] sm:$0xff]  ;;  %v3331_v20 = vld [vmem:[#allocation20 + $0x88] sm:$0xff]  ;;  %v8249_v30 = vld [vmem:[#allocation19] ss:$0 sm:$0xff] }
 0x4e0   : > { %5412 = vmatprep.mubr.msk.f32.mxu1 %vm1895_vm8, %v2751_v23  ;;  %v3334_v53 = vld [vmem:[#allocation20 + $0xa0] sm:$0xff] }
 0x4e1   : > { %v2705_v36 = vpop.permute.xlu1 %2704  ;;  %v2707_v60 = vpop.permute.xlu0 %2706  ;;  %5736 = vmatpush1.bf16.msra.mxu0 %v5735_v35 }
 0x4e2   : > { %v2745_v43 = vsel %vm1895_vm8, %v2737_v34, %v2705_v36  ;;  %v2746_v10 = vsel %vm1895_vm8, %v2738_v12, %v2707_v60  ;;  %5737 = vmatprep.subr.bf16.mxu0 %v9431_v48  ;;  %v5750_v12 = vpack.c.bf16 %v3325_v33, %v3324_v37  ;;  %v3332_v36 = vld [vmem:[#allocation20 + $0x90] sm:$0xff] }
 0x4e3   : > { %2888 = vmatmul.mubr.f32.gmra.mrb[32].mxu1 %v2744_v4  ;;  %v5759_v4 = vpack.c.bf16 %v3331_v20, %v3330_v42 }
 0x4e4   : > { %5413 = vmatprep.mubr.msk.f32.mxu1 %vm1895_vm8, %v2752_v46  ;;  %v3333_v46 = vld [vmem:[#allocation20 + $0x98] sm:$0xff] }
 0x4e5   : > { %v2709_v39 = vpop.permute.xlu1 %2708  ;;  %5739 = vmatpush1.bf16.msra.mxu0 %v5738_v3  ;;  %v5762_v60 = vpack.c.bf16 %v3333_v46, %v3332_v36  ;;  %v5765_v3 = vpack.c.bf16 %v3335_v16, %v3334_v53 }
 0x4e6   : > { %v2747_v6 = vsel %vm1895_vm8, %v2739_v38, %v2709_v39  ;;  %5740 = vmatprep.subr.bf16.mxu0 %v9431_v48  ;;  %v3329_v38 = vld [vmem:[#allocation20 + $0x78] sm:$0xff]  ;;  %v8247_v39 = vld [vmem:[%s9496_s10] ss:$0 sm:$0xff]  ;;  %s9503_s10 = sld [smem:[#allocation43_spill]] }
 0x4e7   : > { %2893 = vmatmul.mubr.f32.gmra.mrb[34].mxu1 %v2745_v43  ;;  %v5756_v1 = vpack.c.bf16 %v3329_v38, %v3328_v49 }
 0x4e8   : > { %5414 = vmatprep.mubr.msk.f32.mxu1 %vm1895_vm8, %v2753_v52 }
 0x4e9   : > { %5742 = vmatpush1.bf16.msra.mxu0 %v5741_v22 }
 0x4ea   : > { %5743 = vmatprep.subr.bf16.mxu0 %v9431_v48 }
 0x4eb   : > { %2898 = vmatmul.mubr.f32.gmra.mrb[36].mxu1 %v2746_v10 }
 0x4ec   : > { %5415 = vmatprep.mubr.msk.f32.mxu1 %vm1895_vm8, %v8077_v51 }
 0x4ed   : > { %5745 = vmatpush1.bf16.msra.mxu0 %v5744_v18 }
 0x4ee   : > { %5746 = vmatprep.subr.bf16.mxu0 %v9431_v48 }
 0x4ef   : > { %2903 = vmatmul.mubr.f32.gmra.mrb[38].mxu1 %v2747_v6 }
 0x4f1   : > { %5748 = vmatpush1.bf16.msra.mxu0 %v5747_v5 }
 0x4f2   : > { %5749 = vmatprep.subr.bf16.mxu0 %v9431_v48 }
 0x4f5   : > { %5751 = vmatpush1.bf16.msra.mxu0 %v5750_v12 }
 0x4f6   : > { %5752 = vmatprep.subr.bf16.mxu0 %v9431_v48 }
 0x4f9   : > { %5754 = vmatpush1.bf16.msra.mxu0 %v5753_v11 }
 0x4fa   : > { %5755 = vmatprep.subr.bf16.mxu0 %v9431_v48 }
 0x4fd   : > { %5757 = vmatpush1.bf16.msra.mxu0 %v5756_v1 }
 0x4fe   : > { %5758 = vmatprep.subr.bf16.mxu0 %v9431_v48 }
 0x501   : > { %5760 = vmatpush1.bf16.msra.mxu0 %v5759_v4 }
 0x502   : > { %5761 = vmatprep.subr.bf16.mxu0 %v9431_v48 }
 0x505   : > { %5763 = vmatpush1.bf16.msra.mxu0 %v5762_v60 }
 0x506   : > { %5764 = vmatprep.subr.bf16.mxu0 %v9431_v48 }
 0x509   : > { %5766 = vmatpush1.bf16.msra.mxu0 %v5765_v3 }
 0x50a   : > { %5767 = vmatprep.subr.bf16.mxu0 %v9431_v48 }
 0x56e   : > { %v8204_v44 = vpop.f32.mrb[8].mxu1 }
 0x56f   : > { %v8206_v57 = vpop.f32.mrb[9].mxu1 }
 0x57c   : > { %v8210_v15 = vpop.f32.mrb[10].mxu1 }
 0x57d   : > { %v8212_v34 = vpop.f32.mrb[11].mxu1 }
 0x580   : > { %v8215_v63 = vpop.f32.mrb[12].mxu1 }
 0x581   : > { %v8217_v32 = vpop.f32.mrb[13].mxu1 }
 0x586   : > { %v8220_v56 = vpop.f32.mrb[14].mxu1 }
 0x587   : > { %v8223_v25 = vpop.f32.mrb[15].mxu1 }
 0x58c   : > { %v8226_v19 = vpop.f32.mrb[16].mxu1 }
 0x58d   : > { %v8228_v24 = vpop.f32.mrb[17].mxu1 }
 0x590   : > { %v8231_v23 = vpop.f32.mrb[18].mxu1 }
 0x591   : > { %v8233_v47 = vpop.f32.mrb[19].mxu1 }
 0x594   : > { %v8236_v43 = vpop.f32.mrb[20].mxu1 }
 0x595   : > { %v8238_v8 = vpop.f32.mrb[21].mxu1 }
 0x598   : > { %v8241_v52 = vpop.f32.mrb[22].mxu1 }
 0x599   : > { %v8243_v10 = vpop.f32.mrb[23].mxu1 }
 0x5a6   : > { %v2869_v6 = vpop.f32.mrb[24].mxu1 }
 0x5a7   : > { %v2915_v35 = vmul.f32 %v8247_v39, %v2869_v6  ;;  %v2871_v55 = vpop.f32.mrb[25].mxu1 }
 0x5a9   : > { %v2930_v45 = vadd.f32 %v8249_v30, %v2915_v35 }
 0x5aa   : > { %v2874_v41 = vpop.f32.mrb[26].mxu1 }
 0x5ab   : > { %v2938_v22 = vmax.f32 %v2930_v45, 0.0  ;;  %v2916_v13 = vmul.f32 %v8247_v39, %v2874_v41  ;;  %v2876_v21 = vpop.f32.mrb[27].mxu1 }
 0x5ad   : > { %v2954_v18 = vrot.slane %v2938_v22, 5  ;;  %v2931_v26 = vadd.f32 %v8249_v30, %v2916_v13 }
 0x5ae   : > { %v2879_v28 = vpop.f32.mrb[28].mxu1 }
 0x5af   : > { %v8257_v5 = vsel %vm1568_vm1, 0.0, %v2954_v18  ;;  %v8260_v37 = vsel %vm1568_vm1, %v2954_v18, 0.0  ;;  %v2939_v33 = vmax.f32 %v2931_v26, 0.0  ;;  %v2917_v12 = vmul.f32 %v8247_v39, %v2879_v28  ;;  %v2881_v59 = vpop.f32.mrb[29].mxu1 }
 0x5b0   : > { %v3178_v14 = vrot.slane %v8257_v5, 5  ;;  %v3179_v11 = vrot.slane %v8260_v37, 5  ;;  %v3226_v49 = vrot.slane %v8257_v5, 6  ;;  %v3227_v38 = vrot.slane %v8260_v37, 6 }
 0x5b1   : > { %v2955_v1 = vrot.slane %v2939_v33, 5  ;;  %v2932_v42 = vadd.f32 %v8249_v30, %v2917_v12  ;;  %v3002_v20 = vrot.slane %v8257_v5, 1  ;;  %v3003_v4 = vrot.slane %v8260_v37, 1 }
 0x5b2   : > { %v2884_v36 = vpop.f32.mrb[30].mxu1  ;;  %v3180_v46 = vsel %vm1568_vm1, %v3178_v14, %v3179_v11  ;;  %v3050_v60 = vrot.slane %v8257_v5, 2  ;;  %v3051_v6 = vrot.slane %v8260_v37, 2  ;;  %v3228_v45 = vsel %vm1829_vm4, %v3226_v49, %v3227_v38 }
 0x5b3   : > { %v8274_v53 = vsel %vm1568_vm1, 0.0, %v2955_v1  ;;  %v8277_v16 = vsel %vm1568_vm1, %v2955_v1, 0.0  ;;  %v2940_v35 = vmax.f32 %v2932_v42, 0.0  ;;  %v2918_v55 = vmul.f32 %v8247_v39, %v2884_v36  ;;  %3202 = vrot.lane.b32.xlu1 %v3180_v46, %s6934_s16  ;;  %v2886_v3 = vpop.f32.mrb[31].mxu1 }
 0x5b4   : > { %v3004_v41 = vsel %vm1601_vm2, %v3002_v20, %v3003_v4  ;;  %v3005_v22 = vrot.slane %v8274_v53, 1  ;;  %v3006_v13 = vrot.slane %v8277_v16, 1  ;;  %v3181_v26 = vrot.slane %v8274_v53, 5 }
 0x5b5   : > { %v2956_v21 = vrot.slane %v2940_v35, 5  ;;  %v2933_v18 = vadd.f32 %v8249_v30, %v2918_v55  ;;  %v3182_v28 = vrot.slane %v8277_v16, 5  ;;  %v3052_v59 = vsel %vm1650_vm3, %v3050_v60, %v3051_v6 }
 0x5b6   : > { %v2889_v33 = vpop.f32.mrb[32].mxu1  ;;  %v3007_v12 = vsel %vm1601_vm2, %v3005_v22, %v3006_v13  ;;  %v3053_v14 = vrot.slane %v8274_v53, 2  ;;  %v3054_v11 = vrot.slane %v8277_v16, 2  ;;  %v3098_v20 = vrot.slane %v8257_v5, 3 }
 0x5b7   : > { %v8293_v49 = vsel %vm1568_vm1, 0.0, %v2956_v21  ;;  %v2941_v38 = vmax.f32 %v2933_v18, 0.0  ;;  %v2919_v1 = vmul.f32 %v8247_v39, %v2889_v33  ;;  %3250 = vrot.lane.b32.xlu1 %v3228_v45, %s6933_s28  ;;  %v2891_v42 = vpop.f32.mrb[33].mxu1  ;;  %v8299_v4 = vsel %vm1568_vm1, %v2956_v21, 0.0 }
 0x5b8   : > { %v6224_v36 = vpack.i.bf16 %v3007_v12, %v3004_v41  ;;  %v3055_v46 = vsel %vm1650_vm3, %v3053_v14, %v3054_v11  ;;  %v3099_v60 = vrot.slane %v8260_v37, 3  ;;  %v3101_v3 = vrot.slane %v8274_v53, 3 }
 0x5b9   : > { %v2957_v6 = vrot.slane %v2941_v38, 5  ;;  %v2934_v35 = vadd.f32 %v8249_v30, %v2919_v1  ;;  %v6229_v55 = vpack.i.bf16 %v3055_v46, %v3052_v59  ;;  %v3183_v22 = vsel %vm1568_vm1, %v3181_v26, %v3182_v28 }
 0x5ba   : > { %6225 = vrot.lane.b32.xlu0 %v6224_v36, %s6934_s16  ;;  %v2894_v45 = vpop.f32.mrb[34].mxu1  ;;  %v3102_v13 = vrot.slane %v8277_v16, 3  ;;  %v3008_v21 = vrot.slane %v8293_v49, 1  ;;  %v3009_v59 = vrot.slane %v8299_v4, 1  ;;  %v3100_v14 = vsel %vm1699_vm5, %v3098_v20, %v3099_v60 }
 0x5bb   : > { %v8310_v41 = vsel %vm1568_vm1, 0.0, %v2957_v6  ;;  %v8313_v18 = vsel %vm1568_vm1, %v2957_v6, 0.0  ;;  %v2920_v33 = vmul.f32 %v8247_v39, %v2894_v45  ;;  %3204 = vrot.lane.b32.xlu1 %v3183_v22, %s6934_s16  ;;  %v2896_v12 = vpop.f32.mrb[35].mxu1  ;;  %v2942_v38 = vmax.f32 %v2934_v35, 0.0 }
 0x5bc   : > { %v3103_v26 = vsel %vm1699_vm5, %v3101_v3, %v3102_v13  ;;  %v3011_v28 = vrot.slane %v8310_v41, 1  ;;  %v3012_v11 = vrot.slane %v8313_v18, 1  ;;  %v3229_v36 = vrot.slane %v8274_v53, 6 }
 0x5bd   : > { %v2935_v1 = vadd.f32 %v8249_v30, %v2920_v33  ;;  %v6234_v42 = vpack.i.bf16 %v3103_v26, %v3100_v14  ;;  %v3230_v45 = vrot.slane %v8277_v16, 6  ;;  %v3056_v20 = vrot.slane %v8293_v49, 2 }
 0x5be   : > { %6230 = vrot.lane.b32.xlu0 %v6229_v55, %s6933_s28  ;;  %v2899_v46 = vpop.f32.mrb[36].mxu1  ;;  %v3013_v6 = vsel %vm1601_vm2, %v3011_v28, %v3012_v11  ;;  %v3057_v60 = vrot.slane %v8299_v4, 2  ;;  %v3010_v13 = vsel %vm1601_vm2, %v3008_v21, %v3009_v59  ;;  %v3059_v12 = vrot.slane %v8310_v41, 2 }
 0x5bf   : > { %v2943_v3 = vmax.f32 %v2935_v1, 0.0  ;;  %v2921_v22 = vmul.f32 %v8247_v39, %v2899_v46  ;;  %v2901_v35 = vpop.f32.mrb[37].mxu1  ;;  %v6239_v33 = vpack.i.bf16 %v3013_v6, %v3010_v13  ;;  %v2958_v14 = vrot.slane %v2942_v38, 5 }
 0x5c0   : > { %v3231_v26 = vsel %vm1829_vm4, %v3229_v36, %v3230_v45  ;;  %v3060_v28 = vrot.slane %v8313_v18, 2  ;;  %v3058_v1 = vsel %vm1650_vm3, %v3056_v20, %v3057_v60  ;;  %v3104_v46 = vrot.slane %v8293_v49, 3 }
 0x5c1   : > { %v2936_v55 = vadd.f32 %v8249_v30, %v2921_v22  ;;  %6240 = vrot.lane.b32.xlu1 %v6239_v33, %s6934_s16  ;;  %v3105_v21 = vrot.slane %v8299_v4, 3  ;;  %v3107_v59 = vrot.slane %v8310_v41, 3  ;;  %v2959_v38 = vrot.slane %v2943_v3, 5 }
 0x5c2   : > { %6235 = vrot.lane.b32.xlu0 %v6234_v42, %s6935_s25  ;;  %v2904_v11 = vpop.f32.mrb[38].mxu1  ;;  %v3184_v45 = vrot.slane %v8293_v49, 5  ;;  %v3061_v42 = vsel %vm1650_vm3, %v3059_v12, %v3060_v28  ;;  %v3185_v35 = vrot.slane %v8299_v4, 5  ;;  %v3108_v20 = vrot.slane %v8313_v18, 3 }
 0x5c3   : > { %v2944_v6 = vmax.f32 %v2936_v55, 0.0  ;;  %v2922_v22 = vmul.f32 %v8247_v39, %v2904_v11  ;;  %v2906_v36 = vpop.f32.mrb[39].mxu1  ;;  %v3106_v13 = vsel %vm1699_vm5, %v3104_v46, %v3105_v21  ;;  %v6244_v0 = vpack.i.bf16 %v3061_v42, %v3058_v1 }
 0x5c4   : > { %v3232_v3 = vrot.slane %v8293_v49, 6  ;;  %v3109_v39 = vsel %vm1699_vm5, %v3107_v59, %v3108_v20  ;;  %v3233_v55 = vrot.slane %v8299_v4, 6  ;;  %v3235_v12 = vrot.slane %v8310_v41, 6 }
 0x5c5   : > { %v2960_v60 = vrot.slane %v2944_v6, 5  ;;  %v2937_v33 = vadd.f32 %v8249_v30, %v2922_v22  ;;  %v3236_v28 = vrot.slane %v8313_v18, 6  ;;  %v8355_v11 = vsel %vm1568_vm1, 0.0, %v2958_v14  ;;  %6245 = vrot.lane.b32.xlu1 %v6244_v0, %s6933_s28 }
 0x5c6   : > { %3252 = vrot.lane.b32.xlu0 %v3231_v26, %s6933_s28  ;;  %v8358_v46 = vsel %vm1568_vm1, %v2958_v14, 0.0  ;;  %v6249_v1 = vpack.i.bf16 %v3109_v39, %v3106_v13  ;;  %v8362_v26 = vsel %vm1568_vm1, 0.0, %v2959_v38  ;;  %v8365_v21 = vsel %vm1568_vm1, %v2959_v38, 0.0 }
 0x5c7   : > { %v2945_v30 = vmax.f32 %v2937_v33, 0.0  ;;  %v8368_v59 = vsel %vm1568_vm1, 0.0, %v2960_v60  ;;  %v8371_v6 = vsel %vm1568_vm1, %v2960_v60, 0.0  ;;  %v3186_v22 = vsel %vm1568_vm1, %v3184_v45, %v3185_v35 }
 0x5c8   : > { %v3234_v14 = vsel %vm1829_vm4, %v3232_v3, %v3233_v55  ;;  %v3237_v0 = vsel %vm1829_vm4, %v3235_v12, %v3236_v28  ;;  %v3014_v36 = vrot.slane %v8355_v11, 1  ;;  %v3015_v42 = vrot.slane %v8358_v46, 1 }
 0x5c9   : > { %v2961_v38 = vrot.slane %v2945_v30, 5  ;;  %6250 = vrot.lane.b32.xlu1 %v6249_v1, %s6935_s25  ;;  %v3187_v13 = vrot.slane %v8310_v41, 5  ;;  %v3188_v20 = vrot.slane %v8313_v18, 5  ;;  %v3017_v60 = vrot.slane %v8362_v26, 1 }
 0x5ca   : > { %3206 = vrot.lane.b32.xlu0 %v3186_v22, %s6934_s16  ;;  %v3190_v45 = vrot.slane %v8355_v11, 5  ;;  %v3191_v35 = vrot.slane %v8358_v46, 5  ;;  %v3238_v33 = vrot.slane %v8355_v11, 6  ;;  %v3018_v3 = vrot.slane %v8365_v21, 1 }
 0x5cb   : > { %v3016_v39 = vsel %vm1601_vm2, %v3014_v36, %v3015_v42  ;;  %v3062_v55 = vrot.slane %v8355_v11, 2  ;;  %v3063_v12 = vrot.slane %v8358_v46, 2  ;;  %v3065_v28 = vrot.slane %v8362_v26, 2 }
 0x5cc   : > { %v3019_v30 = vsel %vm1601_vm2, %v3017_v60, %v3018_v3  ;;  %v3066_v1 = vrot.slane %v8365_v21, 2  ;;  %v3110_v22 = vrot.slane %v8355_v11, 3  ;;  %v3111_v48 = vrot.slane %v8358_v46, 3 }
 0x5cd   : > { %v8397_v31 = vsel %vm1568_vm1, 0.0, %v2961_v38  ;;  %3256 = vrot.lane.b32.xlu1 %v3237_v0, %s6933_s28  ;;  %v3189_v36 = vsel %vm1568_vm1, %v3187_v13, %v3188_v20  ;;  %v6254_v42 = vpack.i.bf16 %v3019_v30, %v3016_v39  ;;  %v3113_v54 = vrot.slane %v8362_v26, 3 }
 0x5ce   : > { %3254 = vrot.lane.b32.xlu0 %v3234_v14, %s6933_s28  ;;  %v8403_v14 = vsel %vm1568_vm1, %v2961_v38, 0.0  ;;  %v3064_v60 = vsel %vm1650_vm3, %v3062_v55, %v3063_v12  ;;  %v3067_v3 = vsel %vm1650_vm3, %v3065_v28, %v3066_v1  ;;  %v3114_v58 = vrot.slane %v8365_v21, 3 }
 0x5cf   : > { %v3192_v9 = vsel %vm1568_vm1, %v3190_v45, %v3191_v35  ;;  %v3239_v61 = vrot.slane %v8358_v46, 6  ;;  %v6259_v50 = vpack.i.bf16 %v3067_v3, %v3064_v60  ;;  %v3112_v0 = vsel %vm1699_vm5, %v3110_v22, %v3111_v48  ;;  %v3336_v3 = vld [vmem:[#allocation20 + $0xb0] sm:$0xff] }
 0x5d0   : > { %v3115_v13 = vsel %vm1699_vm5, %v3113_v54, %v3114_v58  ;;  %v3020_v38 = vrot.slane %v8368_v59, 1  ;;  %v3021_v20 = vrot.slane %v8371_v6, 1  ;;  %v3023_v39 = vrot.slane %v8397_v31, 1 }
 0x5d1   : > { %3210 = vrot.lane.b32.xlu1 %v3192_v9, %s6934_s16  ;;  %v6264_v55 = vpack.i.bf16 %v3115_v13, %v3112_v0  ;;  %v3024_v45 = vrot.slane %v8403_v14, 1  ;;  %v3068_v12 = vrot.slane %v8368_v59, 2  ;;  %v3069_v28 = vrot.slane %v8371_v6, 2  ;;  %v3337_v0 = vld [vmem:[#allocation20 + $0xb8] sm:$0xff] }
 0x5d2   : > { %3208 = vrot.lane.b32.xlu0 %v3189_v36, %s6934_s16  ;;  %v3022_v35 = vsel %vm1601_vm2, %v3020_v38, %v3021_v20  ;;  %v3071_v58 = vrot.slane %v8397_v31, 2  ;;  %v3072_v54 = vrot.slane %v8403_v14, 2  ;;  %v3240_v30 = vsel %vm1829_vm4, %v3238_v33, %v3239_v61  ;;  %v3338_v38 = vld [vmem:[#allocation20 + $0xc0] sm:$0xff]  ;;  %v3339_v20 = vld [vmem:[#allocation20 + $0xc8] sm:$0xff] }
 0x5d3   : > { %v3025_v48 = vsel %vm1601_vm2, %v3023_v39, %v3024_v45  ;;  %v3193_v9 = vrot.slane %v8362_v26, 5  ;;  %v3194_v1 = vrot.slane %v8365_v21, 5  ;;  %v3070_v36 = vsel %vm1650_vm3, %v3068_v12, %v3069_v28  ;;  %v3340_v28 = vld [vmem:[#allocation20 + $0xd0] sm:$0xff] }
 0x5d4   : > { %v6269_v22 = vpack.i.bf16 %v3025_v48, %v3022_v35  ;;  %v3073_v60 = vsel %vm1650_vm3, %v3071_v58, %v3072_v54  ;;  %v3116_v33 = vrot.slane %v8368_v59, 3  ;;  %v5768_v39 = vpack.c.bf16 %v3337_v0, %v3336_v3  ;;  %v3341_v58 = vld [vmem:[#allocation20 + $0xd8] sm:$0xff] }
 0x5d5   : > { %3258 = vrot.lane.b32.xlu1 %v3240_v30, %s6933_s28  ;;  %v6274_v13 = vpack.i.bf16 %v3073_v60, %v3070_v36  ;;  %v3195_v61 = vsel %vm1568_vm1, %v3193_v9, %v3194_v1  ;;  %v5771_v45 = vpack.c.bf16 %v3339_v20, %v3338_v38  ;;  %v3241_v35 = vrot.slane %v8362_v26, 6 }
 0x5d6   : > { %6255 = vrot.lane.b32.xlu0 %v6254_v42, %s6934_s16  ;;  %v3117_v42 = vrot.slane %v8371_v6, 3  ;;  %5769 = vmatpush1.bf16.msra.mxu0 %v5768_v39  ;;  %v3242_v12 = vrot.slane %v8365_v21, 6  ;;  %v9497_v48 = vmov 0.0|0.0   ;;  %v5774_v54 = vpack.c.bf16 %v3341_v58, %v3340_v28 }
 0x5d7   : > { %5770 = vmatprep.subr.bf16.mxu0 %v9497_v48  ;;  %v3196_v9 = vrot.slane %v8368_v59, 5  ;;  %v3197_v1 = vrot.slane %v8371_v6, 5  ;;  %v3244_v36 = vrot.slane %v8368_v59, 6  ;;  %v3245_v60 = vrot.slane %v8371_v6, 6 }
 0x5d8   : > { %v3243_v30 = vsel %vm1829_vm4, %v3241_v35, %v3242_v12  ;;  %v3247_v3 = vrot.slane %v8397_v31, 6  ;;  %v3248_v0 = vrot.slane %v8403_v14, 6  ;;  %v3199_v20 = vrot.slane %v8397_v31, 5 }
 0x5d9   : > { %3212 = vrot.lane.b32.xlu1 %v3195_v61, %s6934_s16  ;;  %v3246_v38 = vsel %vm1829_vm4, %v3244_v36, %v3245_v60  ;;  %v3120_v39 = vrot.slane %v8403_v14, 3  ;;  %v3147_v35 = vrot.slane %v8260_v37, 4  ;;  %v3149_v60 = vrot.slane %v8274_v53, 4 }
 0x5da   : > { %6260 = vrot.lane.b32.xlu0 %v6259_v50, %s6933_s28  ;;  %v3118_v50 = vsel %vm1699_vm5, %v3116_v33, %v3117_v42  ;;  %5772 = vmatpush1.bf16.msra.mxu0 %v5771_v45  ;;  %v3249_v61 = vsel %vm1829_vm4, %v3247_v3, %v3248_v0  ;;  %v3119_v42 = vrot.slane %v8397_v31, 3  ;;  %v3146_v45 = vrot.slane %v8257_v5, 4 }
 0x5db   : > { %5773 = vmatprep.subr.bf16.mxu0 %v9497_v48  ;;  %v3150_v3 = vrot.slane %v8277_v16, 4 }
 0x5dc   : > { %v3148_v28 = vsel %vm1748_vm6, %v3146_v45, %v3147_v35 }
 0x5dd   : > { %3134 = vrot.lane.b32.xlu1 %v3118_v50, %s6935_s25 }
 0x5de   : > { %6265 = vrot.lane.b32.xlu0 %v6264_v55, %s6935_s25  ;;  %5775 = vmatpush1.bf16.msra.mxu0 %v5774_v54  ;;  %v3198_v55 = vsel %vm1568_vm1, %v3196_v9, %v3197_v1 }
 0x5e1   : > { %6270 = vrot.lane.b32.xlu1 %v6269_v22, %s6934_s16  ;;  %v3200_v22 = vrot.slane %v8403_v14, 5 }
 0x5e2   : > { %3260 = vrot.lane.b32.xlu0 %v3243_v30, %s6933_s28 }
 0x5e3   : > { %v3201_v33 = vsel %vm1568_vm1, %v3199_v20, %v3200_v22 }
 0x5e5   : > { %6275 = vrot.lane.b32.xlu1 %v6274_v13, %s6933_s28  ;;  %v3121_v13 = vsel %vm1699_vm5, %v3119_v42, %v3120_v39  ;;  %v3151_v42 = vsel %vm1748_vm6, %v3149_v60, %v3150_v3 }
 0x5e6   : > { %3214 = vrot.lane.b32.xlu0 %v3198_v55, %s6934_s16 }
 0x5e9   : > { %3264 = vrot.lane.b32.xlu1 %v3249_v61, %s6933_s28 }
 0x5ea   : > { %3262 = vrot.lane.b32.xlu0 %v3246_v38, %s6933_s28 }
 0x5ee   : > { %3216 = vrot.lane.b32.xlu0 %v3201_v33, %s6934_s16 }
 0x5f2   : > { %3136 = vrot.lane.b32.xlu0 %v3121_v13, %s6935_s25 }
 0x625   : > { %v3203_v12 = vpop.permute.xlu1 %3202 }
 0x626   : > { %v3298_v58 = vsel %vm1878_vm7, %v3148_v28, %v3203_v12 }
 0x629   : > { %v3251_v50 = vpop.permute.xlu1 %3250 }
 0x62a   : > { %v3306_v54 = vsel %vm1183_vm0, %v3298_v58, %v3251_v50  ;;  %v3152_v58 = vrot.slane %v8293_v49, 4  ;;  %v3153_v50 = vrot.slane %v8299_v4, 4  ;;  %v3155_v4 = vrot.slane %v8310_v41, 4 }
 0x62b   : > { %5418 = vmatprep.mubr.msk.f32.mxu0 %vm1895_vm8, %v3306_v54 }
 0x62c   : > { %v6226_v30 = vpop.permute.xlu0 %6225  ;;  %v3154_v60 = vsel %vm1748_vm6, %v3152_v58, %v3153_v50 }
 0x62d   : > { %v3205_v9 = vpop.permute.xlu1 %3204  ;;  %v6227_v55 = vunpack.i.l.bf16 %v6226_v30  ;;  %v6228_v38 = vunpack.i.h.bf16 %v6226_v30 }
 0x62e   : > { %v3299_v45 = vsel %vm1878_vm7, %v3151_v42, %v3205_v9 }
 0x62f   : > { %v3274_v20 = vsel %vm1878_vm7, %v8257_v5, %v6227_v55  ;;  %v3275_v28 = vsel %vm1878_vm7, %v8274_v53, %v6228_v38  ;;  %v3156_v38 = vrot.slane %v8313_v18, 4  ;;  %v3158_v18 = vrot.slane %v8355_v11, 4 }
 0x630   : > { %v6231_v1 = vpop.permute.xlu0 %6230 }
 0x631   : > { %v6232_v36 = vunpack.i.l.bf16 %v6231_v1  ;;  %v6233_v61 = vunpack.i.h.bf16 %v6231_v1 }
 0x633   : > { %v6241_v0 = vpop.permute.xlu1 %6240  ;;  %v3282_v33 = vsel %vm1183_vm0, %v3274_v20, %v6232_v36  ;;  %v3283_v5 = vsel %vm1183_vm0, %v3275_v28, %v6233_v61 }
 0x634   : > { %v6236_v37 = vpop.permute.xlu0 %6235  ;;  %v6242_v30 = vunpack.i.l.bf16 %v6241_v0  ;;  %v6243_v20 = vunpack.i.h.bf16 %v6241_v0 }
 0x635   : > { %v6237_v22 = vunpack.i.l.bf16 %v6236_v37  ;;  %v6238_v39 = vunpack.i.h.bf16 %v6236_v37 }
 0x636   : > { %v3276_v37 = vsel %vm1878_vm7, %v8293_v49, %v6242_v30  ;;  %v3157_v49 = vsel %vm1748_vm6, %v3155_v4, %v3156_v38  ;;  %v3277_v28 = vsel %vm1878_vm7, %v8310_v41, %v6243_v20 }
 0x637   : > { %v3290_v13 = vsel %vm1895_vm8, %v3282_v33, %v6237_v22  ;;  %v6246_v12 = vpop.permute.xlu1 %6245  ;;  %v3291_v54 = vsel %vm1895_vm8, %v3283_v5, %v6238_v39 }
 0x638   : > { %v3253_v35 = vpop.permute.xlu0 %3252  ;;  %3431 = vmatmul.mubr.f32.vlgmr.msra.gmra.mrb[40].mxu0 %v3290_v13  ;;  %v6247_v1 = vunpack.i.l.bf16 %v6246_v12  ;;  %v6248_v42 = vunpack.i.h.bf16 %v6246_v12 }
 0x639   : > { %v3307_v16 = vsel %vm1183_vm0, %v3299_v45, %v3253_v35  ;;  %v3159_v35 = vrot.slane %v8358_v46, 4 }
 0x63a   : > { %5419 = vmatprep.mubr.msk.f32.mxu0 %vm1895_vm8, %v3307_v16  ;;  %v3284_v33 = vsel %vm1183_vm0, %v3276_v37, %v6247_v1  ;;  %v3285_v5 = vsel %vm1183_vm0, %v3277_v28, %v6248_v42  ;;  %v3164_v28 = vrot.slane %v8368_v59, 4 }
 0x63b   : > { %v6251_v55 = vpop.permute.xlu1 %6250  ;;  %v3160_v50 = vsel %vm1748_vm6, %v3158_v18, %v3159_v35 }
 0x63c   : > { %v3207_v9 = vpop.permute.xlu0 %3206  ;;  %3436 = vmatmul.mubr.f32.gmra.mrb[42].mxu0 %v3291_v54  ;;  %v6252_v36 = vunpack.i.l.bf16 %v6251_v55  ;;  %v6253_v13 = vunpack.i.h.bf16 %v6251_v55 }
 0x63d   : > { %v3300_v53 = vsel %vm1878_vm7, %v3154_v60, %v3207_v9  ;;  %v3162_v60 = vrot.slane %v8365_v21, 4 }
 0x63e   : > { %v3292_v39 = vsel %vm1895_vm8, %v3284_v33, %v6252_v36  ;;  %v3293_v58 = vsel %vm1895_vm8, %v3285_v5, %v6253_v13 }
 0x63f   : > { %v3257_v61 = vpop.permute.xlu1 %3256 }
 0x640   : > { %v3255_v3 = vpop.permute.xlu0 %3254 }
 0x641   : > { %v3308_v22 = vsel %vm1183_vm0, %v3300_v53, %v3255_v3  ;;  %v3161_v53 = vrot.slane %v8362_v26, 4 }
 0x642   : > { %5420 = vmatprep.mubr.msk.f32.mxu0 %vm1895_vm8, %v3308_v22 }
 0x643   : > { %3441 = vmatmul.mubr.f32.gmra.mrb[44].mxu0 %v3292_v39  ;;  %v3211_v16 = vpop.permute.xlu1 %3210  ;;  %v3163_v33 = vsel %vm1748_vm6, %v3161_v53, %v3162_v60 }
 0x644   : > { %v3209_v45 = vpop.permute.xlu0 %3208  ;;  %v3302_v46 = vsel %vm1878_vm7, %v3160_v50, %v3211_v16  ;;  %v3165_v16 = vrot.slane %v8371_v6, 4  ;;  %v3167_v6 = vrot.slane %v8397_v31, 4 }
 0x645   : > { %v3301_v0 = vsel %vm1878_vm7, %v3157_v49, %v3209_v45 }
 0x646   : > { %v3309_v12 = vsel %vm1183_vm0, %v3301_v0, %v3257_v61  ;;  %v3166_v50 = vsel %vm1748_vm6, %v3164_v28, %v3165_v16  ;;  %v3626_v28 = vld [vmem:[#allocation22 + $0x50] sm:$0xff] }
 0x647   : > { %5421 = vmatprep.mubr.msk.f32.mxu0 %vm1895_vm8, %v3309_v12  ;;  %v3259_v30 = vpop.permute.xlu1 %3258 }
 0x648   : > { %3446 = vmatmul.mubr.f32.gmra.mrb[46].mxu0 %v3293_v58  ;;  %v6256_v54 = vpop.permute.xlu0 %6255  ;;  %v3310_v9 = vsel %vm1183_vm0, %v3302_v46, %v3259_v30 }
 0x649   : > { %5422 = vmatprep.mubr.msk.f32.mxu0 %vm1895_vm8, %v3310_v9  ;;  %v6257_v1 = vunpack.i.l.bf16 %v6256_v54  ;;  %v6258_v37 = vunpack.i.h.bf16 %v6256_v54  ;;  %v3168_v9 = vrot.slane %v8403_v14, 4 }
 0x64b   : > { %v3213_v55 = vpop.permute.xlu1 %3212  ;;  %v3278_v20 = vsel %vm1878_vm7, %v8355_v11, %v6257_v1  ;;  %v3279_v18 = vsel %vm1878_vm7, %v8362_v26, %v6258_v37 }
 0x64c   : > { %v6261_v41 = vpop.permute.xlu0 %6260  ;;  %v3303_v13 = vsel %vm1878_vm7, %v3163_v33, %v3213_v55  ;;  %v3618_v33 = vld [vmem:[#allocation22 + $0x10] sm:$0xff] }
 0x64d   : > { %v6262_v36 = vunpack.i.l.bf16 %v6261_v41  ;;  %v6263_v22 = vunpack.i.h.bf16 %v6261_v41 }
 0x64f   : > { %v3135_v4 = vpop.permute.xlu1 %3134  ;;  %v3286_v61 = vsel %vm1183_vm0, %v3278_v20, %v6262_v36  ;;  %v3287_v11 = vsel %vm1183_vm0, %v3279_v18, %v6263_v22  ;;  %v3616_v22 = vld [vmem:[#allocation22] sm:$0xff]  ;;  %v3623_v18 = vld [vmem:[#allocation22 + $0x38] sm:$0xff] }
 0x650   : > { %v6266_v3 = vpop.permute.xlu0 %6265 }
 0x651   : > { %v6267_v38 = vunpack.i.l.bf16 %v6266_v3  ;;  %v6268_v42 = vunpack.i.h.bf16 %v6266_v3 }
 0x653   : > { %v3294_v39 = vsel %vm1895_vm8, %v3286_v61, %v6267_v38  ;;  %v6271_v49 = vpop.permute.xlu1 %6270  ;;  %v3295_v0 = vsel %vm1895_vm8, %v3287_v11, %v6268_v42  ;;  %v3617_v61 = vld [vmem:[#allocation22 + $0x8] sm:$0xff] }
 0x654   : > { %v3261_v21 = vpop.permute.xlu0 %3260  ;;  %3451 = vmatmul.mubr.f32.gmra.mrb[48].mxu0 %v3294_v39  ;;  %v6272_v35 = vunpack.i.l.bf16 %v6271_v49  ;;  %v6273_v55 = vunpack.i.h.bf16 %v6271_v49  ;;  %v5777_v42 = vpack.c.bf16 %v3617_v61, %v3616_v22  ;;  %v3619_v39 = vld [vmem:[#allocation22 + $0x18] sm:$0xff]  ;;  %v3638_v22 = vld [vmem:[#allocation22 + $0xb0] sm:$0xff] }
 0x655   : > { %v3311_v45 = vsel %vm1183_vm0, %v3303_v13, %v3261_v21  ;;  %v5780_v13 = vpack.c.bf16 %v3619_v39, %v3618_v33  ;;  %v3620_v21 = vld [vmem:[#allocation22 + $0x20] sm:$0xff]  ;;  %v3639_v61 = vld [vmem:[#allocation22 + $0xb8] sm:$0xff] }
 0x656   : > { %5423 = vmatprep.mubr.msk.f32.mxu0 %vm1895_vm8, %v3311_v45  ;;  %v3280_v26 = vsel %vm1878_vm7, %v8368_v59, %v6272_v35  ;;  %v3169_v59 = vsel %vm1748_vm6, %v3167_v6, %v3168_v9  ;;  %v3281_v14 = vsel %vm1878_vm7, %v8397_v31, %v6273_v55  ;;  %5778 = vmatpush1.bf16.msra.mxu1 %v5777_v42  ;;  %v3621_v45 = vld [vmem:[#allocation22 + $0x28] sm:$0xff]  ;;  %v3622_v31 = vld [vmem:[#allocation22 + $0x30] sm:$0xff]  ;;  %v3624_v35 = vld [vmem:[#allocation22 + $0x40] sm:$0xff] }
 0x657   : > { %v6276_v5 = vpop.permute.xlu1 %6275  ;;  %5779 = vmatprep.subr.bf16.mxu1 %v9497_v48  ;;  %v5783_v49 = vpack.c.bf16 %v3621_v45, %v3620_v21  ;;  %v5786_v11 = vpack.c.bf16 %v3623_v18, %v3622_v31  ;;  %v3632_v9 = vld [vmem:[#allocation22 + $0x80] sm:$0xff]  ;;  %v3633_v6 = vld [vmem:[#allocation22 + $0x88] sm:$0xff]  ;;  %v3635_v55 = vld [vmem:[#allocation22 + $0x98] sm:$0xff] }
 0x658   : > { %3456 = vmatmul.mubr.f32.gmra.mrb[50].mxu0 %v3295_v0  ;;  %v3215_v12 = vpop.permute.xlu0 %3214  ;;  %v6277_v58 = vunpack.i.l.bf16 %v6276_v5  ;;  %v6278_v36 = vunpack.i.h.bf16 %v6276_v5  ;;  %v3625_v0 = vld [vmem:[#allocation22 + $0x48] sm:$0xff]  ;;  %v3640_v31 = vld [vmem:[#allocation22 + $0xc0] sm:$0xff] }
 0x659   : > { %v3304_v54 = vsel %vm1878_vm7, %v3166_v50, %v3215_v12  ;;  %v5789_v16 = vpack.c.bf16 %v3625_v0, %v3624_v35  ;;  %v3627_v12 = vld [vmem:[#allocation22 + $0x58] sm:$0xff]  ;;  %v3629_v50 = vld [vmem:[#allocation22 + $0x68] sm:$0xff] }
 0x65a   : > { %v3288_v30 = vsel %vm1183_vm0, %v3280_v26, %v6277_v58  ;;  %v3289_v20 = vsel %vm1183_vm0, %v3281_v14, %v6278_v36  ;;  %5781 = vmatpush1.bf16.msra.mxu1 %v5780_v13  ;;  %v5792_v5 = vpack.c.bf16 %v3627_v12, %v3626_v28  ;;  %v3628_v58 = vld [vmem:[#allocation22 + $0x60] sm:$0xff]  ;;  %v5810_v13 = vpack.c.bf16 %v3639_v61, %v3638_v22  ;;  %v3641_v18 = vld [vmem:[#allocation22 + $0xc8] sm:$0xff]  ;;  %v3642_v12 = vld [vmem:[#allocation22 + $0xd0] sm:$0xff] }
 0x65b   : > { %v3296_v1 = vsel %vm1895_vm8, %v3288_v30, %v3135_v4  ;;  %v3265_v53 = vpop.permute.xlu1 %3264  ;;  %5782 = vmatprep.subr.bf16.mxu1 %v9497_v48  ;;  %v5795_v26 = vpack.c.bf16 %v3629_v50, %v3628_v58  ;;  %v5813_v0 = vpack.c.bf16 %v3641_v18, %v3640_v31 }
 0x65c   : > { %v3263_v46 = vpop.permute.xlu0 %3262 }
 0x65d   : > { %v3312_v41 = vsel %vm1183_vm0, %v3304_v54, %v3263_v46  ;;  %v3630_v54 = vld [vmem:[#allocation22 + $0x70] sm:$0xff]  ;;  %v3631_v46 = vld [vmem:[#allocation22 + $0x78] sm:$0xff] }
 0x65e   : > { %5424 = vmatprep.mubr.msk.f32.mxu0 %vm1895_vm8, %v3312_v41  ;;  %5784 = vmatpush1.bf16.msra.mxu1 %v5783_v49  ;;  %v5798_v30 = vpack.c.bf16 %v3631_v46, %v3630_v54  ;;  %v5801_v41 = vpack.c.bf16 %v3633_v6, %v3632_v9 }
 0x65f   : > { %3461 = vmatmul.mubr.f32.gmra.mrb[52].mxu0 %v3296_v1  ;;  %5785 = vmatprep.subr.bf16.mxu1 %v9497_v48  ;;  %v3634_v1 = vld [vmem:[#allocation22 + $0x90] sm:$0xff] }
 0x660   : > { %v3217_v60 = vpop.permute.xlu0 %3216  ;;  %v5804_v36 = vpack.c.bf16 %v3635_v55, %v3634_v1 }
 0x661   : > { %v3305_v3 = vsel %vm1878_vm7, %v3169_v59, %v3217_v60  ;;  %v8558_v60 = vld [vmem:[%s9498_s11] ss:$0 sm:$0xff]  ;;  %s5088_s11 = sshll.u32 %s7845_s1, 4  ;;  %s9363_s11 = int_to_ptr.vmem [resolvable:$true] %s5088_s11 }
 0x662   : > { %v3313_v37 = vsel %vm1183_vm0, %v3305_v3, %v3265_v53  ;;  %5787 = vmatpush1.bf16.msra.mxu1 %v5786_v11  ;;  %v3636_v53 = vld [vmem:[#allocation22 + $0xa0] sm:$0xff]  ;;  %v3637_v3 = vld [vmem:[#allocation22 + $0xa8] sm:$0xff] }
 0x663   : > { %5425 = vmatprep.mubr.msk.f32.mxu0 %vm1895_vm8, %v3313_v37  ;;  %5788 = vmatprep.subr.bf16.mxu1 %v9497_v48 }
 0x664   : > { %v3137_v38 = vpop.permute.xlu0 %3136 }
 0x665   : > { %v3297_v4 = vsel %vm1895_vm8, %v3289_v20, %v3137_v38  ;;  %v5807_v38 = vpack.c.bf16 %v3637_v3, %v3636_v53  ;;  %v8562_v20 = vld [vmem:[%s9499_s8] ss:$0 sm:$0xff] }
 0x666   : > { %3466 = vmatmul.mubr.f32.gmra.mrb[54].mxu0 %v3297_v4  ;;  %5790 = vmatpush1.bf16.msra.mxu1 %v5789_v16 }
 0x667   : > { %5791 = vmatprep.subr.bf16.mxu1 %v9497_v48 }
 0x66a   : > { %5793 = vmatpush1.bf16.msra.mxu1 %v5792_v5  ;;  %v3643_v5 = vld [vmem:[#allocation22 + $0xd8] sm:$0xff] }
 0x66b   : > { %5794 = vmatprep.subr.bf16.mxu1 %v9497_v48  ;;  %v5816_v58 = vpack.c.bf16 %v3643_v5, %v3642_v12 }
 0x66e   : > { %5796 = vmatpush1.bf16.msra.mxu1 %v5795_v26 }
 0x66f   : > { %5797 = vmatprep.subr.bf16.mxu1 %v9497_v48 }
 0x672   : > { %5799 = vmatpush1.bf16.msra.mxu1 %v5798_v30 }
 0x673   : > { %5800 = vmatprep.subr.bf16.mxu1 %v9497_v48 }
 0x676   : > { %5802 = vmatpush1.bf16.msra.mxu1 %v5801_v41 }
 0x677   : > { %5803 = vmatprep.subr.bf16.mxu1 %v9497_v48 }
 0x67a   : > { %5805 = vmatpush1.bf16.msra.mxu1 %v5804_v36 }
 0x67b   : > { %5806 = vmatprep.subr.bf16.mxu1 %v9497_v48 }
 0x67e   : > { %5808 = vmatpush1.bf16.msra.mxu1 %v5807_v38 }
 0x67f   : > { %5809 = vmatprep.subr.bf16.mxu1 %v9497_v48 }
 0x682   : > { %5811 = vmatpush1.bf16.msra.mxu1 %v5810_v13 }
 0x683   : > { %5812 = vmatprep.subr.bf16.mxu1 %v9497_v48 }
 0x686   : > { %5814 = vmatpush1.bf16.msra.mxu1 %v5813_v0 }
 0x687   : > { %5815 = vmatprep.subr.bf16.mxu1 %v9497_v48 }
 0x68a   : > { %5817 = vmatpush1.bf16.msra.mxu1 %v5816_v58 }
 0x70b   : > { %v3432_v59 = vpop.f32.mrb[40].mxu0 }
 0x70c   : > { %v3478_v37 = vmul.f32 %v8558_v60, %v3432_v59  ;;  %v3434_v14 = vpop.f32.mrb[41].mxu0 }
 0x70e   : > { %v8566_v33 = vadd.f32 %v8562_v20, %v3478_v37 }
 0x70f   : > { %v3437_v4 = vpop.f32.mrb[42].mxu0 }
 0x710   : > { %v3479_v42 = vmul.f32 %v8558_v60, %v3437_v4  ;;  %v3439_v39 = vpop.f32.mrb[43].mxu0  ;;  %v3501_v45 = vmax.f32 %v8566_v33, 0.0 }
 0x712   : > { %v8570_v21 = vadd.f32 %v8562_v20, %v3479_v42 }
 0x714   : > { %v3502_v49 = vmax.f32 %v8570_v21, 0.0 }
 0x716   : > { %v3442_v11 = vpop.f32.mrb[44].mxu0  ;;  %v6279_v35 = vpack.i.bf16 %v3502_v49, %v3501_v45 }
 0x717   : > { %v3480_v16 = vmul.f32 %v8558_v60, %v3442_v11  ;;  %v3444_v28 = vpop.f32.mrb[45].mxu0 }
 0x718   : > { %6280 = vrot.lane.b32.xlu1 %v6279_v35, %s6935_s25 }
 0x719   : > { %v3495_v50 = vadd.f32 %v8562_v20, %v3480_v16 }
 0x71b   : > { %v8583_v26 = vmax.f32 %v3495_v50, 0.0  ;;  %v3447_v54 = vpop.f32.mrb[46].mxu0 }
 0x71c   : > { %v3481_v46 = vmul.f32 %v8558_v60, %v3447_v54  ;;  %v3449_v30 = vpop.f32.mrb[47].mxu0  ;;  %6285 = vrot.lane.b32.xlu1 %v6279_v35, %s6933_s28 }
 0x71d   : > { %3560 = vrot.lane.b32.xlu0 %v8583_v26, %s6935_s25 }
 0x71e   : > { %v3496_v9 = vadd.f32 %v8562_v20, %v3481_v46 }
 0x720   : > { %6290 = vrot.lane.b32.xlu1 %v6279_v35, %s6934_s16  ;;  %v8593_v48 = vmax.f32 %v3496_v9, 0.0 }
 0x721   : > { %3538 = vrot.lane.b32.xlu0 %v8583_v26, %s6933_s28 }
 0x724   : > { %3519 = vrot.lane.b32.xlu1 %v8583_v26, %s6934_s16 }
 0x725   : > { %3540 = vrot.lane.b32.xlu0 %v8593_v48, %s6933_s28 }
 0x727   : > { %v3452_v6 = vpop.f32.mrb[48].mxu0 }
 0x728   : > { %v3482_v41 = vmul.f32 %v8558_v60, %v3452_v6  ;;  %v3454_v1 = vpop.f32.mrb[49].mxu0 }
 0x729   : > { %3521 = vrot.lane.b32.xlu0 %v8593_v48, %s6934_s16 }
 0x72a   : > { %v3497_v55 = vadd.f32 %v8562_v20, %v3482_v41 }
 0x72b   : > { %v3457_v36 = vpop.f32.mrb[50].mxu0 }
 0x72c   : > { %v8603_v59 = vmax.f32 %v3497_v55, 0.0  ;;  %v3483_v53 = vmul.f32 %v8558_v60, %v3457_v36  ;;  %v3459_v3 = vpop.f32.mrb[51].mxu0 }
 0x72e   : > { %v3498_v37 = vadd.f32 %v8562_v20, %v3483_v53  ;;  %3542 = vrot.lane.b32.xlu0 %v8603_v59, %s6933_s28 }
 0x730   : > { %v8609_v14 = vmax.f32 %v3498_v37, 0.0 }
 0x732   : > { %3523 = vrot.lane.b32.xlu0 %v8603_v59, %s6934_s16  ;;  %3544 = vrot.lane.b32.xlu1 %v8609_v14, %s6933_s28  ;;  %v3462_v38 = vpop.f32.mrb[52].mxu0 }
 0x733   : > { %v3484_v4 = vmul.f32 %v8558_v60, %v3462_v38  ;;  %v3464_v22 = vpop.f32.mrb[53].mxu0 }
 0x735   : > { %v3499_v61 = vadd.f32 %v8562_v20, %v3484_v4 }
 0x736   : > { %3562 = vrot.lane.b32.xlu0 %v8593_v48, %s6935_s25  ;;  %3525 = vrot.lane.b32.xlu1 %v8609_v14, %s6934_s16 }
 0x737   : > { %v8621_v42 = vmax.f32 %v3499_v61, 0.0 }
 0x739   : > { %v3467_v39 = vpop.f32.mrb[54].mxu0 }
 0x73a   : > { %v3485_v13 = vmul.f32 %v8558_v60, %v3467_v39  ;;  %3546 = vrot.lane.b32.xlu1 %v8621_v42, %s6933_s28  ;;  %v3469_v31 = vpop.f32.mrb[55].mxu0 }
 0x73c   : > { %v3500_v18 = vadd.f32 %v8562_v20, %v3485_v13 }
 0x73e   : > { %v8627_v11 = vmax.f32 %v3500_v18, 0.0  ;;  %3580 = vrot.lane.b32.xlu1 %v8621_v42, %s6934_s16 }
 0x740   : > { %3586 = vrot.lane.b32.xlu0 %v8627_v11, %s6933_s28 }
 0x742   : > { %3564 = vrot.lane.b32.xlu1 %v8603_v59, %s6935_s25 }
 0x744   : > { %3582 = vrot.lane.b32.xlu0 %v8627_v11, %s6934_s16 }
 0x746   : > { %3566 = vrot.lane.b32.xlu1 %v8609_v14, %s6935_s25 }
 0x748   : > { %3568 = vrot.lane.b32.xlu0 %v8621_v42, %s6935_s25 }
 0x74a   : > { %3570 = vrot.lane.b32.xlu1 %v8627_v11, %s6935_s25 }
 0x78a   : > { %v6281_v60 = vpop.permute.xlu1 %6280 }
 0x78b   : > { %v6282_v28 = vunpack.i.l.bf16 %v6281_v60  ;;  %v6283_v41 = vunpack.i.h.bf16 %v6281_v60 }
 0x78d   : > { %v3602_v54 = vsel %vm1895_vm8, %v8077_v51, %v6282_v28 }
 0x78e   : > { %v6286_v20 = vpop.permute.xlu1 %6285 }
 0x78f   : > { %v3561_v35 = vpop.permute.xlu0 %3560  ;;  %v6287_v46 = vunpack.i.l.bf16 %v6286_v20  ;;  %v6288_v36 = vunpack.i.h.bf16 %v6286_v20 }
 0x791   : > { %v3595_v6 = vsel %vm1183_vm0, %v8067_v62, %v6287_v46 }
 0x792   : > { %v6291_v0 = vpop.permute.xlu1 %6290  ;;  %v3603_v53 = vsel %vm1895_vm8, %v3595_v6, %v6283_v41 }
 0x793   : > { %v3539_v16 = vpop.permute.xlu0 %3538  ;;  %v6292_v9 = vunpack.i.l.bf16 %v6291_v0  ;;  %v6293_v4 = vunpack.i.h.bf16 %v6291_v0 }
 0x795   : > { %v3589_v1 = vsel %vm1878_vm7, 0.0, %v6292_v9  ;;  %v3590_v39 = vsel %vm1878_vm7, %v3501_v45, %v6293_v4  ;;  %v6358_v4 = vld [vmem:[%s7391_s22 + $0x8] sm:$0xff] }
 0x796   : > { %v3520_v12 = vpop.permute.xlu1 %3519  ;;  %v3596_v38 = vsel %vm1183_vm0, %v3589_v1, %v6288_v36 }
 0x797   : > { %v3591_v5 = vsel %vm1878_vm7, %v3502_v49, %v3520_v12  ;;  %v3541_v58 = vpop.permute.xlu0 %3540  ;;  %v3604_v22 = vsel %vm1895_vm8, %v3596_v38, %v3561_v35 }
 0x798   : > { %v3598_v50 = vsel %vm1183_vm0, %v3591_v5, %v3541_v58  ;;  %v3612_v5 = vsel %vm1878_vm7, %v8627_v11, %v8061_v2  ;;  %v9500_v11 = vmov 0.0  }
 0x799   : > { %5428 = vmatprep.mubr.msk.f32.mxu1 %vm1895_vm8, %v3598_v50  ;;  %v4441_v9 = vrot.slane %v9500_v11, 7 }
 0x79a   : > { %3730 = vmatmul.mubr.f32.vlgmr.msra.gmra.mrb[40].mxu1 %v3602_v54 }
 0x79b   : > { %v3522_v30 = vpop.permute.xlu0 %3521  ;;  %v4469_v6 = vsel %vm4459_vm9, %v4441_v9, 0.0 }
 0x79c   : > { %v3592_v21 = vsel %vm1878_vm7, %v8583_v26, %v3522_v30  ;;  %v4543_v1 = vrot.slane %v4469_v6, 2 }
 0x7a0   : > { %v3543_v49 = vpop.permute.xlu0 %3542 }
 0x7a1   : > { %v3599_v55 = vsel %vm1183_vm0, %v3592_v21, %v3543_v49  ;;  %v4503_v21 = vrot.slane %v4469_v6, 1  ;;  %v4649_v6 = vld [vmem:[#allocation25 + $0x48] sm:$0xff] }
 0x7a2   : > { %5429 = vmatprep.mubr.msk.f32.mxu1 %vm1895_vm8, %v3599_v55 }
 0x7a3   : > { %3735 = vmatmul.mubr.f32.gmra.mrb[42].mxu1 %v3603_v53 }
 0x7a4   : > { %v3524_v3 = vpop.permute.xlu0 %3523  ;;  %v3545_v37 = vpop.permute.xlu1 %3544 }
 0x7a5   : > { %v3593_v62 = vsel %vm1878_vm7, %v8593_v48, %v3524_v3  ;;  %v3597_v48 = vsel %vm1183_vm0, %v3590_v39, %v3539_v16  ;;  %v4641_v39 = vld [vmem:[#allocation25 + $0x8] sm:$0xff] }
 0x7a6   : > { %v3600_v26 = vsel %vm1183_vm0, %v3593_v62, %v3545_v37 }
 0x7a7   : > { %5430 = vmatprep.mubr.msk.f32.mxu1 %vm1895_vm8, %v3600_v26 }
 0x7a8   : > { %v3526_v61 = vpop.permute.xlu1 %3525  ;;  %3740 = vmatmul.mubr.f32.gmra.mrb[44].mxu1 %v3604_v22  ;;  %v3563_v13 = vpop.permute.xlu0 %3562 }
 0x7a9   : > { %v3594_v31 = vsel %vm1878_vm7, %v8603_v59, %v3526_v61  ;;  %v3605_v20 = vsel %vm1895_vm8, %v3597_v48, %v3563_v13  ;;  %v4643_v13 = vld [vmem:[#allocation25 + $0x18] sm:$0xff] }
 0x7ac   : > { %v3547_v18 = vpop.permute.xlu1 %3546 }
 0x7ad   : > { %v3601_v60 = vsel %vm1183_vm0, %v3594_v31, %v3547_v18  ;;  %v5874_v18 = vpack.c.bf16 %v4643_v13, %v4641_v39  ;;  %v4648_v13 = vld [vmem:[#allocation25 + $0x40] sm:$0xff] }
 0x7ae   : > { %5431 = vmatprep.mubr.msk.f32.mxu1 %vm1895_vm8, %v3601_v60 }
 0x7af   : > { %3745 = vmatmul.mubr.f32.gmra.mrb[46].mxu1 %v3605_v20  ;;  %5875 = vmatprep.subr.bf16.mxu1 %v5874_v18  ;;  %v4653_v18 = vld [vmem:[#allocation25 + $0x68] sm:$0xff] }
 0x7b0   : > { %v3581_v35 = vpop.permute.xlu1 %3580 }
 0x7b1   : > { %v3610_v33 = vsel %vm1878_vm7, %v8609_v14, %v3581_v35 }
 0x7b2   : > { %v3587_v0 = vpop.permute.xlu0 %3586 }
 0x7b3   : > { %v3613_v45 = vsel %vm1183_vm0, %v3610_v33, %v3587_v0 }
 0x7b4   : > { %v3565_v28 = vpop.permute.xlu1 %3564  ;;  %5432 = vmatprep.mubr.msk.f32.mxu1 %vm1895_vm8, %v3613_v45 }
 0x7b5   : > { %v3606_v59 = vsel %vm1895_vm8, %v3598_v50, %v3565_v28  ;;  %v3615_v50 = vsel %vm1183_vm0, %v3612_v5, %v8063_v7 }
 0x7b6   : > { %3750 = vmatmul.mubr.f32.gmra.mrb[48].mxu1 %v3606_v59  ;;  %v3583_v16 = vpop.permute.xlu0 %3582  ;;  %v4640_v59 = vld [vmem:[#allocation25] sm:$0xff] }
 0x7b7   : > { %v3611_v12 = vsel %vm1878_vm7, %v8621_v42, %v3583_v16  ;;  %v4642_v16 = vld [vmem:[#allocation25 + $0x10] sm:$0xff] }
 0x7b8   : > { %v3567_v58 = vpop.permute.xlu1 %3566  ;;  %v3614_v14 = vsel %vm1183_vm0, %v3611_v12, %v8063_v7  ;;  %v8697_v7 = vsel %vm4459_vm9, 0.0, %v4441_v9  ;;  %v4645_v12 = vld [vmem:[#allocation25 + $0x28] sm:$0xff] }
 0x7b9   : > { %5433 = vmatprep.mubr.msk.f32.mxu1 %vm1895_vm8, %v3614_v14  ;;  %v3607_v54 = vsel %vm1895_vm8, %v3599_v55, %v3567_v58  ;;  %v4502_v41 = vrot.slane %v8697_v7, 1  ;;  %v6357_v55 = vld [vmem:[%s7391_s22] sm:$0xff]  ;;  %v5876_v58 = vpack.c.bf16 %v4642_v16, %v4640_v59  ;;  %v4647_v14 = vld [vmem:[#allocation25 + $0x38] sm:$0xff] }
 0x7ba   : > { %3755 = vmatmul.mubr.f32.gmra.mrb[50].mxu1 %v3607_v54  ;;  %v3569_v46 = vpop.permute.xlu0 %3568  ;;  %v4442_v36 = vrot.slane %v6357_v55, 7  ;;  %v4644_v54 = vld [vmem:[#allocation25 + $0x20] sm:$0xff]  ;;  %v5878_v9 = vpack.c.bf16 %v4647_v14, %v4645_v12 }
 0x7bb   : > { %5434 = vmatprep.mubr.msk.f32.mxu1 %vm1895_vm8, %v3615_v50  ;;  %v3608_v42 = vsel %vm1895_vm8, %v3600_v26, %v3569_v46  ;;  %v8702_v49 = vsel %vm1601_vm2, %v4502_v41, %v4503_v21  ;;  %v4443_v26 = vrot.slane %v6358_v4, 7  ;;  %v4646_v46 = vld [vmem:[#allocation25 + $0x30] sm:$0xff]  ;;  %v4651_v41 = vld [vmem:[#allocation25 + $0x58] sm:$0xff]  ;;  %5877 = vmatpush1.bf16.msra.mxu1 %v5876_v58  ;;  %v4652_v14 = vld [vmem:[#allocation25 + $0x60] sm:$0xff] }
 0x7bc   : > { %v3571_v30 = vpop.permute.xlu1 %3570  ;;  %v4534_v53 = vadd.f32 %v8702_v49, %v8697_v7  ;;  %v4461_v37 = vsel %vm4459_vm9, 0.0, %v4442_v36  ;;  %v4470_v38 = vsel %vm4459_vm9, %v4442_v36, 0.0  ;;  %v5880_v55 = vpack.c.bf16 %v4646_v46, %v4644_v54  ;;  %5879 = vmatprep.subr.bf16.mxu1 %v5878_v9  ;;  %v4654_v54 = vld [vmem:[#allocation25 + $0x70] sm:$0xff] }
 0x7bd   : > { %v3609_v2 = vsel %vm1895_vm8, %v3601_v60, %v3571_v30  ;;  %v4505_v22 = vrot.slane %v4461_v37, 1  ;;  %v4506_v61 = vrot.slane %v4470_v38, 1  ;;  %v4462_v48 = vsel %vm4459_vm9, 0.0, %v4443_v26  ;;  %v6359_v30 = vld [vmem:[%s7391_s22 + $0x10] sm:$0xff] }
 0x7be   : > { %3760 = vmatmul.mubr.f32.gmra.mrb[52].mxu1 %v3608_v42  ;;  %v4471_v60 = vsel %vm4459_vm9, %v4443_v26, 0.0  ;;  %v4545_v35 = vrot.slane %v4461_v37, 2  ;;  %v4546_v33 = vrot.slane %v4470_v38, 2  ;;  %v4508_v45 = vrot.slane %v4462_v48, 1 }
 0x7bf   : > { %5435 = vmatprep.mubr.msk.f32.mxu1 %vm1895_vm8, %v8077_v51  ;;  %v4542_v51 = vrot.slane %v8697_v7, 2  ;;  %v4507_v20 = vsel %vm1601_vm2, %v4505_v22, %v4506_v61  ;;  %v4509_v28 = vrot.slane %v4471_v60, 1  ;;  %v6361_v61 = vld [vmem:[%s7391_s22 + $0x20] sm:$0xff]  ;;  %5881 = vmatpush1.bf16.msra.mxu1 %v5880_v55 }
 0x7c0   : > { %v4547_v5 = vsel %vm1650_vm3, %v4545_v35, %v4546_v33  ;;  %v4535_v50 = vadd.f32 %v4507_v20, %v4461_v37  ;;  %v4446_v39 = vrot.slane %v6361_v61, 7  ;;  %v4655_v33 = vld [vmem:[#allocation25 + $0x78] sm:$0xff] }
 0x7c1   : > { %v8709_v3 = vsel %vm1650_vm3, %v4542_v51, %v4543_v1  ;;  %v4510_v21 = vsel %vm1601_vm2, %v4508_v45, %v4509_v28  ;;  %v4548_v51 = vrot.slane %v4462_v48, 2  ;;  %v4549_v1 = vrot.slane %v4471_v60, 2  ;;  %v6362_v61 = vld [vmem:[%s7391_s22 + $0x28] sm:$0xff] }
 0x7c2   : > { %3765 = vmatmul.mubr.f32.gmra.mrb[54].mxu1 %v3609_v2  ;;  %v4574_v62 = vadd.f32 %v8709_v3, %v4534_v53  ;;  %v4444_v2 = vrot.slane %v6359_v30, 7  ;;  %v4536_v36 = vadd.f32 %v4510_v21, %v4462_v48  ;;  %v5882_v53 = vpack.c.bf16 %v4651_v41, %v4649_v6 }
 0x7c3   : > { %4744 = vmatprep.mubr.f32.mxu1 %v9500_v11  ;;  %v4575_v4 = vadd.f32 %v4547_v5, %v4535_v50  ;;  %v4550_v26 = vsel %vm1650_vm3, %v4548_v51, %v4549_v1  ;;  %v4465_v58 = vsel %vm4459_vm9, 0.0, %v4446_v39  ;;  %v4474_v50 = vsel %vm4459_vm9, %v4446_v39, 0.0 }
 0x7c4   : > { %v4582_v31 = vadd.f32 %v4574_v62, %v4461_v37  ;;  %v6360_v62 = vld [vmem:[%s7391_s22 + $0x18] sm:$0xff]  ;;  %v4463_v22 = vsel %vm4459_vm9, 0.0, %v4444_v2  ;;  %v4576_v60 = vadd.f32 %v4550_v26, %v4536_v36  ;;  %5883 = vmatprep.subr.bf16.mxu1 %v5882_v53  ;;  %v4517_v41 = vrot.slane %v4465_v58, 1 }
 0x7c5   : > { %v4445_v37 = vrot.slane %v6360_v62, 7  ;;  %v4511_v28 = vrot.slane %v4463_v22, 1  ;;  %v4583_v16 = vadd.f32 %v4575_v4, %v4462_v48  ;;  %v4551_v1 = vrot.slane %v4463_v22, 2 }
 0x7c6   : > { %v4596_v0 = vadd.f32 %v4582_v31, %v4507_v20  ;;  %v4650_v31 = vld [vmem:[#allocation25 + $0x50] sm:$0xff]  ;;  %v4472_v20 = vsel %vm4459_vm9, %v4444_v2, 0.0  ;;  %v4584_v46 = vadd.f32 %v4576_v60, %v4463_v22  ;;  %v4558_v4 = vrot.slane %v4474_v50, 2 }
 0x7c7   : > { %v5884_v35 = vpack.c.bf16 %v4650_v31, %v4648_v13  ;;  %v4464_v59 = vsel %vm4459_vm9, 0.0, %v4445_v37  ;;  %v4512_v12 = vrot.slane %v4472_v20, 1  ;;  %v4552_v30 = vrot.slane %v4472_v20, 2 }
 0x7c8   : > { %v4608_v42 = vadd.f32 %v4596_v0, %v4547_v5  ;;  %v5886_v0 = vpack.c.bf16 %v4655_v33, %v4653_v18  ;;  %v4473_v5 = vsel %vm4459_vm9, %v4445_v37, 0.0  ;;  %v4514_v9 = vrot.slane %v4464_v59, 1 }
 0x7c9   : > { %5885 = vmatpush1.bf16.msra.mxu1 %v5884_v35  ;;  %v4515_v6 = vrot.slane %v4473_v5, 1  ;;  %v4513_v51 = vsel %vm1601_vm2, %v4511_v28, %v4512_v12  ;;  %v4597_v55 = vadd.f32 %v4583_v16, %v4510_v21  ;;  %v4553_v62 = vsel %vm1650_vm3, %v4551_v1, %v4552_v30 }
 0x7ca   : > { %v4616_v38 = vadd.f32 %v4608_v42, %v4462_v48  ;;  %5887 = vmatprep.subr.bf16.mxu1 %v5886_v0  ;;  %v5888_v42 = vpack.c.bf16 %v4654_v54, %v4652_v14  ;;  %v4518_v48 = vrot.slane %v4474_v50, 1  ;;  %v4537_v36 = vadd.f32 %v4513_v51, %v4463_v22 }
 0x7cb   : > { %v4598_v53 = vadd.f32 %v4584_v46, %v4513_v51  ;;  %v4609_v37 = vadd.f32 %v4597_v55, %v4550_v26  ;;  %v4447_v39 = vrot.slane %v6362_v61, 7  ;;  %v4516_v60 = vsel %vm1601_vm2, %v4514_v9, %v4515_v6  ;;  %v6363_v46 = vld [vmem:[%s7391_s22 + $0x30] sm:$0xff]  ;;  %v6364_v61 = vld [vmem:[%s7391_s22 + $0x38] sm:$0xff]  ;;  %s9501_s22 = sld [smem:[#allocation48_spill]] }
 0x7cc   : > { %v4624_v45 = vadd.f32 %v4616_v38, %v4510_v21  ;;  %v4555_v38 = vrot.slane %v4473_v5, 2  ;;  %v4577_v13 = vadd.f32 %v4553_v62, %v4537_v36  ;;  %v4554_v21 = vrot.slane %v4464_v59, 2 }
 0x7cd   : > { %5889 = vmatpush1.bf16.msra.mxu1 %v5888_v42  ;;  %v4610_v31 = vadd.f32 %v4598_v53, %v4553_v62  ;;  %v4617_v18 = vadd.f32 %v4609_v37, %v4463_v22  ;;  %v4519_v20 = vsel %vm1601_vm2, %v4517_v41, %v4518_v48  ;;  %v4538_v33 = vadd.f32 %v4516_v60, %v4464_v59 }
 0x7ce   : > { %v4632_v2 = vadd.f32 %v4624_v45, %v4550_v26  ;;  %v4585_v35 = vadd.f32 %v4577_v13, %v4464_v59  ;;  %v4539_v26 = vadd.f32 %v4519_v20, %v4465_v58  ;;  %v4556_v28 = vsel %vm1650_vm3, %v4554_v21, %v4555_v38 }
 0x7cf   : > { %v4618_v0 = vadd.f32 %v4610_v31, %v4464_v59  ;;  %v4625_v45 = vadd.f32 %v4617_v18, %v4513_v51  ;;  %v4557_v16 = vrot.slane %v4465_v58, 2  ;;  %v4578_v12 = vadd.f32 %v4556_v28, %v4538_v33 }
 0x7d0   : > { %5446 = vmatmul.mubr.msk.f32.vlgmr.msra.gmra.mrb[56].mxu1 %vm1183_vm0, %v4632_v2  ;;  %v4599_v5 = vadd.f32 %v4585_v35, %v4516_v60  ;;  %v4466_v54 = vsel %vm4459_vm9, 0.0, %v4447_v39  ;;  %v4448_v22 = vrot.slane %v6363_v46, 7  ;;  %v4475_v30 = vsel %vm4459_vm9, %v4447_v39, 0.0 }
 0x7d1   : > { %4750 = vmatprep.mubr.f32.mxu1 %v9500_v11  ;;  %v4626_v14 = vadd.f32 %v4618_v0, %v4516_v60  ;;  %v4633_v50 = vadd.f32 %v4625_v45, %v4553_v62  ;;  %v4559_v42 = vsel %vm1650_vm3, %v4557_v16, %v4558_v4  ;;  %v4586_v2 = vadd.f32 %v4578_v12, %v4465_v58 }
 0x7d2   : > { %v4611_v9 = vadd.f32 %v4599_v5, %v4556_v28  ;;  %v4579_v59 = vadd.f32 %v4559_v42, %v4539_v26  ;;  %v4520_v51 = vrot.slane %v4466_v54, 1  ;;  %v4521_v1 = vrot.slane %v4475_v30, 1 }
 0x7d3   : > { %v4634_v6 = vadd.f32 %v4626_v14, %v4556_v28  ;;  %v4600_v41 = vadd.f32 %v4586_v2, %v4519_v20  ;;  %v4467_v55 = vsel %vm4459_vm9, 0.0, %v4448_v22  ;;  %v4476_v36 = vsel %vm4459_vm9, %v4448_v22, 0.0 }
 0x7d4   : > { %5447 = vmatmul.mubr.msk.f32.gmra.mrb[58].mxu1 %vm1183_vm0, %v4633_v50  ;;  %v4619_v48 = vadd.f32 %v4611_v9, %v4465_v58  ;;  %v4587_v53 = vadd.f32 %v4579_v59, %v4466_v54  ;;  %v4561_v37 = vrot.slane %v4475_v30, 2  ;;  %v4523_v4 = vrot.slane %v4467_v55, 1 }
 0x7d5   : > { %4756 = vmatprep.mubr.f32.mxu1 %v9500_v11  ;;  %v4612_v38 = vadd.f32 %v4600_v41, %v4559_v42  ;;  %v4449_v39 = vrot.slane %v6364_v61, 7  ;;  %v4524_v31 = vrot.slane %v4476_v36, 1  ;;  %v4522_v58 = vsel %vm1601_vm2, %v4520_v51, %v4521_v1 }
 0x7d6   : > { %v4627_v62 = vadd.f32 %v4619_v48, %v4519_v20  ;;  %v4560_v18 = vrot.slane %v4466_v54, 2  ;;  %v4540_v21 = vadd.f32 %v4522_v58, %v4466_v54  ;;  %v4601_v35 = vadd.f32 %v4587_v53, %v4522_v58 }
 0x7d7   : > { %v4620_v60 = vadd.f32 %v4612_v38, %v4466_v54  ;;  %v4564_v33 = vrot.slane %v4476_v36, 2  ;;  %v4468_v28 = vsel %vm4459_vm9, 0.0, %v4449_v39  ;;  %v4525_v12 = vsel %vm1601_vm2, %v4523_v4, %v4524_v31  ;;  %v4177_v31 = vld [vmem:[#allocation23 + $0x8] sm:$0xff] }
 0x7d8   : > { %5448 = vmatmul.mubr.msk.f32.gmra.mrb[60].mxu1 %vm1183_vm0, %v4634_v6  ;;  %v4635_v13 = vadd.f32 %v4627_v62, %v4559_v42  ;;  %v4562_v20 = vsel %vm1650_vm3, %v4560_v18, %v4561_v37  ;;  %v4563_v5 = vrot.slane %v4467_v55, 2  ;;  %v4477_v14 = vsel %vm4459_vm9, %v4449_v39, 0.0  ;;  %v4176_v18 = vld [vmem:[#allocation23] sm:$0xff] }
 0x7d9   : > { %4762 = vmatprep.mubr.f32.mxu1 %v9500_v11  ;;  %v4628_v0 = vadd.f32 %v4620_v60, %v4522_v58  ;;  %v4580_v26 = vadd.f32 %v4562_v20, %v4540_v21  ;;  %v4613_v45 = vadd.f32 %v4601_v35, %v4562_v20  ;;  %v4541_v46 = vadd.f32 %v4525_v12, %v4467_v55  ;;  %v4179_v58 = vld [vmem:[#allocation23 + $0x18] sm:$0xff]  ;;  %v4178_v21 = vld [vmem:[#allocation23 + $0x10] sm:$0xff] }
 0x7da   : > { %v4565_v50 = vsel %vm1650_vm3, %v4563_v5, %v4564_v33  ;;  %v4592_v2 = vrot.slane %v4468_v28, 1  ;;  %v4593_v9 = vrot.slane %v4477_v14, 1  ;;  %v4605_v48 = vrot.slane %v4477_v14, 2  ;;  %v4181_v33 = vld [vmem:[#allocation23 + $0x28] sm:$0xff]  ;;  %v4191_v14 = vld [vmem:[#allocation23 + $0x78] sm:$0xff] }
 0x7db   : > { %v4636_v16 = vadd.f32 %v4628_v0, %v4562_v20  ;;  %v4588_v54 = vadd.f32 %v4580_v26, %v4467_v55  ;;  %v4621_v22 = vadd.f32 %v4613_v45, %v4467_v55  ;;  %v4581_v59 = vadd.f32 %v4565_v50, %v4541_v46  ;;  %v4183_v20 = vld [vmem:[#allocation23 + $0x38] sm:$0xff]  ;;  %v4180_v0 = vld [vmem:[#allocation23 + $0x20] sm:$0xff]  ;;  %v4182_v26 = vld [vmem:[#allocation23 + $0x30] sm:$0xff] }
 0x7dc   : > { %5449 = vmatmul.mubr.msk.f32.gmra.mrb[62].mxu1 %vm1183_vm0, %v4635_v13  ;;  %v4594_v1 = vsel %vm1601_vm2, %v4592_v2, %v4593_v9  ;;  %v4604_v55 = vrot.slane %v4468_v28, 2  ;;  %v5818_v60 = vpack.c.bf16 %v4179_v58, %v4177_v31  ;;  %v5820_v35 = vpack.c.bf16 %v4178_v21, %v4176_v18  ;;  %v4184_v45 = vld [vmem:[#allocation23 + $0x40] sm:$0xff]  ;;  %v4189_v5 = vld [vmem:[#allocation23 + $0x68] sm:$0xff]  ;;  %v4206_v18 = vld [vmem:[#allocation23 + $0xf0] sm:$0xff] }
 0x7dd   : > { %4768 = vmatprep.mubr.f32.mxu1 %v9500_v11  ;;  %v4602_v42 = vadd.f32 %v4588_v54, %v4525_v12  ;;  %v4629_v30 = vadd.f32 %v4621_v22, %v4525_v12  ;;  %v4589_v51 = vadd.f32 %v4581_v59, %v4468_v28  ;;  %v4188_v54 = vld [vmem:[#allocation23 + $0x60] sm:$0xff]  ;;  %v5830_v46 = vpack.c.bf16 %v4191_v14, %v4189_v5  ;;  %v4190_v22 = vld [vmem:[#allocation23 + $0x70] sm:$0xff]  ;;  %v4211_v21 = vld [vmem:[#allocation23 + $0x118] sm:$0xff] }
 0x7de   : > { %v4606_v38 = vsel %vm1650_vm3, %v4604_v55, %v4605_v48  ;;  %5819 = vmatprep.subr.bf16.mxu0 %v5818_v60  ;;  %v4192_v2 = vld [vmem:[#allocation23 + $0x80] sm:$0xff]  ;;  %v4194_v59 = vld [vmem:[#allocation23 + $0x90] sm:$0xff]  ;;  %v4199_v48 = vld [vmem:[#allocation23 + $0xb8] sm:$0xff] }
 0x7df   : > { %v4614_v6 = vadd.f32 %v4602_v42, %v4565_v50  ;;  %v4637_v41 = vadd.f32 %v4629_v30, %v4565_v50  ;;  %v4603_v53 = vadd.f32 %v4594_v1, %v4589_v51  ;;  %5821 = vmatpush1.bf16.msra.mxu0 %v5820_v35  ;;  %v5832_v50 = vpack.c.bf16 %v4190_v22, %v4188_v54  ;;  %v4193_v42 = vld [vmem:[#allocation23 + $0x88] sm:$0xff]  ;;  %v4195_v30 = vld [vmem:[#allocation23 + $0x98] sm:$0xff]  ;;  %v4196_v51 = vld [vmem:[#allocation23 + $0xa0] sm:$0xff] }
 0x7e0   : > { %5450 = vmatmul.mubr.msk.f32.gmra.mrb[64].mxu1 %vm1183_vm0, %v4636_v16  ;;  %v4186_v16 = vld [vmem:[#allocation23 + $0x50] sm:$0xff]  ;;  %v5834_v9 = vpack.c.bf16 %v4195_v30, %v4193_v42  ;;  %v4204_v58 = vld [vmem:[#allocation23 + $0xe0] sm:$0xff]  ;;  %v4209_v60 = vld [vmem:[#allocation23 + $0x108] sm:$0xff] }
 0x7e1   : > { %4774 = vmatprep.mubr.f32.mxu1 %v9500_v11  ;;  %v4622_v36 = vadd.f32 %v4614_v6, %v4468_v28  ;;  %v4615_v37 = vadd.f32 %v4606_v38, %v4603_v53  ;;  %v5828_v12 = vpack.c.bf16 %v4186_v16, %v4184_v45  ;;  %v5836_v6 = vpack.c.bf16 %v4194_v59, %v4192_v2  ;;  %v4198_v55 = vld [vmem:[#allocation23 + $0xb0] sm:$0xff]  ;;  %v4203_v53 = vld [vmem:[#allocation23 + $0xd8] sm:$0xff]  ;;  %v4216_v30 = vld [vmem:[#allocation23 + $0x140] sm:$0xff] }
 0x7e2   : > { %v5848_v35 = vpack.c.bf16 %v4206_v18, %v4204_v58  ;;  %v4215_v45 = vld [vmem:[#allocation23 + $0x138] sm:$0xff]  ;;  %v4214_v14 = vld [vmem:[#allocation23 + $0x130] sm:$0xff]  ;;  %v4220_v18 = vld [vmem:[#allocation23 + $0x160] sm:$0xff] }
 0x7e3   : > { %v4630_v62 = vadd.f32 %v4622_v36, %v4594_v1  ;;  %v4623_v61 = vadd.f32 %v4615_v37, %v8697_v7  ;;  %v5822_v7 = vpack.c.bf16 %v4183_v20, %v4181_v33  ;;  %v4201_v36 = vld [vmem:[#allocation23 + $0xc8] sm:$0xff]  ;;  %v4200_v37 = vld [vmem:[#allocation23 + $0xc0] sm:$0xff]  ;;  %v5850_v33 = vpack.c.bf16 %v4211_v21, %v4209_v60  ;;  %v4219_v42 = vld [vmem:[#allocation23 + $0x158] sm:$0xff] }
 0x7e4   : > { %5451 = vmatmul.mubr.msk.f32.gmra.mrb[66].mxu1 %vm1183_vm0, %v4637_v41  ;;  %v4197_v41 = vld [vmem:[#allocation23 + $0xa8] sm:$0xff]  ;;  %v4208_v20 = vld [vmem:[#allocation23 + $0x100] sm:$0xff]  ;;  %v4222_v60 = vld [vmem:[#allocation23 + $0x170] sm:$0xff] }
 0x7e5   : > { %4780 = vmatprep.mubr.f32.mxu1 %v9500_v11  ;;  %v4638_v4 = vadd.f32 %v4630_v62, %v4606_v38  ;;  %v4631_v39 = vadd.f32 %v4623_v61, %v8702_v49  ;;  %5823 = vmatprep.subr.bf16.mxu0 %v5822_v7  ;;  %v4185_v49 = vld [vmem:[#allocation23 + $0x48] sm:$0xff]  ;;  %v5838_v1 = vpack.c.bf16 %v4199_v48, %v4197_v41 }
 0x7e6   : > { %v5840_v38 = vpack.c.bf16 %v4198_v55, %v4196_v51  ;;  %v5842_v62 = vpack.c.bf16 %v4203_v53, %v4201_v36  ;;  %v4205_v61 = vld [vmem:[#allocation23 + $0xe8] sm:$0xff] }
 0x7e7   : > { %v4639_v13 = vadd.f32 %v4631_v39, %v8709_v3  ;;  %v4187_v3 = vld [vmem:[#allocation23 + $0x58] sm:$0xff]  ;;  %v4225_v21 = vld [vmem:[#allocation23 + $0x188] sm:$0xff] }
 0x7e8   : > { %5452 = vmatmul.mubr.msk.f32.gmra.mrb[68].mxu1 %vm1183_vm0, %v4638_v4  ;;  %v5826_v28 = vpack.c.bf16 %v4187_v3, %v4185_v49  ;;  %v4202_v4 = vld [vmem:[#allocation23 + $0xd0] sm:$0xff]  ;;  %v4207_v39 = vld [vmem:[#allocation23 + $0xf8] sm:$0xff]  ;;  %v4213_v3 = vld [vmem:[#allocation23 + $0x128] sm:$0xff] }
 0x7e9   : > { %4786 = vmatprep.mubr.f32.mxu1 %v9500_v11  ;;  %v5824_v11 = vpack.c.bf16 %v4182_v26, %v4180_v0  ;;  %v5846_v31 = vpack.c.bf16 %v4207_v39, %v4205_v61  ;;  %v4210_v0 = vld [vmem:[#allocation23 + $0x110] sm:$0xff]  ;;  %v5854_v5 = vpack.c.bf16 %v4215_v45, %v4213_v3 }
 0x7ea   : > { %v5852_v7 = vpack.c.bf16 %v4210_v0, %v4208_v20  ;;  %v8770_v26 = vld [vmem:[%s9501_s22] ss:$0 sm:$0xff]  ;;  %v5864_v20 = vpack.c.bf16 %v4222_v60, %v4220_v18  ;;  %v4227_v0 = vld [vmem:[#allocation23 + $0x198] sm:$0xff]  ;;  %s6785_s22 = scalar_lea.vmem %s9363_s11, 6144 }
 0x7eb   : > { %5825 = vmatpush1.bf16.msra.mxu0 %v5824_v11  ;;  %v8773_v11 = vld [vmem:[%s9502_s26] ss:$0 sm:$0xff]  ;;  %v5866_v45 = vpack.c.bf16 %v4227_v0, %v4225_v21  ;;  %v4224_v0 = vld [vmem:[#allocation23 + $0x180] sm:$0xff]  ;;  %p6786_p3 = scmp.ne.s32.totalorder %s9363_s11, %s6785_s22  ;;  %s6936_s26 = smov [#allocation26]  }
 0x7ec   : > { %5453 = vmatmul.mubr.msk.f32.gmra.mrb[70].mxu1 %vm1183_vm0, %v4639_v13  ;;  %5827 = vmatprep.subr.bf16.mxu0 %v5826_v28  ;;  %v5844_v13 = vpack.c.bf16 %v4202_v4, %v4200_v37  ;;  %v4212_v28 = vld [vmem:[#allocation23 + $0x120] sm:$0xff] }
 0x7ed   : > { %v5856_v54 = vpack.c.bf16 %v4214_v14, %v4212_v28  ;;  %p6787_p12 = pnand %p6786_p3, %p9512_p4 }
 0x7ef   : > { %5829 = vmatpush1.bf16.msra.mxu0 %v5828_v12  ;;  %p6788_p5 = pneg %p6787_p12 }
 0x7f0   : > { %5831 = vmatprep.subr.bf16.mxu0 %v5830_v46 }
 0x7f3   : > { %5833 = vmatpush1.bf16.msra.mxu0 %v5832_v50  ;;  %v4217_v50 = vld [vmem:[#allocation23 + $0x148] sm:$0xff] }
 0x7f4   : > { %5835 = vmatprep.subr.bf16.mxu0 %v5834_v9  ;;  %v5858_v2 = vpack.c.bf16 %v4219_v42, %v4217_v50  ;;  %v4218_v9 = vld [vmem:[#allocation23 + $0x150] sm:$0xff] }
 0x7f7   : > { %5837 = vmatpush1.bf16.msra.mxu0 %v5836_v6  ;;  %v5860_v6 = vpack.c.bf16 %v4218_v9, %v4216_v30 }
 0x7f8   : > { %5839 = vmatprep.subr.bf16.mxu0 %v5838_v1 }
 0x7fb   : > { %5841 = vmatpush1.bf16.msra.mxu0 %v5840_v38  ;;  %v4221_v38 = vld [vmem:[#allocation23 + $0x168] sm:$0xff] }
 0x7fc   : > { %5843 = vmatprep.subr.bf16.mxu0 %v5842_v62  ;;  %v4223_v62 = vld [vmem:[#allocation23 + $0x178] sm:$0xff] }
 0x7fd   : > { %v5862_v58 = vpack.c.bf16 %v4223_v62, %v4221_v38 }
 0x7ff   : > { %5845 = vmatpush1.bf16.msra.mxu0 %v5844_v13 }
 0x800   : > { %5847 = vmatprep.subr.bf16.mxu0 %v5846_v31 }
 0x803   : > { %5849 = vmatpush1.bf16.msra.mxu0 %v5848_v35 }
 0x804   : > { %5851 = vmatprep.subr.bf16.mxu0 %v5850_v33 }
 0x807   : > { %5853 = vmatpush1.bf16.msra.mxu0 %v5852_v7 }
 0x808   : > { %5855 = vmatprep.subr.bf16.mxu0 %v5854_v5 }
 0x80b   : > { %5857 = vmatpush1.bf16.msra.mxu0 %v5856_v54 }
 0x80c   : > { %5859 = vmatprep.subr.bf16.mxu0 %v5858_v2 }
 0x80f   : > { %5861 = vmatpush1.bf16.msra.mxu0 %v5860_v6 }
 0x810   : > { %5863 = vmatprep.subr.bf16.mxu0 %v5862_v58 }
 0x813   : > { %5865 = vmatpush1.bf16.msra.mxu0 %v5864_v20 }
 0x814   : > { %5867 = vmatprep.subr.bf16.mxu0 %v5866_v45 }
 0x86d   : > { %v3731_v49 = vpop.f32.mrb[40].mxu1 }
 0x86e   : > { %v3777_v16 = vmul.f32 %v8770_v26, %v3731_v49  ;;  %v3733_v12 = vpop.f32.mrb[41].mxu1 }
 0x870   : > { %v3792_v46 = vadd.f32 %v8773_v11, %v3777_v16 }
 0x872   : > { %v3800_v22 = vmax.f32 %v3792_v46, 0.0 }
 0x874   : > { %v3816_v59 = vrot.slane %v3800_v22, 5 }
 0x876   : > { %v8778_v41 = vsel %vm1568_vm1, 0.0, %v3816_v59  ;;  %v8781_v48 = vsel %vm1568_vm1, %v3816_v59, 0.0  ;;  %v3736_v51 = vpop.f32.mrb[42].mxu1 }
 0x877   : > { %v3778_v1 = vmul.f32 %v8770_v26, %v3736_v51  ;;  %v3738_v55 = vpop.f32.mrb[43].mxu1  ;;  %v4040_v36 = vrot.slane %v8778_v41, 5  ;;  %v4041_v53 = vrot.slane %v8781_v48, 5  ;;  %v4088_v61 = vrot.slane %v8778_v41, 6 }
 0x878   : > { %v4089_v39 = vrot.slane %v8781_v48, 6  ;;  %v3864_v3 = vrot.slane %v8778_v41, 1  ;;  %v3865_v16 = vrot.slane %v8781_v48, 1  ;;  %v3912_v12 = vrot.slane %v8778_v41, 2 }
 0x879   : > { %v3793_v37 = vadd.f32 %v8773_v11, %v3778_v1  ;;  %v4042_v4 = vsel %vm1568_vm1, %v4040_v36, %v4041_v53  ;;  %v3913_v5 = vrot.slane %v8781_v48, 2  ;;  %v3960_v46 = vrot.slane %v8778_v41, 3 }
 0x87a   : > { %4064 = vrot.lane.b32.xlu1 %v4042_v4, %s6934_s16  ;;  %v4090_v49 = vsel %vm1829_vm4, %v4088_v61, %v4089_v39  ;;  %v3961_v22 = vrot.slane %v8781_v48, 3  ;;  %v3866_v53 = vsel %vm1601_vm2, %v3864_v3, %v3865_v16  ;;  %v4229_v16 = vld [vmem:[#allocation23 + $0x1a8] sm:$0xff] }
 0x87b   : > { %v3801_v13 = vmax.f32 %v3793_v37, 0.0  ;;  %v3741_v31 = vpop.f32.mrb[44].mxu1  ;;  %v3914_v61 = vsel %vm1650_vm3, %v3912_v12, %v3913_v5  ;;  %v4231_v12 = vld [vmem:[#allocation23 + $0x1b8] sm:$0xff] }
 0x87c   : > { %v3779_v35 = vmul.f32 %v8770_v26, %v3741_v31  ;;  %v3743_v33 = vpop.f32.mrb[45].mxu1  ;;  %v3962_v58 = vsel %vm1699_vm5, %v3960_v46, %v3961_v22 }
 0x87d   : > { %v3817_v7 = vrot.slane %v3801_v13, 5 }
 0x87e   : > { %v3794_v28 = vadd.f32 %v8773_v11, %v3779_v35  ;;  %4112 = vrot.lane.b32.xlu1 %v4090_v49, %s6933_s28 }
 0x87f   : > { %v8800_v14 = vsel %vm1568_vm1, 0.0, %v3817_v7  ;;  %v8803_v54 = vsel %vm1568_vm1, %v3817_v7, 0.0  ;;  %v4226_v7 = vld [vmem:[#allocation23 + $0x190] sm:$0xff] }
 0x880   : > { %v3802_v50 = vmax.f32 %v3794_v28, 0.0  ;;  %v4043_v42 = vrot.slane %v8800_v14, 5  ;;  %v4044_v30 = vrot.slane %v8803_v54, 5  ;;  %v3867_v2 = vrot.slane %v8800_v14, 1 }
 0x881   : > { %v3868_v9 = vrot.slane %v8803_v54, 1  ;;  %v3915_v59 = vrot.slane %v8800_v14, 2  ;;  %v3916_v6 = vrot.slane %v8803_v54, 2  ;;  %v3963_v51 = vrot.slane %v8800_v14, 3 }
 0x882   : > { %v3818_v1 = vrot.slane %v3802_v50, 5  ;;  %v3746_v55 = vpop.f32.mrb[46].mxu1  ;;  %v4045_v36 = vsel %vm1568_vm1, %v4043_v42, %v4044_v30  ;;  %v3964_v38 = vrot.slane %v8803_v54, 3  ;;  %v4091_v49 = vrot.slane %v8800_v14, 6 }
 0x883   : > { %v3780_v62 = vmul.f32 %v8770_v26, %v3746_v55  ;;  %4066 = vrot.lane.b32.xlu1 %v4045_v36, %s6934_s16  ;;  %v3748_v37 = vpop.f32.mrb[47].mxu1  ;;  %v3869_v4 = vsel %vm1601_vm2, %v3867_v2, %v3868_v9  ;;  %v3917_v39 = vsel %vm1650_vm3, %v3915_v59, %v3916_v6  ;;  %v4092_v3 = vrot.slane %v8803_v54, 6 }
 0x884   : > { %v6294_v13 = vpack.i.bf16 %v3869_v4, %v3866_v53  ;;  %v6299_v31 = vpack.i.bf16 %v3917_v39, %v3914_v61  ;;  %v8824_v18 = vsel %vm1568_vm1, 0.0, %v3818_v1  ;;  %v8827_v60 = vsel %vm1568_vm1, %v3818_v1, 0.0 }
 0x885   : > { %v3795_v21 = vadd.f32 %v8773_v11, %v3780_v62  ;;  %v3965_v35 = vsel %vm1699_vm5, %v3963_v51, %v3964_v38  ;;  %v3870_v45 = vrot.slane %v8824_v18, 1  ;;  %v3871_v28 = vrot.slane %v8827_v60, 1 }
 0x886   : > { %6295 = vrot.lane.b32.xlu0 %v6294_v13, %s6934_s16  ;;  %v6304_v33 = vpack.i.bf16 %v3965_v35, %v3962_v58  ;;  %v4046_v22 = vrot.slane %v8824_v18, 5  ;;  %v4047_v50 = vrot.slane %v8827_v60, 5  ;;  %v3918_v42 = vrot.slane %v8824_v18, 2 }
 0x887   : > { %v3803_v20 = vmax.f32 %v3795_v21, 0.0  ;;  %v3919_v9 = vrot.slane %v8827_v60, 2  ;;  %v3966_v59 = vrot.slane %v8824_v18, 3  ;;  %v5868_v6 = vpack.c.bf16 %v4226_v7, %v4224_v0  ;;  %v4228_v7 = vld [vmem:[#allocation23 + $0x1a0] sm:$0xff] }
 0x888   : > { %v3967_v55 = vrot.slane %v8827_v60, 3  ;;  %v5870_v36 = vpack.c.bf16 %v4231_v12, %v4229_v16  ;;  %v3872_v61 = vsel %vm1601_vm2, %v3870_v45, %v3871_v28  ;;  %v4230_v16 = vld [vmem:[#allocation23 + $0x1b0] sm:$0xff] }
 0x889   : > { %v3819_v5 = vrot.slane %v3803_v20, 5  ;;  %v3751_v46 = vpop.f32.mrb[48].mxu1  ;;  %5869 = vmatpush1.bf16.msra.mxu0 %v5868_v6  ;;  %v3920_v0 = vsel %vm1650_vm3, %v3918_v42, %v3919_v9  ;;  %v4093_v6 = vsel %vm1829_vm4, %v4091_v49, %v4092_v3  ;;  %v4094_v42 = vrot.slane %v8824_v18, 6 }
 0x88a   : > { %6300 = vrot.lane.b32.xlu0 %v6299_v31, %s6933_s28  ;;  %v3781_v30 = vmul.f32 %v8770_v26, %v3751_v46  ;;  %v3753_v2 = vpop.f32.mrb[49].mxu1  ;;  %5871 = vmatprep.subr.bf16.mxu0 %v5870_v36  ;;  %v3968_v12 = vsel %vm1699_vm5, %v3966_v59, %v3967_v55  ;;  %v4095_v9 = vrot.slane %v8827_v60, 6  ;;  %v4048_v3 = vsel %vm1568_vm1, %v4046_v22, %v4047_v50 }
 0x88b   : > { %v8844_v51 = vsel %vm1568_vm1, 0.0, %v3819_v5  ;;  %v8847_v1 = vsel %vm1568_vm1, %v3819_v5, 0.0 }
 0x88c   : > { %v3796_v53 = vadd.f32 %v8773_v11, %v3781_v30  ;;  %v3873_v38 = vrot.slane %v8844_v51, 1  ;;  %v3874_v62 = vrot.slane %v8847_v1, 1  ;;  %v3921_v37 = vrot.slane %v8844_v51, 2 }
 0x88d   : > { %v3756_v4 = vpop.f32.mrb[50].mxu1  ;;  %v3922_v39 = vrot.slane %v8847_v1, 2  ;;  %v3969_v13 = vrot.slane %v8844_v51, 3  ;;  %v3970_v31 = vrot.slane %v8847_v1, 3 }
 0x88e   : > { %v3804_v58 = vmax.f32 %v3796_v53, 0.0  ;;  %6305 = vrot.lane.b32.xlu0 %v6304_v33, %s6935_s25  ;;  %v3782_v21 = vmul.f32 %v8770_v26, %v3756_v4  ;;  %v3758_v35 = vpop.f32.mrb[51].mxu1  ;;  %v3875_v20 = vsel %vm1601_vm2, %v3873_v38, %v3874_v62  ;;  %v5872_v53 = vpack.c.bf16 %v4230_v16, %v4228_v7 }
 0x88f   : > { %v6309_v45 = vpack.i.bf16 %v3875_v20, %v3872_v61  ;;  %v3923_v28 = vsel %vm1650_vm3, %v3921_v37, %v3922_v39  ;;  %v3971_v5 = vsel %vm1699_vm5, %v3969_v13, %v3970_v31  ;;  %v4097_v61 = vrot.slane %v8844_v51, 6 }
 0x890   : > { %v3820_v46 = vrot.slane %v3804_v58, 5  ;;  %v3797_v30 = vadd.f32 %v8773_v11, %v3782_v21  ;;  %v6314_v33 = vpack.i.bf16 %v3923_v28, %v3920_v0  ;;  %v6319_v2 = vpack.i.bf16 %v3971_v5, %v3968_v12  ;;  %5873 = vmatpush1.bf16.msra.mxu0 %v5872_v53 }
 0x891   : > { %6310 = vrot.lane.b32.xlu1 %v6309_v45, %s6934_s16  ;;  %v3761_v36 = vpop.f32.mrb[52].mxu1  ;;  %v4098_v39 = vrot.slane %v8847_v1, 6  ;;  %v4096_v31 = vsel %vm1829_vm4, %v4094_v42, %v4095_v9  ;;  %v4049_v58 = vrot.slane %v8844_v51, 5 }
 0x892   : > { %v8871_v38 = vsel %vm1568_vm1, 0.0, %v3820_v46  ;;  %v8874_v59 = vsel %vm1568_vm1, %v3820_v46, 0.0  ;;  %v3805_v55 = vmax.f32 %v3797_v30, 0.0  ;;  %4114 = vrot.lane.b32.xlu0 %v4093_v6, %s6933_s28  ;;  %v3783_v62 = vmul.f32 %v8770_v26, %v3761_v36  ;;  %v3763_v49 = vpop.f32.mrb[53].mxu1 }
 0x893   : > { %v3876_v21 = vrot.slane %v8871_v38, 1  ;;  %v3877_v35 = vrot.slane %v8874_v59, 1  ;;  %v3924_v28 = vrot.slane %v8871_v38, 2  ;;  %v3925_v12 = vrot.slane %v8874_v59, 2 }
 0x894   : > { %v3821_v37 = vrot.slane %v3805_v55, 5  ;;  %v3798_v4 = vadd.f32 %v8773_v11, %v3783_v62  ;;  %v4050_v46 = vrot.slane %v8847_v1, 5  ;;  %v4099_v30 = vsel %vm1829_vm4, %v4097_v61, %v4098_v39 }
 0x895   : > { %6315 = vrot.lane.b32.xlu1 %v6314_v33, %s6933_s28  ;;  %v3766_v13 = vpop.f32.mrb[54].mxu1  ;;  %v4053_v53 = vrot.slane %v8874_v59, 5  ;;  %v3926_v62 = vsel %vm1650_vm3, %v3924_v28, %v3925_v12 }
 0x896   : > { %v8888_v22 = vsel %vm1568_vm1, 0.0, %v3821_v37  ;;  %v8891_v50 = vsel %vm1568_vm1, %v3821_v37, 0.0  ;;  %v3806_v20 = vmax.f32 %v3798_v4, 0.0  ;;  %4068 = vrot.lane.b32.xlu0 %v4048_v3, %s6934_s16  ;;  %v3784_v0 = vmul.f32 %v8770_v26, %v3766_v13  ;;  %v3768_v7 = vpop.f32.mrb[55].mxu1 }
 0x897   : > { %v3879_v16 = vrot.slane %v8888_v22, 1  ;;  %v3880_v45 = vrot.slane %v8891_v50, 1  ;;  %v3927_v33 = vrot.slane %v8888_v22, 2  ;;  %v3878_v26 = vsel %vm1601_vm2, %v3876_v21, %v3877_v35 }
 0x898   : > { %v3799_v5 = vadd.f32 %v8773_v11, %v3784_v0  ;;  %v3822_v6 = vrot.slane %v3806_v20, 5  ;;  %v3928_v42 = vrot.slane %v8891_v50, 2  ;;  %v4052_v11 = vrot.slane %v8871_v38, 5 }
 0x899   : > { %6320 = vrot.lane.b32.xlu1 %v6319_v2, %s6935_s25  ;;  %v3881_v36 = vsel %vm1601_vm2, %v3879_v16, %v3880_v45  ;;  %v3972_v2 = vrot.slane %v8871_v38, 3  ;;  %v3973_v3 = vrot.slane %v8874_v59, 3  ;;  %v3975_v61 = vrot.slane %v8888_v22, 3 }
 0x89a   : > { %v3807_v9 = vmax.f32 %v3799_v5, 0.0  ;;  %4116 = vrot.lane.b32.xlu0 %v4096_v31, %s6933_s28  ;;  %v6324_v55 = vpack.i.bf16 %v3881_v36, %v3878_v26  ;;  %v3929_v49 = vsel %vm1650_vm3, %v3927_v33, %v3928_v42  ;;  %v3976_v39 = vrot.slane %v8891_v50, 3 }
 0x89b   : > { %v6329_v4 = vpack.i.bf16 %v3929_v49, %v3926_v62  ;;  %v8917_v13 = vsel %vm1568_vm1, 0.0, %v3822_v6  ;;  %v8920_v31 = vsel %vm1568_vm1, %v3822_v6, 0.0  ;;  %v4051_v21 = vsel %vm1568_vm1, %v4049_v58, %v4050_v46 }
 0x89c   : > { %v3823_v37 = vrot.slane %v3807_v9, 5  ;;  %v3974_v0 = vsel %vm1699_vm5, %v3972_v2, %v3973_v3  ;;  %v3977_v7 = vsel %vm1699_vm5, %v3975_v61, %v3976_v39  ;;  %v4054_v16 = vsel %vm1568_vm1, %v4052_v11, %v4053_v53 }
 0x89d   : > { %4118 = vrot.lane.b32.xlu1 %v4099_v30, %s6933_s28  ;;  %v4100_v45 = vrot.slane %v8871_v38, 6  ;;  %v6334_v28 = vpack.i.bf16 %v3977_v7, %v3974_v0  ;;  %v4101_v58 = vrot.slane %v8874_v59, 6  ;;  %v3882_v12 = vrot.slane %v8917_v13, 1  ;;  %v2424_v7 = vld [vmem:[%s9503_s10] sm:$0x3]  ;;  %s6789_s10 = sshll.u32 %s6936_s26, 4  ;;  %s6790_s10 = int_to_ptr.vmem [resolvable:$false] %s6789_s10 }
 0x89e   : > { %v8925_v35 = vsel %vm1568_vm1, 0.0, %v3823_v37  ;;  %v8928_v20 = vsel %vm1568_vm1, %v3823_v37, 0.0  ;;  %4070 = vrot.lane.b32.xlu0 %v4051_v21, %s6934_s16  ;;  %v3883_v5 = vrot.slane %v8920_v31, 1  ;;  %v3930_v33 = vrot.slane %v8917_v13, 2  ;;  %p6792_p6 = scmp.lt.s32.totalorder %s9363_s11, %s6790_s10 }
 0x89f   : > { %v3885_v46 = vrot.slane %v8925_v35, 1  ;;  %v3886_v30 = vrot.slane %v8928_v20, 1  ;;  %v3931_v6 = vrot.slane %v8920_v31, 2  ;;  %v3933_v26 = vrot.slane %v8925_v35, 2 }
 0x8a0   : > { %v3884_v36 = vsel %vm1601_vm2, %v3882_v12, %v3883_v5  ;;  %v3934_v9 = vrot.slane %v8928_v20, 2  ;;  %v4102_v11 = vsel %vm1829_vm4, %v4100_v45, %v4101_v58  ;;  %v4055_v53 = vrot.slane %v8888_v22, 5  ;;  %v2452_v5 = vld [vmem:[#allocation13] sm:$0x3] }
 0x8a1   : > { %4072 = vrot.lane.b32.xlu1 %v4054_v16, %s6934_s16  ;;  %v3887_v42 = vsel %vm1601_vm2, %v3885_v46, %v3886_v30  ;;  %v4056_v62 = vrot.slane %v8891_v50, 5  ;;  %v3932_v49 = vsel %vm1650_vm3, %v3930_v33, %v3931_v6  ;;  %v3978_v61 = vrot.slane %v8917_v13, 3 }
 0x8a2   : > { %6325 = vrot.lane.b32.xlu0 %v6324_v55, %s6934_s16  ;;  %v6339_v55 = vpack.i.bf16 %v3887_v42, %v3884_v36  ;;  %v3935_v2 = vsel %vm1650_vm3, %v3933_v26, %v3934_v9  ;;  %v3979_v39 = vrot.slane %v8920_v31, 3  ;;  %v4103_v21 = vrot.slane %v8888_v22, 6 }
 0x8a3   : > { %v6344_v3 = vpack.i.bf16 %v3935_v2, %v3932_v49  ;;  %v4057_v37 = vsel %vm1568_vm1, %v4055_v53, %v4056_v62  ;;  %v4104_v0 = vrot.slane %v8891_v50, 6  ;;  %v4058_v45 = vrot.slane %v8917_v13, 5 }
 0x8a4   : > { %v3980_v16 = vsel %vm1699_vm5, %v3978_v61, %v3979_v39  ;;  %v4059_v58 = vrot.slane %v8920_v31, 5  ;;  %v8970_v12 = vrot.slane %v2424_v7, %v7786_v29  ;;  %v4107_v30 = vrot.slane %v8920_v31, 6 }
 0x8a5   : > { %4120 = vrot.lane.b32.xlu1 %v4102_v11, %s6933_s28  ;;  %v8980_v6 = vrot.slane %v2452_v5, %v7786_v29  ;;  %v8983_v26 = vrot.slane %v2424_v7, %v7789_v40  ;;  %v4109_v36 = vrot.slane %v8925_v35, 6  ;;  %v4110_v42 = vrot.slane %v8928_v20, 6 }
 0x8a6   : > { %6330 = vrot.lane.b32.xlu0 %v6329_v4, %s6933_s28  ;;  %v4105_v4 = vsel %vm1829_vm4, %v4103_v21, %v4104_v0  ;;  %v4060_v46 = vsel %vm1568_vm1, %v4058_v45, %v4059_v58  ;;  %v2436_v33 = vmul.f32 %v8970_v12, %v8204_v44  ;;  %v4061_v11 = vrot.slane %v8925_v35, 5 }
 0x8a7   : > { %v4062_v53 = vrot.slane %v8928_v20, 5  ;;  %v2438_v62 = vmul.f32 %v8970_v12, %v8210_v15  ;;  %v8998_v49 = vrot.slane %v2452_v5, %v7789_v40  ;;  %v4111_v2 = vsel %vm1829_vm4, %v4109_v36, %v4110_v42 }
 0x8a8   : > { %v2464_v44 = vadd.f32 %v8980_v6, %v2436_v33  ;;  %v3982_v61 = vrot.slane %v8928_v20, 3  ;;  %v2439_v0 = vmul.f32 %v8983_v26, %v8212_v34  ;;  %v2442_v45 = vmul.f32 %v8970_v12, %v8220_v56 }
 0x8a9   : > { %4074 = vrot.lane.b32.xlu1 %v4057_v37, %s6934_s16  ;;  %v3981_v37 = vrot.slane %v8925_v35, 3  ;;  %v2466_v15 = vadd.f32 %v8980_v6, %v2438_v62  ;;  %v2441_v5 = vmul.f32 %v8983_v26, %v8217_v32  ;;  %v2443_v56 = vmul.f32 %v8983_v26, %v8223_v25 }
 0x8aa   : > { %6335 = vrot.lane.b32.xlu0 %v6334_v28, %s6935_s25  ;;  %v4106_v28 = vrot.slane %v8917_v13, 6  ;;  %v2480_v39 = vmax.f32 %v2464_v44, 0.0  ;;  %v2446_v42 = vmul.f32 %v8970_v12, %v8231_v23  ;;  %v2448_v44 = vmul.f32 %v8970_v12, %v8236_v43 }
 0x8ab   : > { %v3983_v7 = vsel %vm1699_vm5, %v3981_v37, %v3982_v61  ;;  %v2469_v33 = vadd.f32 %v8998_v49, %v2441_v5  ;;  %v2447_v23 = vmul.f32 %v8983_v26, %v8233_v47  ;;  %v2449_v43 = vmul.f32 %v8983_v26, %v8238_v8 }
 0x8ac   : > { %v4108_v9 = vsel %vm1829_vm4, %v4106_v28, %v4107_v30  ;;  %v2444_v28 = vmul.f32 %v8970_v12, %v8226_v19  ;;  %v2445_v19 = vmul.f32 %v8983_v26, %v8228_v24 }
 0x8ad   : > { %3996 = vrot.lane.b32.xlu1 %v3980_v16, %s6935_s25  ;;  %v2482_v16 = vmax.f32 %v2466_v15, 0.0  ;;  %v2475_v61 = vadd.f32 %v8998_v49, %v2447_v23 }
 0x8ae   : > { %4122 = vrot.lane.b32.xlu0 %v4105_v4, %s6933_s28  ;;  %v2472_v36 = vadd.f32 %v8980_v6, %v2444_v28 }
 0x8af   : > { %v2491_v15 = vmax.f32 %v2475_v61, 0.0 }
 0x8b0   : > { %v2488_v25 = vmax.f32 %v2472_v36, 0.0 }
 0x8b1   : > { %6340 = vrot.lane.b32.xlu1 %v6339_v55, %s6934_s16  ;;  %v2437_v55 = vmul.f32 %v8983_v26, %v8206_v57  ;;  %v2440_v57 = vmul.f32 %v8970_v12, %v8215_v63  ;;  %v2467_v63 = vadd.f32 %v8998_v49, %v2439_v0  ;;  %v4793_v0 = vld [vmem:[%s7092_s5] sm:$0x3] }
 0x8b2   : > { %4076 = vrot.lane.b32.xlu0 %v4060_v46, %s6934_s16  ;;  %v2470_v46 = vadd.f32 %v8980_v6, %v2442_v45 }
 0x8b3   : > { %v2465_v21 = vadd.f32 %v8998_v49, %v2437_v55  ;;  %v2468_v4 = vadd.f32 %v8980_v6, %v2440_v57  ;;  %v2483_v30 = vmax.f32 %v2467_v63, 0.0  ;;  %v2473_v55 = vadd.f32 %v8998_v49, %v2445_v19 }
 0x8b4   : > { %v2486_v32 = vmax.f32 %v2470_v46, 0.0  ;;  %v2477_v57 = vadd.f32 %v8998_v49, %v2449_v43  ;;  %v4746_v46 = vpop.f32.mrb[56].mxu1 }
 0x8b5   : > { %6345 = vrot.lane.b32.xlu1 %v6344_v3, %s6933_s28  ;;  %v4063_v3 = vsel %vm1568_vm1, %v4061_v11, %v4062_v53  ;;  %v2481_v58 = vmax.f32 %v2465_v21, 0.0  ;;  %v2484_v34 = vmax.f32 %v2468_v4, 0.0  ;;  %v2471_v11 = vadd.f32 %v8998_v49, %v2443_v56  ;;  %v4822_v4 = vld [vmem:[%s7097_s21] sm:$0x3] }
 0x8b6   : > { %4124 = vrot.lane.b32.xlu0 %v4108_v9, %s6933_s28  ;;  %v2485_v9 = vmax.f32 %v2469_v33, 0.0  ;;  %v2474_v53 = vadd.f32 %v8980_v6, %v2446_v42  ;;  %v2489_v37 = vmax.f32 %v2473_v55, 0.0  ;;  %v9077_v63 = vrot.slane %v4822_v4, %v7786_v29  ;;  %v4748_v33 = vpop.f32.mrb[57].mxu1 }
 0x8b7   : > { %v2487_v62 = vmax.f32 %v2471_v11, 0.0  ;;  %v4752_v11 = vpop.f32.mrb[58].mxu1 }
 0x8b8   : > { %v2490_v24 = vmax.f32 %v2474_v53, 0.0  ;;  %v4754_v53 = vpop.f32.mrb[59].mxu1 }
 0x8b9   : > { %4126 = vrot.lane.b32.xlu1 %v4111_v2, %s6933_s28  ;;  %v2476_v2 = vadd.f32 %v8980_v6, %v2448_v44  ;;  %v4758_v23 = vpop.f32.mrb[60].mxu1 }
 0x8ba   : > { %4078 = vrot.lane.b32.xlu0 %v4063_v3, %s6934_s16  ;;  %v2450_v3 = vmul.f32 %v8970_v12, %v8241_v52  ;;  %v2451_v52 = vmul.f32 %v8983_v26, %v8243_v10  ;;  %v2493_v12 = vmax.f32 %v2477_v57, 0.0  ;;  %v4008_v10 = vrot.slane %v8778_v41, 4  ;;  %s9511_s16 = sld [smem:[#allocation52_spill]] }
 0x8bb   : > { %v2492_v47 = vmax.f32 %v2476_v2, 0.0  ;;  %v4012_v57 = vrot.slane %v8803_v54, 4 }
 0x8bc   : > { %v2479_v21 = vadd.f32 %v8998_v49, %v2451_v52 }
 0x8bd   : > { %4882 = vrot.lane.b32.xlu1 %v2480_v39, %s6933_s28  ;;  %v2478_v39 = vadd.f32 %v8980_v6, %v2450_v3 }
 0x8be   : > { %3998 = vrot.lane.b32.xlu0 %v3983_v7, %s6935_s25  ;;  %v2495_v6 = vmax.f32 %v2479_v21, 0.0  ;;  %v4794_v7 = vmul.f32 0.11111111, %v4793_v0  ;;  %s5891_s25 = smul.u32 6144, %s7125_s0  ;;  %s9370_s0 = scalar_lea.sflag [#allocation4], %s1151_s4 }
 0x8bf   : > { %v2494_v8 = vmax.f32 %v2478_v39, 0.0 }
 0x8c0   : > { %v9070_v45 = vrot.slane %v4794_v7, %v7786_v29  ;;  %v9073_v49 = vrot.slane %v4794_v7, %v7789_v40  ;;  %s9360_s8 = scalar_lea.hbm %s7102_s3, %s5891_s25 }
 0x8c1   : > { %4886 = vrot.lane.b32.xlu1 %v2482_v16, %s6933_s28  ;;  %v4009_v16 = vrot.slane %v8781_v48, 4  ;;  %v9081_v48 = vrot.slane %v4822_v4, %v7789_v40 }
 0x8c2   : > { %4884 = vrot.lane.b32.xlu0 %v2481_v58, %s6933_s28  ;;  %v4807_v56 = vmul.f32 %v9073_v49, %v4748_v33  ;;  %v4809_v44 = vmul.f32 %v9073_v49, %v4754_v53  ;;  %v4810_v3 = vmul.f32 %v9070_v45, %v4758_v23 }
 0x8c3   : > { %v4010_v58 = vsel %vm1748_vm6, %v4008_v10, %v4009_v16 }
 0x8c4   : > { %v4835_v36 = vadd.f32 %v9081_v48, %v4807_v56  ;;  %v4837_v55 = vadd.f32 %v9081_v48, %v4809_v44 }
 0x8c5   : > { %4890 = vrot.lane.b32.xlu1 %v2484_v34, %s6933_s28 }
 0x8c6   : > { %4888 = vrot.lane.b32.xlu0 %v2483_v30, %s6933_s28  ;;  %v4806_v30 = vmul.f32 %v9070_v45, %v4746_v46  ;;  %v4853_v43 = vmax.f32 %v4837_v55, 0.0 }
 0x8c9   : > { %4894 = vrot.lane.b32.xlu1 %v2486_v32, %s6933_s28  ;;  %v4834_v32 = vadd.f32 %v9077_v63, %v4806_v30 }
 0x8ca   : > { %4892 = vrot.lane.b32.xlu0 %v2485_v9, %s6933_s28  ;;  %v4851_v9 = vmax.f32 %v4835_v36, 0.0 }
 0x8cb   : > { %v4850_v42 = vmax.f32 %v4834_v32, 0.0 }
 0x8cd   : > { %4898 = vrot.lane.b32.xlu1 %v2488_v25, %s6933_s28  ;;  %v4808_v25 = vmul.f32 %v9070_v45, %v4752_v11 }
 0x8ce   : > { %4896 = vrot.lane.b32.xlu0 %v2487_v62, %s6933_s28 }
 0x8cf   : > { %v4836_v62 = vadd.f32 %v9077_v63, %v4808_v25 }
 0x8d1   : > { %4902 = vrot.lane.b32.xlu1 %v2490_v24, %s6933_s28  ;;  %v4852_v2 = vmax.f32 %v4836_v62, 0.0 }
 0x8d2   : > { %4900 = vrot.lane.b32.xlu0 %v2489_v37, %s6933_s28  ;;  %v4760_v37 = vpop.f32.mrb[61].mxu1 }
 0x8d3   : > { %v4764_v21 = vpop.f32.mrb[62].mxu1 }
 0x8d4   : > { %v4812_v16 = vmul.f32 %v9070_v45, %v4764_v21  ;;  %v4766_v10 = vpop.f32.mrb[63].mxu1 }
 0x8d5   : > { %4906 = vrot.lane.b32.xlu1 %v2492_v47, %s6933_s28  ;;  %v4811_v47 = vmul.f32 %v9073_v49, %v4760_v37  ;;  %v4813_v54 = vmul.f32 %v9073_v49, %v4766_v10  ;;  %v4770_v32 = vpop.f32.mrb[64].mxu1 }
 0x8d6   : > { %4904 = vrot.lane.b32.xlu0 %v2491_v15, %s6933_s28  ;;  %v4838_v15 = vadd.f32 %v9077_v63, %v4810_v3  ;;  %v4840_v46 = vadd.f32 %v9077_v63, %v4812_v16  ;;  %v4814_v11 = vmul.f32 %v9070_v45, %v4770_v32  ;;  %v4014_v3 = vrot.slane %v8824_v18, 4 }
 0x8d8   : > { %v4854_v7 = vmax.f32 %v4838_v15, 0.0  ;;  %v4842_v23 = vadd.f32 %v9077_v63, %v4814_v11 }
 0x8d9   : > { %4910 = vrot.lane.b32.xlu1 %v2494_v8, %s6933_s28  ;;  %v4011_v8 = vrot.slane %v8800_v14, 4 }
 0x8da   : > { %4908 = vrot.lane.b32.xlu0 %v2493_v12, %s6933_s28  ;;  %v4839_v12 = vadd.f32 %v9081_v48, %v4811_v47  ;;  %v4858_v47 = vmax.f32 %v4842_v23, 0.0 }
 0x8dd   : > { %4954 = vrot.lane.b32.xlu1 %v4850_v42, %s6933_s28 }
 0x8de   : > { %4912 = vrot.lane.b32.xlu0 %v2495_v6, %s6933_s28 }
 0x8e1   : > { %4958 = vrot.lane.b32.xlu1 %v4852_v2, %s6933_s28  ;;  %v4015_v2 = vrot.slane %v8827_v60, 4 }
 0x8e2   : > { %4956 = vrot.lane.b32.xlu0 %v4851_v9, %s6933_s28  ;;  %v4856_v9 = vmax.f32 %v4840_v46, 0.0 }
 0x8e5   : > { %4962 = vrot.lane.b32.xlu1 %v4854_v7, %s6933_s28 }
 0x8e6   : > { %4960 = vrot.lane.b32.xlu0 %v4853_v43, %s6933_s28 }
 0x8e9   : > { %4966 = vrot.lane.b32.xlu1 %v4856_v9, %s6933_s28 }
 0x8ec   : > { %v4065_v26 = vpop.permute.xlu1 %4064 }
 0x8ed   : > { %v4160_v5 = vsel %vm1878_vm7, %v4010_v58, %v4065_v26  ;;  %v4855_v58 = vmax.f32 %v4839_v12, 0.0  ;;  %4970 = vrot.lane.b32.xlu1 %v4858_v47, %s6933_s28  ;;  %v4016_v12 = vsel %vm1748_vm6, %v4014_v3, %v4015_v2 }
 0x8ef   : > { %4964 = vrot.lane.b32.xlu0 %v4855_v58, %s6933_s28 }
 0x8f0   : > { %v4113_v34 = vpop.permute.xlu1 %4112 }
 0x8f1   : > { %v4168_v28 = vsel %vm1183_vm0, %v4160_v5, %v4113_v34 }
 0x8f2   : > { %5438 = vmatprep.mubr.msk.f32.mxu0 %vm1895_vm8, %v4168_v28  ;;  %v4013_v28 = vsel %vm1748_vm6, %v4011_v8, %v4012_v57 }
 0x8f5   : > { %v4067_v52 = vpop.permute.xlu1 %4066 }
 0x8f6   : > { %v4161_v36 = vsel %vm1878_vm7, %v4013_v28, %v4067_v52 }
 0x8f8   : > { %v6296_v19 = vpop.permute.xlu0 %6295 }
 0x8f9   : > { %v6297_v61 = vunpack.i.l.bf16 %v6296_v19  ;;  %v6298_v6 = vunpack.i.h.bf16 %v6296_v19  ;;  %v4772_v19 = vpop.f32.mrb[65].mxu1 }
 0x8fa   : > { %v4815_v62 = vmul.f32 %v9073_v49, %v4772_v19  ;;  %v4021_v19 = vrot.slane %v8874_v59, 4 }
 0x8fb   : > { %v4136_v26 = vsel %vm1878_vm7, %v8778_v41, %v6297_v61  ;;  %v4841_v41 = vadd.f32 %v9081_v48, %v4813_v54  ;;  %v4137_v53 = vsel %vm1878_vm7, %v8800_v14, %v6298_v6  ;;  %v4018_v6 = vrot.slane %v8847_v1, 4 }
 0x8fc   : > { %v6301_v24 = vpop.permute.xlu0 %6300  ;;  %v4843_v14 = vadd.f32 %v9081_v48, %v4815_v62  ;;  %v4020_v62 = vrot.slane %v8871_v38, 4 }
 0x8fd   : > { %v6302_v39 = vunpack.i.l.bf16 %v6301_v24  ;;  %v6303_v5 = vunpack.i.h.bf16 %v6301_v24  ;;  %v4857_v44 = vmax.f32 %v4841_v41, 0.0 }
 0x8fe   : > { %v4859_v57 = vmax.f32 %v4843_v14, 0.0  ;;  %v4022_v14 = vsel %vm1748_vm6, %v4020_v62, %v4021_v19  ;;  %v4030_v19 = vrot.slane %v8928_v20, 4 }
 0x8ff   : > { %v4144_v34 = vsel %vm1183_vm0, %v4136_v26, %v6302_v39  ;;  %v4145_v55 = vsel %vm1183_vm0, %v4137_v53, %v6303_v5  ;;  %4968 = vrot.lane.b32.xlu0 %v4857_v44, %s6933_s28  ;;  %v4776_v39 = vpop.f32.mrb[66].mxu1 }
 0x900   : > { %v6306_v0 = vpop.permute.xlu0 %6305  ;;  %v4816_v52 = vmul.f32 %v9070_v45, %v4776_v39  ;;  %v4778_v8 = vpop.f32.mrb[67].mxu1 }
 0x901   : > { %v6307_v4 = vunpack.i.l.bf16 %v6306_v0  ;;  %v6308_v30 = vunpack.i.h.bf16 %v6306_v0  ;;  %v4817_v60 = vmul.f32 %v9073_v49, %v4778_v8  ;;  %v4017_v0 = vrot.slane %v8844_v51, 4 }
 0x902   : > { %v4844_v7 = vadd.f32 %v9077_v63, %v4816_v52 }
 0x903   : > { %v4152_v33 = vsel %vm1895_vm8, %v4144_v34, %v6307_v4  ;;  %v9112_v56 = vpop.permute.xlu1 %6310  ;;  %v4153_v24 = vsel %vm1895_vm8, %v4145_v55, %v6308_v30  ;;  %4972 = vrot.lane.b32.xlu0 %v4859_v57, %s6933_s28  ;;  %v4845_v58 = vadd.f32 %v9081_v48, %v4817_v60 }
 0x904   : > { %v4115_v42 = vpop.permute.xlu0 %4114  ;;  %4321 = vmatmul.mubr.f32.vlgmr.msra.gmra.mrb[56].mxu0 %v4152_v33  ;;  %v6312_v61 = vunpack.i.l.bf16 %v9112_v56  ;;  %v6313_v54 = vunpack.i.h.bf16 %v9112_v56  ;;  %v4860_v34 = vmax.f32 %v4844_v7, 0.0  ;;  %v4019_v56 = vsel %vm1748_vm6, %v4017_v0, %v4018_v6 }
 0x905   : > { %v4169_v25 = vsel %vm1183_vm0, %v4161_v36, %v4115_v42  ;;  %v4861_v30 = vmax.f32 %v4845_v58, 0.0  ;;  %v4024_v6 = vrot.slane %v8891_v50, 4  ;;  %v4023_v7 = vrot.slane %v8888_v22, 4 }
 0x906   : > { %5439 = vmatprep.mubr.msk.f32.mxu0 %vm1895_vm8, %v4169_v25  ;;  %v4138_v4 = vsel %vm1878_vm7, %v8824_v18, %v6312_v61  ;;  %4974 = vrot.lane.b32.xlu1 %v4860_v34, %s6933_s28  ;;  %v4782_v18 = vpop.f32.mrb[68].mxu1  ;;  %v4139_v11 = vsel %vm1878_vm7, %v8844_v51, %v6313_v54 }
 0x907   : > { %v6316_v37 = vpop.permute.xlu1 %6315  ;;  %v4818_v36 = vmul.f32 %v9070_v45, %v4782_v18  ;;  %v4784_v42 = vpop.f32.mrb[69].mxu1  ;;  %4976 = vrot.lane.b32.xlu0 %v4861_v30, %s6933_s28  ;;  %v4025_v58 = vsel %vm1748_vm6, %v4023_v7, %v4024_v6 }
 0x908   : > { %4327 = vmatmul.mubr.f32.gmra.mrb[58].mxu0 %v4153_v24  ;;  %v4069_v43 = vpop.permute.xlu0 %4068  ;;  %v6317_v15 = vunpack.i.l.bf16 %v6316_v37  ;;  %v6318_v46 = vunpack.i.h.bf16 %v6316_v37  ;;  %v4819_v25 = vmul.f32 %v9073_v49, %v4784_v42  ;;  %v4788_v37 = vpop.f32.mrb[70].mxu1 }
 0x909   : > { %v4162_v16 = vsel %vm1878_vm7, %v4016_v12, %v4069_v43  ;;  %v4846_v55 = vadd.f32 %v9077_v63, %v4818_v36  ;;  %v4820_v61 = vmul.f32 %v9070_v45, %v4788_v37  ;;  %v4790_v43 = vpop.f32.mrb[71].mxu1 }
 0x90a   : > { %v4146_v1 = vsel %vm1183_vm0, %v4138_v4, %v6317_v15  ;;  %v4147_v44 = vsel %vm1183_vm0, %v4139_v11, %v6318_v46  ;;  %v4847_v2 = vadd.f32 %v9081_v48, %v4819_v25  ;;  %v4821_v15 = vmul.f32 %v9073_v49, %v4790_v43 }
 0x90b   : > { %v6321_v21 = vpop.permute.xlu1 %6320  ;;  %v4862_v59 = vmax.f32 %v4846_v55, 0.0  ;;  %v4848_v8 = vadd.f32 %v9077_v63, %v4820_v61  ;;  %v4029_v25 = vrot.slane %v8925_v35, 4 }
 0x90c   : > { %v4117_v10 = vpop.permute.xlu0 %4116  ;;  %v6322_v26 = vunpack.i.l.bf16 %v6321_v21  ;;  %v6323_v33 = vunpack.i.h.bf16 %v6321_v21  ;;  %v4863_v3 = vmax.f32 %v4847_v2, 0.0  ;;  %v4849_v45 = vadd.f32 %v9081_v48, %v4821_v15 }
 0x90d   : > { %v4170_v5 = vsel %vm1183_vm0, %v4162_v16, %v4117_v10  ;;  %4978 = vrot.lane.b32.xlu1 %v4862_v59, %s6933_s28  ;;  %v4864_v21 = vmax.f32 %v4848_v8, 0.0  ;;  %v4031_v20 = vsel %vm1748_vm6, %v4029_v25, %v4030_v19  ;;  %v1378_v59 = vmax.f32 %v7834_v17, 0.0 }
 0x90e   : > { %5440 = vmatprep.mubr.msk.f32.mxu0 %vm1895_vm8, %v4170_v5  ;;  %v4154_v28 = vsel %vm1895_vm8, %v4146_v1, %v6322_v26  ;;  %v4155_v23 = vsel %vm1895_vm8, %v4147_v44, %v6323_v33  ;;  %4980 = vrot.lane.b32.xlu0 %v4863_v3, %s6933_s28  ;;  %v4865_v49 = vmax.f32 %v4849_v45, 0.0  ;;  %v4027_v33 = vrot.slane %v8920_v31, 4 }
 0x90f   : > { %v4119_v41 = vpop.permute.xlu1 %4118  ;;  %4333 = vmatmul.mubr.f32.gmra.mrb[60].mxu0 %v4154_v28  ;;  %v1380_v17 = vmax.f32 %v7850_v27, 0.0 }
 0x910   : > { %v4071_v32 = vpop.permute.xlu0 %4070 }
 0x911   : > { %v4163_v9 = vsel %vm1878_vm7, %v4019_v56, %v4071_v32  ;;  %4982 = vrot.lane.b32.xlu1 %v4864_v21, %s6933_s28  ;;  %v9505_v21 = vld [vmem:[#allocation60_spill] sm:$0xff] }
 0x912   : > { %v4171_v53 = vsel %vm1183_vm0, %v4163_v9, %v4119_v41  ;;  %4984 = vrot.lane.b32.xlu0 %v4865_v49, %s6933_s28  ;;  %v4026_v41 = vrot.slane %v8917_v13, 4  ;;  %v1384_v6 = vmax.f32 %v9505_v21, 0.0  ;;  %s9510_s28 = sld [smem:[#allocation51_spill]] }
 0x913   : > { %5441 = vmatprep.mubr.msk.f32.mxu0 %vm1895_vm8, %v4171_v53  ;;  %v4073_v24 = vpop.permute.xlu1 %4072 }
 0x914   : > { %4339 = vmatmul.mubr.f32.gmra.mrb[62].mxu0 %v4155_v23  ;;  %v6326_v51 = vpop.permute.xlu0 %6325  ;;  %v4164_v47 = vsel %vm1878_vm7, %v4022_v14, %v4073_v24  ;;  %v4028_v36 = vsel %vm1748_vm6, %v4026_v41, %v4027_v33 }
 0x915   : > { %v6327_v60 = vunpack.i.l.bf16 %v6326_v51  ;;  %v6328_v10 = vunpack.i.h.bf16 %v6326_v51 }
 0x917   : > { %v4121_v39 = vpop.permute.xlu1 %4120  ;;  %v4140_v63 = vsel %vm1878_vm7, %v8871_v38, %v6327_v60  ;;  %v4141_v38 = vsel %vm1878_vm7, %v8888_v22, %v6328_v10  ;;  %v9506_v10 = vld [vmem:[#allocation61_spill] sm:$0xff] }
 0x918   : > { %v4172_v57 = vsel %vm1183_vm0, %v4164_v47, %v4121_v39  ;;  %v6331_v52 = vpop.permute.xlu0 %6330 }
 0x919   : > { %5442 = vmatprep.mubr.msk.f32.mxu0 %vm1895_vm8, %v4172_v57  ;;  %v6332_v12 = vunpack.i.l.bf16 %v6331_v52  ;;  %v6333_v4 = vunpack.i.h.bf16 %v6331_v52  ;;  %v9504_v52 = vld [vmem:[#allocation59_spill] sm:$0xff] }
 0x91a   : > { %v1382_v8 = vmax.f32 %v9504_v52, 0.0  ;;  %v4369_v52 = vld [vmem:[%s9510_s28] sm:$0x3]  ;;  %s6791_s28 = scalar_lea.vmem %s6790_s10, 12288 }
 0x91b   : > { %v4075_v0 = vpop.permute.xlu1 %4074  ;;  %v4148_v48 = vsel %vm1183_vm0, %v4140_v63, %v6332_v12  ;;  %v4149_v28 = vsel %vm1183_vm0, %v4141_v38, %v6333_v4  ;;  %v9508_v38 = vld [vmem:[#allocation63_spill] sm:$0xff]  ;;  %p6793_p9 = scmp.lt.s32.totalorder %s6791_s28, %s6785_s22 }
 0x91c   : > { %v6336_v16 = vpop.permute.xlu0 %6335  ;;  %v4165_v1 = vsel %vm1878_vm7, %v4025_v58, %v4075_v0 }
 0x91d   : > { %v6337_v26 = vunpack.i.l.bf16 %v6336_v16  ;;  %v6338_v50 = vunpack.i.h.bf16 %v6336_v16  ;;  %p6794_p10 = por %p6793_p9, %p6792_p6 }
 0x91f   : > { %v4156_v54 = vsel %vm1895_vm8, %v4148_v48, %v6337_v26  ;;  %v3997_v5 = vpop.permute.xlu1 %3996  ;;  %v4157_v30 = vsel %vm1895_vm8, %v4149_v28, %v6338_v50  ;;  %v1386_v26 = vmax.f32 %v9506_v10, 0.0  ;;  %v9507_v50 = vld [vmem:[#allocation62_spill] sm:$0xff]  ;;  %v1390_v28 = vmax.f32 %v9508_v38, 0.0  ;;  %p6795_p7 = pnand %p6794_p10, %p6788_p5 }
 0x920   : > { %v4123_v34 = vpop.permute.xlu0 %4122  ;;  %4345 = vmatmul.mubr.f32.gmra.mrb[64].mxu0 %v4156_v54  ;;  %v1388_v54 = vmax.f32 %v9507_v50, 0.0 }
 0x921   : > { %v4173_v46 = vsel %vm1183_vm0, %v4165_v1, %v4123_v34 }
 0x922   : > { %5443 = vmatprep.mubr.msk.f32.mxu0 %vm1895_vm8, %v4173_v46 }
 0x923   : > { %v6341_v18 = vpop.permute.xlu1 %6340 }
 0x924   : > { %4351 = vmatmul.mubr.f32.gmra.mrb[66].mxu0 %v4157_v30  ;;  %v4077_v32 = vpop.permute.xlu0 %4076  ;;  %v6342_v56 = vunpack.i.l.bf16 %v6341_v18  ;;  %v6343_v62 = vunpack.i.h.bf16 %v6341_v18 }
 0x925   : > { %v4166_v9 = vsel %vm1878_vm7, %v4028_v36, %v4077_v32  ;;  %v9509_v32 = vld [vmem:[#allocation64_spill] sm:$0xff] }
 0x926   : > { %v4142_v31 = vsel %vm1878_vm7, %v8917_v13, %v6342_v56  ;;  %v4143_v37 = vsel %vm1878_vm7, %v8925_v35, %v6343_v62  ;;  %v1392_v56 = vmax.f32 %v9509_v32, 0.0 }
 0x927   : > { %v6346_v42 = vpop.permute.xlu1 %6345 }
 0x928   : > { %v4125_v22 = vpop.permute.xlu0 %4124  ;;  %v6347_v11 = vunpack.i.l.bf16 %v6346_v42  ;;  %v6348_v24 = vunpack.i.h.bf16 %v6346_v42 }
 0x929   : > { %v4174_v53 = vsel %vm1183_vm0, %v4166_v9, %v4125_v22 }
 0x92a   : > { %5444 = vmatprep.mubr.msk.f32.mxu0 %vm1895_vm8, %v4174_v53  ;;  %v4150_v44 = vsel %vm1183_vm0, %v4142_v31, %v6347_v11  ;;  %v4151_v43 = vsel %vm1183_vm0, %v4143_v37, %v6348_v24 }
 0x92b   : > { %v4127_v55 = vpop.permute.xlu1 %4126  ;;  %v4158_v23 = vsel %vm1895_vm8, %v4150_v44, %v3997_v5 }
 0x92c   : > { %v4079_v2 = vpop.permute.xlu0 %4078  ;;  %4357 = vmatmul.mubr.f32.gmra.mrb[68].mxu0 %v4158_v23 }
 0x92d   : > { %v4167_v51 = vsel %vm1878_vm7, %v4031_v20, %v4079_v2 }
 0x92e   : > { %v4175_v13 = vsel %vm1183_vm0, %v4167_v51, %v4127_v55 }
 0x92f   : > { %5445 = vmatprep.mubr.msk.f32.mxu0 %vm1895_vm8, %v4175_v13  ;;  %v4883_v3 = vpop.permute.xlu1 %4882 }
 0x930   : > { %v3999_v14 = vpop.permute.xlu0 %3998  ;;  %v5010_v61 = vsel %vm1183_vm0, %v1378_v59, %v4883_v3 }
 0x931   : > { %5027 = vst [vmem:[%s7845_s1 + $0x8] sm:$0xff] %v5010_v61  ;;  %v4159_v47 = vsel %vm1895_vm8, %v4151_v43, %v3999_v14 }
 0x932   : > { %4363 = vmatmul.mubr.f32.gmra.mrb[70].mxu0 %v4159_v47 }
 0x933   : > { %v4887_v39 = vpop.permute.xlu1 %4886 }
 0x934   : > { %v4885_v15 = vpop.permute.xlu0 %4884  ;;  %v5011_v57 = vsel %vm1183_vm0, %v1380_v17, %v4887_v39 }
 0x935   : > { %v4914_v35 = vsel %vm1183_vm0, %v4883_v3, %v4885_v15  ;;  %5033 = vst [vmem:[%s7845_s1 + $0x38] sm:$0xff] %v5011_v57 }
 0x936   : > { %5028 = vst [vmem:[%s7845_s1 + $0x10] sm:$0xff] %v4914_v35 }
 0x937   : > { %v4891_v60 = vpop.permute.xlu1 %4890 }
 0x938   : > { %v4889_v45 = vpop.permute.xlu0 %4888  ;;  %v5012_v12 = vsel %vm1183_vm0, %v1382_v8, %v4891_v60  ;;  %v4397_v8 = vld [vmem:[%s9511_s16] sm:$0x3] }
 0x939   : > { %v4915_v27 = vsel %vm1183_vm0, %v4887_v39, %v4889_v45  ;;  %5039 = vst [vmem:[%s7845_s1 + $0x68] sm:$0xff] %v5012_v12  ;;  %v9291_v45 = vrot.slane %v4369_v52, %v7789_v40  ;;  %v9294_v12 = vrot.slane %v4397_v8, %v7786_v29  ;;  %v9297_v21 = vrot.slane %v4397_v8, %v7789_v40 }
 0x93a   : > { %5034 = vst [vmem:[%s7845_s1 + $0x40] sm:$0xff] %v4915_v27 }
 0x93b   : > { %v4895_v0 = vpop.permute.xlu1 %4894 }
 0x93c   : > { %v4893_v7 = vpop.permute.xlu0 %4892  ;;  %v5013_v49 = vsel %vm1183_vm0, %v1384_v6, %v4895_v0 }
 0x93d   : > { %v4916_v16 = vsel %vm1183_vm0, %v4891_v60, %v4893_v7  ;;  %5045 = vst [vmem:[%s7845_s1 + $0x98] sm:$0xff] %v5013_v49  ;;  %v9288_v60 = vrot.slane %v4369_v52, %v7786_v29 }
 0x93e   : > { %5040 = vst [vmem:[%s7845_s1 + $0x70] sm:$0xff] %v4916_v16 }
 0x93f   : > { %v4899_v63 = vpop.permute.xlu1 %4898 }
 0x940   : > { %v4897_v4 = vpop.permute.xlu0 %4896  ;;  %v5014_v48 = vsel %vm1183_vm0, %v1386_v26, %v4899_v63 }
 0x941   : > { %v4917_v58 = vsel %vm1183_vm0, %v4895_v0, %v4897_v4  ;;  %5051 = vst [vmem:[%s7845_s1 + $0xc8] sm:$0xff] %v5014_v48 }
 0x942   : > { %5046 = vst [vmem:[%s7845_s1 + $0xa0] sm:$0xff] %v4917_v58 }
 0x943   : > { %v4903_v5 = vpop.permute.xlu1 %4902 }
 0x944   : > { %v4901_v1 = vpop.permute.xlu0 %4900  ;;  %v5015_v34 = vsel %vm1183_vm0, %v1388_v54, %v4903_v5 }
 0x945   : > { %v4918_v46 = vsel %vm1183_vm0, %v4899_v63, %v4901_v1  ;;  %5057 = vst [vmem:[%s7845_s1 + $0xf8] sm:$0xff] %v5015_v34 }
 0x946   : > { %5052 = vst [vmem:[%s7845_s1 + $0xd0] sm:$0xff] %v4918_v46 }
 0x947   : > { %v4907_v30 = vpop.permute.xlu1 %4906 }
 0x948   : > { %v4905_v33 = vpop.permute.xlu0 %4904  ;;  %v5016_v41 = vsel %vm1183_vm0, %v1390_v28, %v4907_v30 }
 0x949   : > { %v4919_v18 = vsel %vm1183_vm0, %v4903_v5, %v4905_v33  ;;  %5063 = vst [vmem:[%s7845_s1 + $0x128] sm:$0xff] %v5016_v41 }
 0x94a   : > { %5058 = vst [vmem:[%s7845_s1 + $0x100] sm:$0xff] %v4919_v18 }
 0x94b   : > { %v4911_v36 = vpop.permute.xlu1 %4910 }
 0x94c   : > { %v4909_v42 = vpop.permute.xlu0 %4908  ;;  %v5017_v9 = vsel %vm1183_vm0, %v1392_v56, %v4911_v36 }
 0x94d   : > { %v4920_v22 = vsel %vm1183_vm0, %v4907_v30, %v4909_v42  ;;  %5069 = vst [vmem:[%s7845_s1 + $0x158] sm:$0xff] %v5017_v9 }
 0x94e   : > { %5064 = vst [vmem:[%s7845_s1 + $0x130] sm:$0xff] %v4920_v22 }
 0x94f   : > { %v4955_v25 = vpop.permute.xlu1 %4954 }
 0x950   : > { %v4913_v11 = vpop.permute.xlu0 %4912 }
 0x951   : > { %v4921_v19 = vsel %vm1183_vm0, %v4911_v36, %v4913_v11 }
 0x952   : > { %5070 = vst [vmem:[%s7845_s1 + $0x160] sm:$0xff] %v4921_v19 }
 0x953   : > { %v4959_v44 = vpop.permute.xlu1 %4958 }
 0x954   : > { %v4957_v53 = vpop.permute.xlu0 %4956 }
 0x955   : > { %v4986_v31 = vsel %vm1183_vm0, %v4955_v25, %v4957_v53 }
 0x956   : > { %5031 = vst [vmem:[%s7845_s1 + $0x28] sm:$0xff] %v4986_v31 }
 0x957   : > { %v9253_v62 = vpop.permute.xlu1 %4962 }
 0x958   : > { %v4961_v55 = vpop.permute.xlu0 %4960 }
 0x959   : > { %v4987_v23 = vsel %vm1183_vm0, %v4959_v44, %v4961_v55 }
 0x95a   : > { %5037 = vst [vmem:[%s7845_s1 + $0x58] sm:$0xff] %v4987_v23 }
 0x95b   : > { %v9257_v24 = vpop.permute.xlu1 %4966 }
 0x95f   : > { %v9262_v51 = vpop.permute.xlu1 %4970 }
 0x961   : > { %v4965_v2 = vpop.permute.xlu0 %4964 }
 0x962   : > { %v4988_v20 = vsel %vm1183_vm0, %v9253_v62, %v4965_v2 }
 0x963   : > { %5043 = vst [vmem:[%s7845_s1 + $0x88] sm:$0xff] %v4988_v20 }
 0x971   : > { %v4969_v59 = vpop.permute.xlu0 %4968 }
 0x972   : > { %v4989_v13 = vsel %vm1183_vm0, %v9257_v24, %v4969_v59 }
 0x973   : > { %5049 = vst [vmem:[%s7845_s1 + $0xb8] sm:$0xff] %v4989_v13 }
 0x975   : > { %v4973_v3 = vpop.permute.xlu0 %4972 }
 0x976   : > { %v4990_v37 = vsel %vm1183_vm0, %v9262_v51, %v4973_v3 }
 0x977   : > { %5055 = vst [vmem:[%s7845_s1 + $0xe8] sm:$0xff] %v4990_v37 }
 0x978   : > { %v9269_v14 = vpop.permute.xlu1 %4974 }
 0x979   : > { %v4977_v61 = vpop.permute.xlu0 %4976 }
 0x97a   : > { %v4991_v43 = vsel %vm1183_vm0, %v9269_v14, %v4977_v61 }
 0x97b   : > { %5061 = vst [vmem:[%s7845_s1 + $0x118] sm:$0xff] %v4991_v43 }
 0x97f   : > { %v9275_v47 = vpop.permute.xlu1 %4978 }
 0x980   : > { %v4981_v17 = vpop.permute.xlu0 %4980 }
 0x981   : > { %v4992_v39 = vsel %vm1183_vm0, %v9275_v47, %v4981_v17 }
 0x982   : > { %5067 = vst [vmem:[%s7845_s1 + $0x148] sm:$0xff] %v4992_v39 }
 0x983   : > { %v9280_v15 = vpop.permute.xlu1 %4982 }
 0x984   : > { %v4985_v57 = vpop.permute.xlu0 %4984 }
 0x985   : > { %v4993_v35 = vsel %vm1183_vm0, %v9280_v15, %v4985_v57 }
 0x986   : > { %5073 = vst [vmem:[%s7845_s1 + $0x178] sm:$0xff] %v4993_v35 }
 0x9d7   : > { %v4322_v27 = vpop.f32.mrb[56].mxu0 }
 0x9d8   : > { %v4381_v6 = vmul.f32 %v9288_v60, %v4322_v27  ;;  %v4324_v0 = vpop.f32.mrb[57].mxu0 }
 0x9d9   : > { %v4382_v7 = vmul.f32 %v9291_v45, %v4324_v0 }
 0x9da   : > { %v4409_v49 = vadd.f32 %v9294_v12, %v4381_v6 }
 0x9db   : > { %v4410_v16 = vadd.f32 %v9297_v21, %v4382_v7  ;;  %v4328_v10 = vpop.f32.mrb[58].mxu0 }
 0x9dc   : > { %v4425_v26 = vmax.f32 %v4409_v49, 0.0  ;;  %v4383_v29 = vmul.f32 %v9288_v60, %v4328_v10  ;;  %v4330_v63 = vpop.f32.mrb[59].mxu0 }
 0x9dd   : > { %v4426_v4 = vmax.f32 %v4410_v16, 0.0  ;;  %v4384_v40 = vmul.f32 %v9291_v45, %v4330_v63 }
 0x9de   : > { %5029 = vst [vmem:[%s7845_s1 + $0x18] sm:$0xff] %v4425_v26  ;;  %v4411_v48 = vadd.f32 %v9294_v12, %v4383_v29 }
 0x9df   : > { %v4412_v58 = vadd.f32 %v9297_v21, %v4384_v40  ;;  %v5018_v50 = vsel %vm1183_vm0, %v4426_v4, %v4955_v25 }
 0x9e0   : > { %v4427_v54 = vmax.f32 %v4411_v48, 0.0  ;;  %5030 = vst [vmem:[%s7845_s1 + $0x20] sm:$0xff] %v5018_v50 }
 0x9e1   : > { %v4428_v5 = vmax.f32 %v4412_v58, 0.0 }
 0x9e2   : > { %5035 = vst [vmem:[%s7845_s1 + $0x48] sm:$0xff] %v4427_v54  ;;  %v4334_v1 = vpop.f32.mrb[60].mxu0 }
 0x9e3   : > { %v5019_v34 = vsel %vm1183_vm0, %v4428_v5, %v4959_v44  ;;  %v4385_v46 = vmul.f32 %v9288_v60, %v4334_v1  ;;  %v4336_v38 = vpop.f32.mrb[61].mxu0 }
 0x9e4   : > { %5036 = vst [vmem:[%s7845_s1 + $0x50] sm:$0xff] %v5019_v34  ;;  %v4386_v28 = vmul.f32 %v9291_v45, %v4336_v38 }
 0x9e5   : > { %v4413_v30 = vadd.f32 %v9294_v12, %v4385_v46 }
 0x9e6   : > { %v4414_v33 = vadd.f32 %v9297_v21, %v4386_v28 }
 0x9e7   : > { %v4429_v41 = vmax.f32 %v4413_v30, 0.0  ;;  %v4340_v18 = vpop.f32.mrb[62].mxu0 }
 0x9e8   : > { %v4430_v32 = vmax.f32 %v4414_v33, 0.0  ;;  %v4387_v56 = vmul.f32 %v9288_v60, %v4340_v18  ;;  %v4342_v36 = vpop.f32.mrb[63].mxu0 }
 0x9e9   : > { %5041 = vst [vmem:[%s7845_s1 + $0x78] sm:$0xff] %v4429_v41  ;;  %v4388_v42 = vmul.f32 %v9291_v45, %v4342_v36 }
 0x9ea   : > { %v4415_v9 = vadd.f32 %v9294_v12, %v4387_v56  ;;  %v5020_v22 = vsel %vm1183_vm0, %v4430_v32, %v9253_v62 }
 0x9eb   : > { %v4416_v11 = vadd.f32 %v9297_v21, %v4388_v42  ;;  %5042 = vst [vmem:[%s7845_s1 + $0x80] sm:$0xff] %v5020_v22 }
 0x9ec   : > { %v4431_v19 = vmax.f32 %v4415_v9, 0.0 }
 0x9ed   : > { %v4432_v25 = vmax.f32 %v4416_v11, 0.0 }
 0x9ee   : > { %5047 = vst [vmem:[%s7845_s1 + $0xa8] sm:$0xff] %v4431_v19 }
 0x9ef   : > { %v5021_v53 = vsel %vm1183_vm0, %v4432_v25, %v9257_v24 }
 0x9f0   : > { %5048 = vst [vmem:[%s7845_s1 + $0xb0] sm:$0xff] %v5021_v53 }
 0x9f3   : > { %v4346_v31 = vpop.f32.mrb[64].mxu0 }
 0x9f4   : > { %v4389_v44 = vmul.f32 %v9288_v60, %v4346_v31  ;;  %v4348_v55 = vpop.f32.mrb[65].mxu0 }
 0x9f5   : > { %v4390_v23 = vmul.f32 %v9291_v45, %v4348_v55 }
 0x9f6   : > { %v4417_v62 = vadd.f32 %v9294_v12, %v4389_v44 }
 0x9f7   : > { %v4418_v2 = vadd.f32 %v9297_v21, %v4390_v23  ;;  %v4352_v20 = vpop.f32.mrb[66].mxu0 }
 0x9f8   : > { %v4433_v59 = vmax.f32 %v4417_v62, 0.0  ;;  %v4391_v13 = vmul.f32 %v9288_v60, %v4352_v20  ;;  %v4354_v3 = vpop.f32.mrb[67].mxu0 }
 0x9f9   : > { %v4434_v24 = vmax.f32 %v4418_v2, 0.0  ;;  %v4392_v37 = vmul.f32 %v9291_v45, %v4354_v3 }
 0x9fa   : > { %5053 = vst [vmem:[%s7845_s1 + $0xd8] sm:$0xff] %v4433_v59  ;;  %v4419_v61 = vadd.f32 %v9294_v12, %v4391_v13 }
 0x9fb   : > { %v4420_v43 = vadd.f32 %v9297_v21, %v4392_v37  ;;  %v5022_v17 = vsel %vm1183_vm0, %v4434_v24, %v9262_v51 }
 0x9fc   : > { %v4435_v39 = vmax.f32 %v4419_v61, 0.0  ;;  %5054 = vst [vmem:[%s7845_s1 + $0xe0] sm:$0xff] %v5022_v17 }
 0x9fd   : > { %v4436_v57 = vmax.f32 %v4420_v43, 0.0 }
 0x9fe   : > { %5059 = vst [vmem:[%s7845_s1 + $0x108] sm:$0xff] %v4435_v39 }
 0x9ff   : > { %v5023_v35 = vsel %vm1183_vm0, %v4436_v57, %v9269_v14  ;;  %v4358_v52 = vpop.f32.mrb[68].mxu0 }
 0xa00   : > { %5060 = vst [vmem:[%s7845_s1 + $0x110] sm:$0xff] %v5023_v35  ;;  %v4393_v8 = vmul.f32 %v9288_v60, %v4358_v52  ;;  %v4360_v27 = vpop.f32.mrb[69].mxu0 }
 0xa01   : > { %v4394_v6 = vmul.f32 %v9291_v45, %v4360_v27 }
 0xa02   : > { %v4421_v51 = vadd.f32 %v9294_v12, %v4393_v8 }
 0xa03   : > { %v4422_v0 = vadd.f32 %v9297_v21, %v4394_v6 }
 0xa04   : > { %v4437_v7 = vmax.f32 %v4421_v51, 0.0 }
 0xa05   : > { %v4438_v49 = vmax.f32 %v4422_v0, 0.0  ;;  %v4364_v16 = vpop.f32.mrb[70].mxu0 }
 0xa06   : > { %5065 = vst [vmem:[%s7845_s1 + $0x138] sm:$0xff] %v4437_v7  ;;  %v4395_v14 = vmul.f32 %v9288_v60, %v4364_v16  ;;  %v4366_v10 = vpop.f32.mrb[71].mxu0 }
 0xa07   : > { %v4396_v26 = vmul.f32 %v9291_v45, %v4366_v10  ;;  %v5024_v29 = vsel %vm1183_vm0, %v4438_v49, %v9275_v47 }
 0xa08   : > { %v4423_v63 = vadd.f32 %v9294_v12, %v4395_v14  ;;  %5066 = vst [vmem:[%s7845_s1 + $0x140] sm:$0xff] %v5024_v29 }
 0xa09   : > { %v4424_v4 = vadd.f32 %v9297_v21, %v4396_v26 }
 0xa0a   : > { %v4439_v40 = vmax.f32 %v4423_v63, 0.0 }
 0xa0b   : > { %v4440_v48 = vmax.f32 %v4424_v4, 0.0 }
 0xa0c   : > { %5071 = vst [vmem:[%s7845_s1 + $0x168] sm:$0xff] %v4439_v40 }
 0xa0d   : > { %v5025_v47 = vsel %vm1183_vm0, %v4440_v48, %v9280_v15 }
 0xa0e   : > { %5072 = vst [vmem:[%s7845_s1 + $0x170] sm:$0xff] %v5025_v47 }
 0xa0f   : > { %6798 = shalt.err (!%p6795_p7)
}
 0xa10   : > { %s6799_s4 = scalar_lea.hbm %s9360_s8, 6144  ;;  %s6803_s1 = scalar_lea.hbm %s7102_s3, 12288 }
 0xa11   : > { %p6800_p8 = scmp.ne.s32.totalorder %s9360_s8, %s6799_s4  ;;  %p6804_p1 = scmp.lt.u32.totalorder %s9360_s8, %s7102_s3 }
 0xa12   : > { %p6805_p0 = scmp.lt.u32.totalorder %s6803_s1, %s6799_s4  ;;  %p6807_p3 = scmp.lt.u32.totalorder %s6799_s4, %s9360_s8 }
 0xa13   : > { %p6801_p11 = pnand %p6800_p8, %p9512_p4 }
 0xa14   : > { %p6806_p2 = por %p6805_p0, %p6804_p1 }
 0xa15   : > { %p6802_p13 = pneg %p6801_p11 }
 0xa16   : > { %p6808_p12 = por %p6807_p3, %p6806_p2 }
 0xa18   : > { %p6809_p5 = pnand %p6808_p12, %p6802_p13 }
 0xa1a   : > { %6812 = shalt.err (!%p6809_p5)
}
 0xa1b   : > { %s6937_s16 = smov 768   ;;  %s6938_s25 = smov 48  }
 0xa1c   : > { %5952 = dma.vmem_to_hbm [thread:$0]  (%p9512_p4), %s9363_s11, 6144, %s9360_s8, %s9370_s0, %s6937_s16, %s6937_s16, %s6938_s25  }
 0xa1d PF: > { %s9513_s22 = sld [smem:[#allocation55_spill]]  ;;  %s9514_s26 = sld [smem:[#allocation53_spill]] }
 0xa1e   : > { %s9515_s10 = sld [smem:[#allocation58_spill]] }
 0xa23   : > { %p6034_p6 = scmp.ge.s32.totalorder %s9513_s22, 2  ;;  %s5103_s28 = sand.u32 1, %s9514_s26  }
 0xa24   : > { %p9516_p9 = scmp.ne.s32.totalorder %s9515_s10, 0  ;;  %s5104_s4 = scalar_lea.sflag [#allocation4], %s5103_s28 }
 0xa26   : > { %p6001_p10 = pnand %p6034_p6, %p9516_p9 }
 0xa28   : > { %6862 = dma.done.wait (!%p6001_p10), %s5104_s4, 6144  }
 0xa29   : > { %6864 = vsyncadd (!%p6001_p10), %s5104_s4, 4294961152  ;;  %s9517_s28 = sld [smem:[#allocation56_spill]]  ;;  %s9518_s1 = sld [smem:[#allocation54_spill]] }
 0xa2a   : > { %s9519_s26 = sld [smem:[#allocation57_spill]]  ;;  %s9520_s22 = smov %s6871_s23 }
 0xa2f   : > { %p81_p7 = scmp.ge.s32.totalorder %s9517_s28, 4   ;;  %s9521_s23 = smov %s9518_s1 }
 0xa31   :  { %83 = sbr.rel (!%p81_p7) target bundleno = 63 (0x3f), region = 271 }
 0xa38   :  { %5109 = vsyncpa [#allocation3], 1 }
 0xa39   :  { %5111 = vsyncpa [#allocation3 + $0x1], 1 }
 0xa3a   :  { %5112 = vsyncpa [#allocation6], 1 }
 0xa3b   :  { %5113 = vsyncpa [#allocation9], 1 }
 0xa3c   :  { %5114 = vsyncpa [#allocation12], 1 }
 0xa3d   :  { %5115 = vsyncpa [#allocation15], 1 }
 0xa3e   :  { %5116 = vsyncpa [#allocation18], 1 }
 0xa3f   :  { %5117 = vsyncpa [#allocation21], 1 }
 0xa40   :  { %5118 = vsyncpa [#allocation24], 1 }
 0xa41   :  { %5119 = vsyncpa [#allocation4], 1 }
 0xa42   :  { %5121 = vsyncpa [#allocation4 + $0x1], 1 }

</bundles_post_ra>
